<compile_context>
chip_gen: v7x
topology: tpu7x:2x2x1
jax: 0.10.0
libtpu: 0.0.40
codegen_flags: <defaults>
</compile_context>

<pallas_src>
import functools

import jax
import jax.numpy as jnp
import numpy as np
from jax.experimental import pallas as pl
from jax.experimental.pallas import tpu as pltpu


_PAD_W0 = 8  # sublane offset of the conv interior inside the padded scratch (8-aligned)


# ----------------------- math helpers (in-kernel and host) -----------------------

def _gelu(x):
    # exact (erf-based) GELU, matching torch.nn.GELU() defaults
    return 0.5 * x * (1.0 + jax.lax.erf(x * 0.7071067811865476))


def _mish(x):
    # x * tanh(softplus(x)), numerically stable softplus
    sp = jnp.maximum(x, 0.0) + jnp.log(1.0 + jnp.exp(-jnp.abs(x)))
    return x * jnp.tanh(sp)


# ----------------------------- fused Pallas kernel -----------------------------

def _down_fused_kernel(x_ref, emb_ref,
                       w1_ref, g1w_ref, g1b_ref,
                       w2_ref, g2w_ref, g2b_ref,
                       w3_ref, g3w_ref, g3b_ref,
                       w4_ref, g4w_ref, g4b_ref,
                       o_ref,
                       pad_a, pad_b,
                       *, cin, cout, hp, wp):
    """Whole Down block for one batch sample; activations stay in VMEM."""
    w0 = _PAD_W0

    # Zero the padded-conv scratch buffers; only their interiors are rewritten
    # below, so the 1-pixel halo stays zero for every conv stage.
    pad_a[...] = jnp.zeros_like(pad_a)
    pad_b[...] = jnp.zeros_like(pad_b)

    # ---- MaxPool2d(2), fully in-register ----
    # x_ref: (1, 2*hp, wp, 2*cin); last dim packs (w parity, channel), so the
    # W-pool is a max over the two lane halves and the H-pool is a max over a
    # split leading dim.  No HBM strided slices, no jnp.pad.
    xw = jnp.maximum(x_ref[0, :, :, :cin], x_ref[0, :, :, cin:])   # (2*hp, wp, cin)
    xw = xw.reshape(hp, 2, wp, cin)
    xp = jnp.maximum(xw[:, 0, :, :], xw[:, 1, :, :])               # (hp, wp, cin)
    xp_flat = xp.reshape(hp * wp, cin)

    def conv3x3_gn(pad_ref, n_in, w_ref, gw_ref, gb_ref, apply_gelu):
        # 3x3 conv (padding=1, stride=1, no bias) as 9 shifted MXU matmuls read
        # from the zero-padded VMEM scratch, then GroupNorm(1, C) (+ GELU).
        acc = jnp.zeros((hp * wp, w_ref.shape[-1]), jnp.float32)
        for dy in range(3):
            for dx in range(3):
                xs = pad_ref[dy:dy + hp, w0 - 1 + dx:w0 - 1 + dx + wp, :]
                acc = acc + jnp.dot(xs.reshape(hp * wp, n_in), w_ref[dy, dx],
                                    preferred_element_type=jnp.float32)
        mean = jnp.mean(acc)                       # GroupNorm(1): stats over (H,W,C)
        var = jnp.mean(jnp.square(acc - mean))
        y = (acc - mean) * jax.lax.rsqrt(var + 1e-5)
        y = y * gw_ref[...] + gb_ref[...]
        return _gelu(y) if apply_gelu else y

    # ---- DoubleConv(in, in, residual=True): gelu(x + GN(conv(GELU(GN(conv x))))) ----
    pad_a[1:hp + 1, w0:w0 + wp, :] = xp
    h = conv3x3_gn(pad_a, cin, w1_ref, g1w_ref, g1b_ref, True)
    pad_a[1:hp + 1, w0:w0 + wp, :] = h.reshape(hp, wp, cin)
    h = conv3x3_gn(pad_a, cin, w2_ref, g2w_ref, g2b_ref, False)
    x1 = _gelu(xp_flat + h)                                        # residual epilogue

    # ---- DoubleConv(in, out) ----
    pad_a[1:hp + 1, w0:w0 + wp, :] = x1.reshape(hp, wp, cin)
    h = conv3x3_gn(pad_a, cin, w3_ref, g3w_ref, g3b_ref, True)
    pad_b[1:hp + 1, w0:w0 + wp, :] = h.reshape(hp, wp, cout)
    x2 = conv3x3_gn(pad_b, cout, w4_ref, g4w_ref, g4b_ref, False)

    # ---- FiLM epilogue: gamma * x + beta ----
    emb = emb_ref[0]                               # (1, 2*cout)
    out = x2 * emb[:, :cout] + emb[:, cout:]
    o_ref[...] = out.reshape(1, hp, wp, cout)


# ----------------------------- Down forward (wrapper) -----------------------------

def down_forward(params, x_nchw, cond):
    B, Cin, H, W = x_nchw.shape
    Cout = params["dc2_w2"].shape[-1]
    Hp, Wp = H // 2, W // 2

    # NCHW -> NHWC, then a free (contiguous) reshape that packs (w parity, channel)
    # onto the lane dim so the 2x2 max pool needs no strided HBM gathers.
    x = jnp.transpose(x_nchw, (0, 2, 3, 1)).astype(jnp.float32)
    x = x.reshape(B, H, Wp, 2 * Cin)

    # cond encoder (Mish + Linear) is ~1K FLOPs -> plain XLA; FiLM stays fused in-kernel.
    emb = _mish(cond.astype(jnp.float32)) @ params["lin_w"] + params["lin_b"]
    emb = emb.reshape(B, 1, 2 * Cout)

    kernel = functools.partial(_down_fused_kernel, cin=Cin, cout=Cout, hp=Hp, wp=Wp)
    pad_w = _PAD_W0 + Wp + 8   # interior at [_PAD_W0:_PAD_W0+Wp], halo cols stay zero

    vec_spec = lambda c: pl.BlockSpec((1, c), lambda b: (0, 0))
    w_spec = lambda ci, co: pl.BlockSpec((3, 3, ci, co), lambda b: (0, 0, 0, 0))

    out_nhwc = pl.pallas_call(
        kernel,
        out_shape=jax.ShapeDtypeStruct((B, Hp, Wp, Cout), jnp.float32),
        grid=(B,),
        in_specs=[
            pl.BlockSpec((1, H, Wp, 2 * Cin), lambda b: (b, 0, 0, 0)),
            pl.BlockSpec((1, 1, 2 * Cout), lambda b: (b, 0, 0)),
            w_spec(Cin, Cin), vec_spec(Cin), vec_spec(Cin),
            w_spec(Cin, Cin), vec_spec(Cin), vec_spec(Cin),
            w_spec(Cin, Cout), vec_spec(Cout), vec_spec(Cout),
            w_spec(Cout, Cout), vec_spec(Cout), vec_spec(Cout),
        ],
        out_specs=pl.BlockSpec((1, Hp, Wp, Cout), lambda b: (b, 0, 0, 0)),
        scratch_shapes=[
            pltpu.VMEM((Hp + 2, pad_w, Cin), jnp.float32),
            pltpu.VMEM((Hp + 2, pad_w, Cout), jnp.float32),
        ],
        compiler_params=pltpu.CompilerParams(dimension_semantics=("parallel",)),
    )(
        x, emb,
        params["dc1_w1"], params["dc1_gn1_w"].reshape(1, Cin), params["dc1_gn1_b"].reshape(1, Cin),
        params["dc1_w2"], params["dc1_gn2_w"].reshape(1, Cin), params["dc1_gn2_b"].reshape(1, Cin),
        params["dc2_w1"], params["dc2_gn1_w"].reshape(1, Cout), params["dc2_gn1_b"].reshape(1, Cout),
        params["dc2_w2"], params["dc2_gn2_w"].reshape(1, Cout), params["dc2_gn2_b"].reshape(1, Cout),
    )
    return jnp.transpose(out_nhwc, (0, 3, 1, 2))   # NHWC -> NCHW (glue)


# ----------------------------- params (deterministic, synthetic) -----------------------------

def init_params(key, cin, cout, cond_dim):
    ks = jax.random.split(key, 12)
    s = 0.1
    f32 = jnp.float32
    return {
        # DoubleConv 1 (residual): in -> in, mid = in
        "dc1_w1": s * jax.random.normal(ks[0], (3, 3, cin, cin), f32),
        "dc1_gn1_w": 1.0 + s * jax.random.normal(ks[1], (cin,), f32),
        "dc1_gn1_b": s * jax.random.normal(ks[2], (cin,), f32),
        "dc1_w2": s * jax.random.normal(ks[3], (3, 3, cin, cin), f32),
        "dc1_gn2_w": 1.0 + s * jax.random.normal(ks[4], (cin,), f32),
        "dc1_gn2_b": s * jax.random.normal(ks[5], (cin,), f32),
        # DoubleConv 2: in -> out, mid = out
        "dc2_w1": s * jax.random.normal(ks[6], (3, 3, cin, cout), f32),
        "dc2_gn1_w": 1.0 + s * jax.random.normal(ks[7], (cout,), f32),
        "dc2_gn1_b": s * jax.random.normal(ks[8], (cout,), f32),
        "dc2_w2": s * jax.random.normal(ks[9], (3, 3, cout, cout), f32),
        "dc2_gn2_w": jnp.ones((cout,), f32),
        "dc2_gn2_b": jnp.zeros((cout,), f32),
        # cond encoder: Linear(cond_dim, 2*out) stored pre-transposed (in, out)
        "lin_w": s * jax.random.normal(ks[10], (cond_dim, 2 * cout), f32),
        "lin_b": s * jax.random.normal(ks[11], (2 * cout,), f32),
    }


# ----------------------------- pure-JAX reference -----------------------------

def ref_down(params, x_nchw, cond):
    def conv(x, w):  # w: (3,3,Cin,Cout) -> OIHW
        wk = jnp.transpose(w, (3, 2, 0, 1))
        return jax.lax.conv_general_dilated(
            x, wk, window_strides=(1, 1), padding=((1, 1), (1, 1)),
            dimension_numbers=("NCHW", "OIHW", "NCHW"))

    def gn(x, w, b):  # GroupNorm(1, C)
        mean = jnp.mean(x, axis=(1, 2, 3), keepdims=True)
        var = jnp.mean(jnp.square(x - mean), axis=(1, 2, 3), keepdims=True)
        xn = (x - mean) * jax.lax.rsqrt(var + 1e-5)
        return xn * w[None, :, None, None] + b[None, :, None, None]

    xp = jax.lax.reduce_window(x_nchw, -jnp.inf, jax.lax.max,
                               (1, 1, 2, 2), (1, 1, 2, 2), "VALID")
    h = _gelu(gn(conv(xp, params["dc1_w1"]), params["dc1_gn1_w"], params["dc1_gn1_b"]))
    h = gn(conv(h, params["dc1_w2"]), params["dc1_gn2_w"], params["dc1_gn2_b"])
    x1 = _gelu(xp + h)
    h = _gelu(gn(conv(x1, params["dc2_w1"]), params["dc2_gn1_w"], params["dc2_gn1_b"]))
    x2 = gn(conv(h, params["dc2_w2"]), params["dc2_gn2_w"], params["dc2_gn2_b"])
    emb = _mish(cond) @ params["lin_w"] + params["lin_b"]
    c = x2.shape[1]
    gamma = emb[:, :c][:, :, None, None]
    beta = emb[:, c:][:, :, None, None]
    return gamma * x2 + beta


# ----------------------------- main -----------------------------

if __name__ == "__main__":
    B, Cin, Cout, H, W, cond_dim = 2, 4, 8, 16, 16, 32

    key = jax.random.PRNGKey(0)
    kx, kc, kp = jax.random.split(key, 3)
    x = jax.random.normal(kx, (B, Cin, H, W), jnp.float32)
    cond = jax.random.normal(kc, (B, cond_dim), jnp.float32)
    params = init_params(kp, Cin, Cout, cond_dim)

    out = jax.block_until_ready(jax.jit(down_forward)(params, x, cond))
    assert out.shape == (B, Cout, H // 2, W // 2), out.shape

    ref = jax.block_until_ready(ref_down(params, x, cond))
    np.testing.assert_allclose(np.asarray(out), np.asarray(ref),
                               atol=2e-4, rtol=2e-4)

    print("KERNEL_OK")
</pallas_src>

<mosaic_0001>
module attributes {stable_mosaic.version = 11 : i64} {
  func.func @_down_fused_kernel(%arg0: i32, %arg1: memref<1x16x8x8xf32, #tpu.memory_space<vmem>>, %arg2: memref<1x1x16xf32, #tpu.memory_space<vmem>>, %arg3: memref<3x3x4x4xf32, #tpu.memory_space<vmem>>, %arg4: memref<1x4xf32, #tpu.memory_space<vmem>>, %arg5: memref<1x4xf32, #tpu.memory_space<vmem>>, %arg6: memref<3x3x4x4xf32, #tpu.memory_space<vmem>>, %arg7: memref<1x4xf32, #tpu.memory_space<vmem>>, %arg8: memref<1x4xf32, #tpu.memory_space<vmem>>, %arg9: memref<3x3x4x8xf32, #tpu.memory_space<vmem>>, %arg10: memref<1x8xf32, #tpu.memory_space<vmem>>, %arg11: memref<1x8xf32, #tpu.memory_space<vmem>>, %arg12: memref<3x3x8x8xf32, #tpu.memory_space<vmem>>, %arg13: memref<1x8xf32, #tpu.memory_space<vmem>>, %arg14: memref<1x8xf32, #tpu.memory_space<vmem>>, %arg15: memref<1x8x8x8xf32, #tpu.memory_space<vmem>>, %arg16: memref<10x24x4xf32, #tpu.memory_space<vmem>>, %arg17: memref<10x24x8xf32, #tpu.memory_space<vmem>>) attributes {dimension_semantics = [#tpu.dimension_semantics<parallel>], iteration_bounds = array<i64: 2>, scalar_prefetch = 0 : i64, scratch_operands = 2 : i64, tpu.core_type = #tpu.core_type<tc>, window_params = [{transform_indices = @transform_0, window_bounds = array<i64: 1, 16, 8, 8>}, {transform_indices = @transform_1, window_bounds = array<i64: 1, 1, 16>}, {pipeline_mode = #tpu.pipeline_mode<synchronous>, transform_indices = @transform_2, window_bounds = array<i64: 3, 3, 4, 4>}, {pipeline_mode = #tpu.pipeline_mode<synchronous>, transform_indices = @transform_3, window_bounds = array<i64: 1, 4>}, {pipeline_mode = #tpu.pipeline_mode<synchronous>, transform_indices = @transform_4, window_bounds = array<i64: 1, 4>}, {pipeline_mode = #tpu.pipeline_mode<synchronous>, transform_indices = @transform_5, window_bounds = array<i64: 3, 3, 4, 4>}, {pipeline_mode = #tpu.pipeline_mode<synchronous>, transform_indices = @transform_6, window_bounds = array<i64: 1, 4>}, {pipeline_mode = #tpu.pipeline_mode<synchronous>, transform_indices = @transform_7, window_bounds = array<i64: 1, 4>}, {pipeline_mode = #tpu.pipeline_mode<synchronous>, transform_indices = @transform_8, window_bounds = array<i64: 3, 3, 4, 8>}, {pipeline_mode = #tpu.pipeline_mode<synchronous>, transform_indices = @transform_9, window_bounds = array<i64: 1, 8>}, {pipeline_mode = #tpu.pipeline_mode<synchronous>, transform_indices = @transform_10, window_bounds = array<i64: 1, 8>}, {pipeline_mode = #tpu.pipeline_mode<synchronous>, transform_indices = @transform_11, window_bounds = array<i64: 3, 3, 8, 8>}, {pipeline_mode = #tpu.pipeline_mode<synchronous>, transform_indices = @transform_12, window_bounds = array<i64: 1, 8>}, {pipeline_mode = #tpu.pipeline_mode<synchronous>, transform_indices = @transform_13, window_bounds = array<i64: 1, 8>}, {transform_indices = @transform_14, window_bounds = array<i64: 1, 8, 8, 8>}]} {
    %cst = arith.constant 0.000000e+00 : f32
    %0 = vector.broadcast %cst : f32 to vector<10x24x4xf32>
    %c0 = arith.constant 0 : index
    %c0_0 = arith.constant 0 : index
    %c0_1 = arith.constant 0 : index
    %1 = vector.load %arg16[%c0, %c0_0, %c0_1] : memref<10x24x4xf32, #tpu.memory_space<vmem>>, vector<10x24x4xf32>
    tpu.vector_store %arg16[%c0, %c0_0, %c0_1], %0 {strides = array<i32>} : memref<10x24x4xf32, #tpu.memory_space<vmem>>, vector<10x24x4xf32>,
    %cst_2 = arith.constant 0.000000e+00 : f32
    %2 = vector.broadcast %cst_2 : f32 to vector<10x24x8xf32>
    %c0_3 = arith.constant 0 : index
    %c0_4 = arith.constant 0 : index
    %c0_5 = arith.constant 0 : index
    %3 = vector.load %arg17[%c0_3, %c0_4, %c0_5] : memref<10x24x8xf32, #tpu.memory_space<vmem>>, vector<10x24x8xf32>
    tpu.vector_store %arg17[%c0_3, %c0_4, %c0_5], %2 {strides = array<i32>} : memref<10x24x8xf32, #tpu.memory_space<vmem>>, vector<10x24x8xf32>,
    %c0_6 = arith.constant 0 : index
    %c0_7 = arith.constant 0 : index
    %c0_8 = arith.constant 0 : index
    %c0_9 = arith.constant 0 : index
    %4 = vector.load %arg1[%c0_6, %c0_7, %c0_8, %c0_9] : memref<1x16x8x8xf32, #tpu.memory_space<vmem>>, vector<1x16x8x4xf32>
    %5 = vector.shape_cast %4 : vector<1x16x8x4xf32> to vector<16x8x4xf32>
    %c0_10 = arith.constant 0 : index
    %c0_11 = arith.constant 0 : index
    %c0_12 = arith.constant 0 : index
    %c4 = arith.constant 4 : index
    %6 = vector.load %arg1[%c0_10, %c0_11, %c0_12, %c4] : memref<1x16x8x8xf32, #tpu.memory_space<vmem>>, vector<1x16x8x4xf32>
    %7 = vector.shape_cast %6 : vector<1x16x8x4xf32> to vector<16x8x4xf32>
    %8 = arith.maximumf %5, %7 : vector<16x8x4xf32>
    %9 = vector.shape_cast %8 : vector<16x8x4xf32> to vector<8x2x8x4xf32>
    %10 = vector.extract_strided_slice %9 {offsets = [0, 0, 0, 0], sizes = [8, 1, 8, 4], strides = [1, 1, 1, 1]} : vector<8x2x8x4xf32> to vector<8x1x8x4xf32>
    %11 = vector.shape_cast %10 : vector<8x1x8x4xf32> to vector<8x8x4xf32>
    %12 = vector.extract_strided_slice %9 {offsets = [0, 1, 0, 0], sizes = [8, 1, 8, 4], strides = [1, 1, 1, 1]} : vector<8x2x8x4xf32> to vector<8x1x8x4xf32>
    %13 = vector.shape_cast %12 : vector<8x1x8x4xf32> to vector<8x8x4xf32>
    %14 = arith.maximumf %11, %13 : vector<8x8x4xf32>
    %15 = vector.shape_cast %14 : vector<8x8x4xf32> to vector<64x4xf32>
    %c1 = arith.constant 1 : index
    %c8 = arith.constant 8 : index
    %c0_13 = arith.constant 0 : index
    %16 = vector.load %arg16[%c1, %c8, %c0_13] : memref<10x24x4xf32, #tpu.memory_space<vmem>>, vector<8x8x4xf32>
    tpu.vector_store %arg16[%c1, %c8, %c0_13], %14 {strides = array<i32>} : memref<10x24x4xf32, #tpu.memory_space<vmem>>, vector<8x8x4xf32>,
    %cst_14 = arith.constant 0.000000e+00 : f32
    %17 = vector.broadcast %cst_14 : f32 to vector<64x4xf32>
    %c0_15 = arith.constant 0 : index
    %c7 = arith.constant 7 : index
    %c0_16 = arith.constant 0 : index
    %18 = vector.load %arg16[%c0_15, %c7, %c0_16] : memref<10x24x4xf32, #tpu.memory_space<vmem>>, vector<8x8x4xf32>
    %19 = vector.shape_cast %18 : vector<8x8x4xf32> to vector<64x4xf32>
    %c0_17 = arith.constant 0 : index
    %c0_18 = arith.constant 0 : index
    %c0_19 = arith.constant 0 : index
    %c0_20 = arith.constant 0 : index
    %20 = vector.load %arg3[%c0_17, %c0_18, %c0_19, %c0_20] : memref<3x3x4x4xf32, #tpu.memory_space<vmem>>, vector<1x1x4x4xf32>
    %21 = vector.shape_cast %20 : vector<1x1x4x4xf32> to vector<4x4xf32>
    %cst_21 = arith.constant dense<0.000000e+00> : vector<64x4xf32>
    %22 = tpu.matmul %19, %21, %cst_21 {dimension_numbers = #tpu.dot_dimension_numbers<[1], [0], [0], [1], [0, 0, 1, 1], [], []>} : vector<64x4xf32>, vector<4x4xf32>, vector<64x4xf32> -> vector<64x4xf32>
    %23 = arith.addf %17, %22 : vector<64x4xf32>
    %c0_22 = arith.constant 0 : index
    %c8_23 = arith.constant 8 : index
    %c0_24 = arith.constant 0 : index
    %24 = vector.load %arg16[%c0_22, %c8_23, %c0_24] : memref<10x24x4xf32, #tpu.memory_space<vmem>>, vector<8x8x4xf32>
    %25 = vector.shape_cast %24 : vector<8x8x4xf32> to vector<64x4xf32>
    %c0_25 = arith.constant 0 : index
    %c1_26 = arith.constant 1 : index
    %c0_27 = arith.constant 0 : index
    %c0_28 = arith.constant 0 : index
    %26 = vector.load %arg3[%c0_25, %c1_26, %c0_27, %c0_28] : memref<3x3x4x4xf32, #tpu.memory_space<vmem>>, vector<1x1x4x4xf32>
    %27 = vector.shape_cast %26 : vector<1x1x4x4xf32> to vector<4x4xf32>
    %cst_29 = arith.constant dense<0.000000e+00> : vector<64x4xf32>
    %28 = tpu.matmul %25, %27, %cst_29 {dimension_numbers = #tpu.dot_dimension_numbers<[1], [0], [0], [1], [0, 0, 1, 1], [], []>} : vector<64x4xf32>, vector<4x4xf32>, vector<64x4xf32> -> vector<64x4xf32>
    %29 = arith.addf %23, %28 : vector<64x4xf32>
    %c0_30 = arith.constant 0 : index
    %c9 = arith.constant 9 : index
    %c0_31 = arith.constant 0 : index
    %30 = vector.load %arg16[%c0_30, %c9, %c0_31] : memref<10x24x4xf32, #tpu.memory_space<vmem>>, vector<8x8x4xf32>
    %31 = vector.shape_cast %30 : vector<8x8x4xf32> to vector<64x4xf32>
    %c0_32 = arith.constant 0 : index
    %c2 = arith.constant 2 : index
    %c0_33 = arith.constant 0 : index
    %c0_34 = arith.constant 0 : index
    %32 = vector.load %arg3[%c0_32, %c2, %c0_33, %c0_34] : memref<3x3x4x4xf32, #tpu.memory_space<vmem>>, vector<1x1x4x4xf32>
    %33 = vector.shape_cast %32 : vector<1x1x4x4xf32> to vector<4x4xf32>
    %cst_35 = arith.constant dense<0.000000e+00> : vector<64x4xf32>
    %34 = tpu.matmul %31, %33, %cst_35 {dimension_numbers = #tpu.dot_dimension_numbers<[1], [0], [0], [1], [0, 0, 1, 1], [], []>} : vector<64x4xf32>, vector<4x4xf32>, vector<64x4xf32> -> vector<64x4xf32>
    %35 = arith.addf %29, %34 : vector<64x4xf32>
    %c1_36 = arith.constant 1 : index
    %c7_37 = arith.constant 7 : index
    %c0_38 = arith.constant 0 : index
    %36 = vector.load %arg16[%c1_36, %c7_37, %c0_38] : memref<10x24x4xf32, #tpu.memory_space<vmem>>, vector<8x8x4xf32>
    %37 = vector.shape_cast %36 : vector<8x8x4xf32> to vector<64x4xf32>
    %c1_39 = arith.constant 1 : index
    %c0_40 = arith.constant 0 : index
    %c0_41 = arith.constant 0 : index
    %c0_42 = arith.constant 0 : index
    %38 = vector.load %arg3[%c1_39, %c0_40, %c0_41, %c0_42] : memref<3x3x4x4xf32, #tpu.memory_space<vmem>>, vector<1x1x4x4xf32>
    %39 = vector.shape_cast %38 : vector<1x1x4x4xf32> to vector<4x4xf32>
    %cst_43 = arith.constant dense<0.000000e+00> : vector<64x4xf32>
    %40 = tpu.matmul %37, %39, %cst_43 {dimension_numbers = #tpu.dot_dimension_numbers<[1], [0], [0], [1], [0, 0, 1, 1], [], []>} : vector<64x4xf32>, vector<4x4xf32>, vector<64x4xf32> -> vector<64x4xf32>
    %41 = arith.addf %35, %40 : vector<64x4xf32>
    %c1_44 = arith.constant 1 : index
    %c8_45 = arith.constant 8 : index
    %c0_46 = arith.constant 0 : index
    %42 = vector.load %arg16[%c1_44, %c8_45, %c0_46] : memref<10x24x4xf32, #tpu.memory_space<vmem>>, vector<8x8x4xf32>
    %43 = vector.shape_cast %42 : vector<8x8x4xf32> to vector<64x4xf32>
    %c1_47 = arith.constant 1 : index
    %c1_48 = arith.constant 1 : index
    %c0_49 = arith.constant 0 : index
    %c0_50 = arith.constant 0 : index
    %44 = vector.load %arg3[%c1_47, %c1_48, %c0_49, %c0_50] : memref<3x3x4x4xf32, #tpu.memory_space<vmem>>, vector<1x1x4x4xf32>
    %45 = vector.shape_cast %44 : vector<1x1x4x4xf32> to vector<4x4xf32>
    %cst_51 = arith.constant dense<0.000000e+00> : vector<64x4xf32>
    %46 = tpu.matmul %43, %45, %cst_51 {dimension_numbers = #tpu.dot_dimension_numbers<[1], [0], [0], [1], [0, 0, 1, 1], [], []>} : vector<64x4xf32>, vector<4x4xf32>, vector<64x4xf32> -> vector<64x4xf32>
    %47 = arith.addf %41, %46 : vector<64x4xf32>
    %c1_52 = arith.constant 1 : index
    %c9_53 = arith.constant 9 : index
    %c0_54 = arith.constant 0 : index
    %48 = vector.load %arg16[%c1_52, %c9_53, %c0_54] : memref<10x24x4xf32, #tpu.memory_space<vmem>>, vector<8x8x4xf32>
    %49 = vector.shape_cast %48 : vector<8x8x4xf32> to vector<64x4xf32>
    %c1_55 = arith.constant 1 : index
    %c2_56 = arith.constant 2 : index
    %c0_57 = arith.constant 0 : index
    %c0_58 = arith.constant 0 : index
    %50 = vector.load %arg3[%c1_55, %c2_56, %c0_57, %c0_58] : memref<3x3x4x4xf32, #tpu.memory_space<vmem>>, vector<1x1x4x4xf32>
    %51 = vector.shape_cast %50 : vector<1x1x4x4xf32> to vector<4x4xf32>
    %cst_59 = arith.constant dense<0.000000e+00> : vector<64x4xf32>
    %52 = tpu.matmul %49, %51, %cst_59 {dimension_numbers = #tpu.dot_dimension_numbers<[1], [0], [0], [1], [0, 0, 1, 1], [], []>} : vector<64x4xf32>, vector<4x4xf32>, vector<64x4xf32> -> vector<64x4xf32>
    %53 = arith.addf %47, %52 : vector<64x4xf32>
    %c2_60 = arith.constant 2 : index
    %c7_61 = arith.constant 7 : index
    %c0_62 = arith.constant 0 : index
    %54 = vector.load %arg16[%c2_60, %c7_61, %c0_62] : memref<10x24x4xf32, #tpu.memory_space<vmem>>, vector<8x8x4xf32>
    %55 = vector.shape_cast %54 : vector<8x8x4xf32> to vector<64x4xf32>
    %c2_63 = arith.constant 2 : index
    %c0_64 = arith.constant 0 : index
    %c0_65 = arith.constant 0 : index
    %c0_66 = arith.constant 0 : index
    %56 = vector.load %arg3[%c2_63, %c0_64, %c0_65, %c0_66] : memref<3x3x4x4xf32, #tpu.memory_space<vmem>>, vector<1x1x4x4xf32>
    %57 = vector.shape_cast %56 : vector<1x1x4x4xf32> to vector<4x4xf32>
    %cst_67 = arith.constant dense<0.000000e+00> : vector<64x4xf32>
    %58 = tpu.matmul %55, %57, %cst_67 {dimension_numbers = #tpu.dot_dimension_numbers<[1], [0], [0], [1], [0, 0, 1, 1], [], []>} : vector<64x4xf32>, vector<4x4xf32>, vector<64x4xf32> -> vector<64x4xf32>
    %59 = arith.addf %53, %58 : vector<64x4xf32>
    %c2_68 = arith.constant 2 : index
    %c8_69 = arith.constant 8 : index
    %c0_70 = arith.constant 0 : index
    %60 = vector.load %arg16[%c2_68, %c8_69, %c0_70] : memref<10x24x4xf32, #tpu.memory_space<vmem>>, vector<8x8x4xf32>
    %61 = vector.shape_cast %60 : vector<8x8x4xf32> to vector<64x4xf32>
    %c2_71 = arith.constant 2 : index
    %c1_72 = arith.constant 1 : index
    %c0_73 = arith.constant 0 : index
    %c0_74 = arith.constant 0 : index
    %62 = vector.load %arg3[%c2_71, %c1_72, %c0_73, %c0_74] : memref<3x3x4x4xf32, #tpu.memory_space<vmem>>, vector<1x1x4x4xf32>
    %63 = vector.shape_cast %62 : vector<1x1x4x4xf32> to vector<4x4xf32>
    %cst_75 = arith.constant dense<0.000000e+00> : vector<64x4xf32>
    %64 = tpu.matmul %61, %63, %cst_75 {dimension_numbers = #tpu.dot_dimension_numbers<[1], [0], [0], [1], [0, 0, 1, 1], [], []>} : vector<64x4xf32>, vector<4x4xf32>, vector<64x4xf32> -> vector<64x4xf32>
    %65 = arith.addf %59, %64 : vector<64x4xf32>
    %c2_76 = arith.constant 2 : index
    %c9_77 = arith.constant 9 : index
    %c0_78 = arith.constant 0 : index
    %66 = vector.load %arg16[%c2_76, %c9_77, %c0_78] : memref<10x24x4xf32, #tpu.memory_space<vmem>>, vector<8x8x4xf32>
    %67 = vector.shape_cast %66 : vector<8x8x4xf32> to vector<64x4xf32>
    %c2_79 = arith.constant 2 : index
    %c2_80 = arith.constant 2 : index
    %c0_81 = arith.constant 0 : index
    %c0_82 = arith.constant 0 : index
    %68 = vector.load %arg3[%c2_79, %c2_80, %c0_81, %c0_82] : memref<3x3x4x4xf32, #tpu.memory_space<vmem>>, vector<1x1x4x4xf32>
    %69 = vector.shape_cast %68 : vector<1x1x4x4xf32> to vector<4x4xf32>
    %cst_83 = arith.constant dense<0.000000e+00> : vector<64x4xf32>
    %70 = tpu.matmul %67, %69, %cst_83 {dimension_numbers = #tpu.dot_dimension_numbers<[1], [0], [0], [1], [0, 0, 1, 1], [], []>} : vector<64x4xf32>, vector<4x4xf32>, vector<64x4xf32> -> vector<64x4xf32>
    %71 = arith.addf %65, %70 : vector<64x4xf32>
    %72 = vector.shape_cast %71 : vector<64x4xf32> to vector<1x64x4xf32>
    %cst_84 = arith.constant dense<0.000000e+00> : vector<1xf32>
    %73 = vector.multi_reduction <add>, %72, %cst_84 [1, 2] : vector<1x64x4xf32> to vector<1xf32>
    %74 = vector.shape_cast %73 : vector<1xf32> to vector<1x1x1xf32>
    %75 = vector.extract %74[0, 0, 0] : f32 from vector<1x1x1xf32>
    %cst_85 = arith.constant 2.560000e+02 : f32
    %76 = arith.divf %75, %cst_85 : f32
    %77 = vector.broadcast %76 : f32 to vector<64x4xf32>
    %78 = arith.subf %71, %77 : vector<64x4xf32>
    %79 = arith.mulf %78, %78 : vector<64x4xf32>
    %80 = vector.shape_cast %79 : vector<64x4xf32> to vector<1x64x4xf32>
    %cst_86 = arith.constant dense<0.000000e+00> : vector<1xf32>
    %81 = vector.multi_reduction <add>, %80, %cst_86 [1, 2] : vector<1x64x4xf32> to vector<1xf32>
    %82 = vector.shape_cast %81 : vector<1xf32> to vector<1x1x1xf32>
    %83 = vector.extract %82[0, 0, 0] : f32 from vector<1x1x1xf32>
    %cst_87 = arith.constant 2.560000e+02 : f32
    %84 = arith.divf %83, %cst_87 : f32
    %85 = vector.broadcast %76 : f32 to vector<64x4xf32>
    %86 = arith.subf %71, %85 : vector<64x4xf32>
    %cst_88 = arith.constant 9.99999974E-6 : f32
    %87 = arith.addf %84, %cst_88 : f32
    %88 = math.rsqrt %87 : f32
    %89 = vector.broadcast %88 : f32 to vector<64x4xf32>
    %90 = arith.mulf %86, %89 : vector<64x4xf32>
    %c0_89 = arith.constant 0 : index
    %c0_90 = arith.constant 0 : index
    %91 = vector.load %arg4[%c0_89, %c0_90] : memref<1x4xf32, #tpu.memory_space<vmem>>, vector<1x4xf32>
    %92 = vector.broadcast %91 : vector<1x4xf32> to vector<64x4xf32>
    %93 = arith.mulf %90, %92 : vector<64x4xf32>
    %c0_91 = arith.constant 0 : index
    %c0_92 = arith.constant 0 : index
    %94 = vector.load %arg5[%c0_91, %c0_92] : memref<1x4xf32, #tpu.memory_space<vmem>>, vector<1x4xf32>
    %95 = vector.broadcast %94 : vector<1x4xf32> to vector<64x4xf32>
    %96 = arith.addf %93, %95 : vector<64x4xf32>
    %cst_93 = arith.constant 5.000000e-01 : f32
    %97 = vector.broadcast %cst_93 : f32 to vector<64x4xf32>
    %98 = arith.mulf %97, %96 : vector<64x4xf32>
    %cst_94 = arith.constant 0.707106769 : f32
    %99 = vector.broadcast %cst_94 : f32 to vector<64x4xf32>
    %100 = arith.mulf %96, %99 : vector<64x4xf32>
    %101 = math.erf %100 : vector<64x4xf32>
    %cst_95 = arith.constant 1.000000e+00 : f32
    %102 = vector.broadcast %cst_95 : f32 to vector<64x4xf32>
    %103 = arith.addf %102, %101 : vector<64x4xf32>
    %104 = arith.mulf %98, %103 : vector<64x4xf32>
    %105 = vector.shape_cast %104 : vector<64x4xf32> to vector<8x8x4xf32>
    %c1_96 = arith.constant 1 : index
    %c8_97 = arith.constant 8 : index
    %c0_98 = arith.constant 0 : index
    %106 = vector.load %arg16[%c1_96, %c8_97, %c0_98] : memref<10x24x4xf32, #tpu.memory_space<vmem>>, vector<8x8x4xf32>
    tpu.vector_store %arg16[%c1_96, %c8_97, %c0_98], %105 {strides = array<i32>} : memref<10x24x4xf32, #tpu.memory_space<vmem>>, vector<8x8x4xf32>,
    %cst_99 = arith.constant 0.000000e+00 : f32
    %107 = vector.broadcast %cst_99 : f32 to vector<64x4xf32>
    %c0_100 = arith.constant 0 : index
    %c7_101 = arith.constant 7 : index
    %c0_102 = arith.constant 0 : index
    %108 = vector.load %arg16[%c0_100, %c7_101, %c0_102] : memref<10x24x4xf32, #tpu.memory_space<vmem>>, vector<8x8x4xf32>
    %109 = vector.shape_cast %108 : vector<8x8x4xf32> to vector<64x4xf32>
    %c0_103 = arith.constant 0 : index
    %c0_104 = arith.constant 0 : index
    %c0_105 = arith.constant 0 : index
    %c0_106 = arith.constant 0 : index
    %110 = vector.load %arg6[%c0_103, %c0_104, %c0_105, %c0_106] : memref<3x3x4x4xf32, #tpu.memory_space<vmem>>, vector<1x1x4x4xf32>
    %111 = vector.shape_cast %110 : vector<1x1x4x4xf32> to vector<4x4xf32>
    %cst_107 = arith.constant dense<0.000000e+00> : vector<64x4xf32>
    %112 = tpu.matmul %109, %111, %cst_107 {dimension_numbers = #tpu.dot_dimension_numbers<[1], [0], [0], [1], [0, 0, 1, 1], [], []>} : vector<64x4xf32>, vector<4x4xf32>, vector<64x4xf32> -> vector<64x4xf32>
    %113 = arith.addf %107, %112 : vector<64x4xf32>
    %c0_108 = arith.constant 0 : index
    %c8_109 = arith.constant 8 : index
    %c0_110 = arith.constant 0 : index
    %114 = vector.load %arg16[%c0_108, %c8_109, %c0_110] : memref<10x24x4xf32, #tpu.memory_space<vmem>>, vector<8x8x4xf32>
    %115 = vector.shape_cast %114 : vector<8x8x4xf32> to vector<64x4xf32>
    %c0_111 = arith.constant 0 : index
    %c1_112 = arith.constant 1 : index
    %c0_113 = arith.constant 0 : index
    %c0_114 = arith.constant 0 : index
    %116 = vector.load %arg6[%c0_111, %c1_112, %c0_113, %c0_114] : memref<3x3x4x4xf32, #tpu.memory_space<vmem>>, vector<1x1x4x4xf32>
    %117 = vector.shape_cast %116 : vector<1x1x4x4xf32> to vector<4x4xf32>
    %cst_115 = arith.constant dense<0.000000e+00> : vector<64x4xf32>
    %118 = tpu.matmul %115, %117, %cst_115 {dimension_numbers = #tpu.dot_dimension_numbers<[1], [0], [0], [1], [0, 0, 1, 1], [], []>} : vector<64x4xf32>, vector<4x4xf32>, vector<64x4xf32> -> vector<64x4xf32>
    %119 = arith.addf %113, %118 : vector<64x4xf32>
    %c0_116 = arith.constant 0 : index
    %c9_117 = arith.constant 9 : index
    %c0_118 = arith.constant 0 : index
    %120 = vector.load %arg16[%c0_116, %c9_117, %c0_118] : memref<10x24x4xf32, #tpu.memory_space<vmem>>, vector<8x8x4xf32>
    %121 = vector.shape_cast %120 : vector<8x8x4xf32> to vector<64x4xf32>
    %c0_119 = arith.constant 0 : index
    %c2_120 = arith.constant 2 : index
    %c0_121 = arith.constant 0 : index
    %c0_122 = arith.constant 0 : index
    %122 = vector.load %arg6[%c0_119, %c2_120, %c0_121, %c0_122] : memref<3x3x4x4xf32, #tpu.memory_space<vmem>>, vector<1x1x4x4xf32>
    %123 = vector.shape_cast %122 : vector<1x1x4x4xf32> to vector<4x4xf32>
    %cst_123 = arith.constant dense<0.000000e+00> : vector<64x4xf32>
    %124 = tpu.matmul %121, %123, %cst_123 {dimension_numbers = #tpu.dot_dimension_numbers<[1], [0], [0], [1], [0, 0, 1, 1], [], []>} : vector<64x4xf32>, vector<4x4xf32>, vector<64x4xf32> -> vector<64x4xf32>
    %125 = arith.addf %119, %124 : vector<64x4xf32>
    %c1_124 = arith.constant 1 : index
    %c7_125 = arith.constant 7 : index
    %c0_126 = arith.constant 0 : index
    %126 = vector.load %arg16[%c1_124, %c7_125, %c0_126] : memref<10x24x4xf32, #tpu.memory_space<vmem>>, vector<8x8x4xf32>
    %127 = vector.shape_cast %126 : vector<8x8x4xf32> to vector<64x4xf32>
    %c1_127 = arith.constant 1 : index
    %c0_128 = arith.constant 0 : index
    %c0_129 = arith.constant 0 : index
    %c0_130 = arith.constant 0 : index
    %128 = vector.load %arg6[%c1_127, %c0_128, %c0_129, %c0_130] : memref<3x3x4x4xf32, #tpu.memory_space<vmem>>, vector<1x1x4x4xf32>
    %129 = vector.shape_cast %128 : vector<1x1x4x4xf32> to vector<4x4xf32>
    %cst_131 = arith.constant dense<0.000000e+00> : vector<64x4xf32>
    %130 = tpu.matmul %127, %129, %cst_131 {dimension_numbers = #tpu.dot_dimension_numbers<[1], [0], [0], [1], [0, 0, 1, 1], [], []>} : vector<64x4xf32>, vector<4x4xf32>, vector<64x4xf32> -> vector<64x4xf32>
    %131 = arith.addf %125, %130 : vector<64x4xf32>
    %c1_132 = arith.constant 1 : index
    %c8_133 = arith.constant 8 : index
    %c0_134 = arith.constant 0 : index
    %132 = vector.load %arg16[%c1_132, %c8_133, %c0_134] : memref<10x24x4xf32, #tpu.memory_space<vmem>>, vector<8x8x4xf32>
    %133 = vector.shape_cast %132 : vector<8x8x4xf32> to vector<64x4xf32>
    %c1_135 = arith.constant 1 : index
    %c1_136 = arith.constant 1 : index
    %c0_137 = arith.constant 0 : index
    %c0_138 = arith.constant 0 : index
    %134 = vector.load %arg6[%c1_135, %c1_136, %c0_137, %c0_138] : memref<3x3x4x4xf32, #tpu.memory_space<vmem>>, vector<1x1x4x4xf32>
    %135 = vector.shape_cast %134 : vector<1x1x4x4xf32> to vector<4x4xf32>
    %cst_139 = arith.constant dense<0.000000e+00> : vector<64x4xf32>
    %136 = tpu.matmul %133, %135, %cst_139 {dimension_numbers = #tpu.dot_dimension_numbers<[1], [0], [0], [1], [0, 0, 1, 1], [], []>} : vector<64x4xf32>, vector<4x4xf32>, vector<64x4xf32> -> vector<64x4xf32>
    %137 = arith.addf %131, %136 : vector<64x4xf32>
    %c1_140 = arith.constant 1 : index
    %c9_141 = arith.constant 9 : index
    %c0_142 = arith.constant 0 : index
    %138 = vector.load %arg16[%c1_140, %c9_141, %c0_142] : memref<10x24x4xf32, #tpu.memory_space<vmem>>, vector<8x8x4xf32>
    %139 = vector.shape_cast %138 : vector<8x8x4xf32> to vector<64x4xf32>
    %c1_143 = arith.constant 1 : index
    %c2_144 = arith.constant 2 : index
    %c0_145 = arith.constant 0 : index
    %c0_146 = arith.constant 0 : index
    %140 = vector.load %arg6[%c1_143, %c2_144, %c0_145, %c0_146] : memref<3x3x4x4xf32, #tpu.memory_space<vmem>>, vector<1x1x4x4xf32>
    %141 = vector.shape_cast %140 : vector<1x1x4x4xf32> to vector<4x4xf32>
    %cst_147 = arith.constant dense<0.000000e+00> : vector<64x4xf32>
    %142 = tpu.matmul %139, %141, %cst_147 {dimension_numbers = #tpu.dot_dimension_numbers<[1], [0], [0], [1], [0, 0, 1, 1], [], []>} : vector<64x4xf32>, vector<4x4xf32>, vector<64x4xf32> -> vector<64x4xf32>
    %143 = arith.addf %137, %142 : vector<64x4xf32>
    %c2_148 = arith.constant 2 : index
    %c7_149 = arith.constant 7 : index
    %c0_150 = arith.constant 0 : index
    %144 = vector.load %arg16[%c2_148, %c7_149, %c0_150] : memref<10x24x4xf32, #tpu.memory_space<vmem>>, vector<8x8x4xf32>
    %145 = vector.shape_cast %144 : vector<8x8x4xf32> to vector<64x4xf32>
    %c2_151 = arith.constant 2 : index
    %c0_152 = arith.constant 0 : index
    %c0_153 = arith.constant 0 : index
    %c0_154 = arith.constant 0 : index
    %146 = vector.load %arg6[%c2_151, %c0_152, %c0_153, %c0_154] : memref<3x3x4x4xf32, #tpu.memory_space<vmem>>, vector<1x1x4x4xf32>
    %147 = vector.shape_cast %146 : vector<1x1x4x4xf32> to vector<4x4xf32>
    %cst_155 = arith.constant dense<0.000000e+00> : vector<64x4xf32>
    %148 = tpu.matmul %145, %147, %cst_155 {dimension_numbers = #tpu.dot_dimension_numbers<[1], [0], [0], [1], [0, 0, 1, 1], [], []>} : vector<64x4xf32>, vector<4x4xf32>, vector<64x4xf32> -> vector<64x4xf32>
    %149 = arith.addf %143, %148 : vector<64x4xf32>
    %c2_156 = arith.constant 2 : index
    %c8_157 = arith.constant 8 : index
    %c0_158 = arith.constant 0 : index
    %150 = vector.load %arg16[%c2_156, %c8_157, %c0_158] : memref<10x24x4xf32, #tpu.memory_space<vmem>>, vector<8x8x4xf32>
    %151 = vector.shape_cast %150 : vector<8x8x4xf32> to vector<64x4xf32>
    %c2_159 = arith.constant 2 : index
    %c1_160 = arith.constant 1 : index
    %c0_161 = arith.constant 0 : index
    %c0_162 = arith.constant 0 : index
    %152 = vector.load %arg6[%c2_159, %c1_160, %c0_161, %c0_162] : memref<3x3x4x4xf32, #tpu.memory_space<vmem>>, vector<1x1x4x4xf32>
    %153 = vector.shape_cast %152 : vector<1x1x4x4xf32> to vector<4x4xf32>
    %cst_163 = arith.constant dense<0.000000e+00> : vector<64x4xf32>
    %154 = tpu.matmul %151, %153, %cst_163 {dimension_numbers = #tpu.dot_dimension_numbers<[1], [0], [0], [1], [0, 0, 1, 1], [], []>} : vector<64x4xf32>, vector<4x4xf32>, vector<64x4xf32> -> vector<64x4xf32>
    %155 = arith.addf %149, %154 : vector<64x4xf32>
    %c2_164 = arith.constant 2 : index
    %c9_165 = arith.constant 9 : index
    %c0_166 = arith.constant 0 : index
    %156 = vector.load %arg16[%c2_164, %c9_165, %c0_166] : memref<10x24x4xf32, #tpu.memory_space<vmem>>, vector<8x8x4xf32>
    %157 = vector.shape_cast %156 : vector<8x8x4xf32> to vector<64x4xf32>
    %c2_167 = arith.constant 2 : index
    %c2_168 = arith.constant 2 : index
    %c0_169 = arith.constant 0 : index
    %c0_170 = arith.constant 0 : index
    %158 = vector.load %arg6[%c2_167, %c2_168, %c0_169, %c0_170] : memref<3x3x4x4xf32, #tpu.memory_space<vmem>>, vector<1x1x4x4xf32>
    %159 = vector.shape_cast %158 : vector<1x1x4x4xf32> to vector<4x4xf32>
    %cst_171 = arith.constant dense<0.000000e+00> : vector<64x4xf32>
    %160 = tpu.matmul %157, %159, %cst_171 {dimension_numbers = #tpu.dot_dimension_numbers<[1], [0], [0], [1], [0, 0, 1, 1], [], []>} : vector<64x4xf32>, vector<4x4xf32>, vector<64x4xf32> -> vector<64x4xf32>
    %161 = arith.addf %155, %160 : vector<64x4xf32>
    %162 = vector.shape_cast %161 : vector<64x4xf32> to vector<1x64x4xf32>
    %cst_172 = arith.constant dense<0.000000e+00> : vector<1xf32>
    %163 = vector.multi_reduction <add>, %162, %cst_172 [1, 2] : vector<1x64x4xf32> to vector<1xf32>
    %164 = vector.shape_cast %163 : vector<1xf32> to vector<1x1x1xf32>
    %165 = vector.extract %164[0, 0, 0] : f32 from vector<1x1x1xf32>
    %cst_173 = arith.constant 2.560000e+02 : f32
    %166 = arith.divf %165, %cst_173 : f32
    %167 = vector.broadcast %166 : f32 to vector<64x4xf32>
    %168 = arith.subf %161, %167 : vector<64x4xf32>
    %169 = arith.mulf %168, %168 : vector<64x4xf32>
    %170 = vector.shape_cast %169 : vector<64x4xf32> to vector<1x64x4xf32>
    %cst_174 = arith.constant dense<0.000000e+00> : vector<1xf32>
    %171 = vector.multi_reduction <add>, %170, %cst_174 [1, 2] : vector<1x64x4xf32> to vector<1xf32>
    %172 = vector.shape_cast %171 : vector<1xf32> to vector<1x1x1xf32>
    %173 = vector.extract %172[0, 0, 0] : f32 from vector<1x1x1xf32>
    %cst_175 = arith.constant 2.560000e+02 : f32
    %174 = arith.divf %173, %cst_175 : f32
    %175 = vector.broadcast %166 : f32 to vector<64x4xf32>
    %176 = arith.subf %161, %175 : vector<64x4xf32>
    %cst_176 = arith.constant 9.99999974E-6 : f32
    %177 = arith.addf %174, %cst_176 : f32
    %178 = math.rsqrt %177 : f32
    %179 = vector.broadcast %178 : f32 to vector<64x4xf32>
    %180 = arith.mulf %176, %179 : vector<64x4xf32>
    %c0_177 = arith.constant 0 : index
    %c0_178 = arith.constant 0 : index
    %181 = vector.load %arg7[%c0_177, %c0_178] : memref<1x4xf32, #tpu.memory_space<vmem>>, vector<1x4xf32>
    %182 = vector.broadcast %181 : vector<1x4xf32> to vector<64x4xf32>
    %183 = arith.mulf %180, %182 : vector<64x4xf32>
    %c0_179 = arith.constant 0 : index
    %c0_180 = arith.constant 0 : index
    %184 = vector.load %arg8[%c0_179, %c0_180] : memref<1x4xf32, #tpu.memory_space<vmem>>, vector<1x4xf32>
    %185 = vector.broadcast %184 : vector<1x4xf32> to vector<64x4xf32>
    %186 = arith.addf %183, %185 : vector<64x4xf32>
    %187 = arith.addf %15, %186 : vector<64x4xf32>
    %cst_181 = arith.constant 5.000000e-01 : f32
    %188 = vector.broadcast %cst_181 : f32 to vector<64x4xf32>
    %189 = arith.mulf %188, %187 : vector<64x4xf32>
    %cst_182 = arith.constant 0.707106769 : f32
    %190 = vector.broadcast %cst_182 : f32 to vector<64x4xf32>
    %191 = arith.mulf %187, %190 : vector<64x4xf32>
    %192 = math.erf %191 : vector<64x4xf32>
    %cst_183 = arith.constant 1.000000e+00 : f32
    %193 = vector.broadcast %cst_183 : f32 to vector<64x4xf32>
    %194 = arith.addf %193, %192 : vector<64x4xf32>
    %195 = arith.mulf %189, %194 : vector<64x4xf32>
    %196 = vector.shape_cast %195 : vector<64x4xf32> to vector<8x8x4xf32>
    %c1_184 = arith.constant 1 : index
    %c8_185 = arith.constant 8 : index
    %c0_186 = arith.constant 0 : index
    %197 = vector.load %arg16[%c1_184, %c8_185, %c0_186] : memref<10x24x4xf32, #tpu.memory_space<vmem>>, vector<8x8x4xf32>
    tpu.vector_store %arg16[%c1_184, %c8_185, %c0_186], %196 {strides = array<i32>} : memref<10x24x4xf32, #tpu.memory_space<vmem>>, vector<8x8x4xf32>,
    %cst_187 = arith.constant 0.000000e+00 : f32
    %198 = vector.broadcast %cst_187 : f32 to vector<64x8xf32>
    %c0_188 = arith.constant 0 : index
    %c7_189 = arith.constant 7 : index
    %c0_190 = arith.constant 0 : index
    %199 = vector.load %arg16[%c0_188, %c7_189, %c0_190] : memref<10x24x4xf32, #tpu.memory_space<vmem>>, vector<8x8x4xf32>
    %200 = vector.shape_cast %199 : vector<8x8x4xf32> to vector<64x4xf32>
    %c0_191 = arith.constant 0 : index
    %c0_192 = arith.constant 0 : index
    %c0_193 = arith.constant 0 : index
    %c0_194 = arith.constant 0 : index
    %201 = vector.load %arg9[%c0_191, %c0_192, %c0_193, %c0_194] : memref<3x3x4x8xf32, #tpu.memory_space<vmem>>, vector<1x1x4x8xf32>
    %202 = vector.shape_cast %201 : vector<1x1x4x8xf32> to vector<4x8xf32>
    %cst_195 = arith.constant dense<0.000000e+00> : vector<64x8xf32>
    %203 = tpu.matmul %200, %202, %cst_195 {dimension_numbers = #tpu.dot_dimension_numbers<[1], [0], [0], [1], [0, 0, 1, 1], [], []>} : vector<64x4xf32>, vector<4x8xf32>, vector<64x8xf32> -> vector<64x8xf32>
    %204 = arith.addf %198, %203 : vector<64x8xf32>
    %c0_196 = arith.constant 0 : index
    %c8_197 = arith.constant 8 : index
    %c0_198 = arith.constant 0 : index
    %205 = vector.load %arg16[%c0_196, %c8_197, %c0_198] : memref<10x24x4xf32, #tpu.memory_space<vmem>>, vector<8x8x4xf32>
    %206 = vector.shape_cast %205 : vector<8x8x4xf32> to vector<64x4xf32>
    %c0_199 = arith.constant 0 : index
    %c1_200 = arith.constant 1 : index
    %c0_201 = arith.constant 0 : index
    %c0_202 = arith.constant 0 : index
    %207 = vector.load %arg9[%c0_199, %c1_200, %c0_201, %c0_202] : memref<3x3x4x8xf32, #tpu.memory_space<vmem>>, vector<1x1x4x8xf32>
    %208 = vector.shape_cast %207 : vector<1x1x4x8xf32> to vector<4x8xf32>
    %cst_203 = arith.constant dense<0.000000e+00> : vector<64x8xf32>
    %209 = tpu.matmul %206, %208, %cst_203 {dimension_numbers = #tpu.dot_dimension_numbers<[1], [0], [0], [1], [0, 0, 1, 1], [], []>} : vector<64x4xf32>, vector<4x8xf32>, vector<64x8xf32> -> vector<64x8xf32>
    %210 = arith.addf %204, %209 : vector<64x8xf32>
    %c0_204 = arith.constant 0 : index
    %c9_205 = arith.constant 9 : index
    %c0_206 = arith.constant 0 : index
    %211 = vector.load %arg16[%c0_204, %c9_205, %c0_206] : memref<10x24x4xf32, #tpu.memory_space<vmem>>, vector<8x8x4xf32>
    %212 = vector.shape_cast %211 : vector<8x8x4xf32> to vector<64x4xf32>
    %c0_207 = arith.constant 0 : index
    %c2_208 = arith.constant 2 : index
    %c0_209 = arith.constant 0 : index
    %c0_210 = arith.constant 0 : index
    %213 = vector.load %arg9[%c0_207, %c2_208, %c0_209, %c0_210] : memref<3x3x4x8xf32, #tpu.memory_space<vmem>>, vector<1x1x4x8xf32>
    %214 = vector.shape_cast %213 : vector<1x1x4x8xf32> to vector<4x8xf32>
    %cst_211 = arith.constant dense<0.000000e+00> : vector<64x8xf32>
    %215 = tpu.matmul %212, %214, %cst_211 {dimension_numbers = #tpu.dot_dimension_numbers<[1], [0], [0], [1], [0, 0, 1, 1], [], []>} : vector<64x4xf32>, vector<4x8xf32>, vector<64x8xf32> -> vector<64x8xf32>
    %216 = arith.addf %210, %215 : vector<64x8xf32>
    %c1_212 = arith.constant 1 : index
    %c7_213 = arith.constant 7 : index
    %c0_214 = arith.constant 0 : index
    %217 = vector.load %arg16[%c1_212, %c7_213, %c0_214] : memref<10x24x4xf32, #tpu.memory_space<vmem>>, vector<8x8x4xf32>
    %218 = vector.shape_cast %217 : vector<8x8x4xf32> to vector<64x4xf32>
    %c1_215 = arith.constant 1 : index
    %c0_216 = arith.constant 0 : index
    %c0_217 = arith.constant 0 : index
    %c0_218 = arith.constant 0 : index
    %219 = vector.load %arg9[%c1_215, %c0_216, %c0_217, %c0_218] : memref<3x3x4x8xf32, #tpu.memory_space<vmem>>, vector<1x1x4x8xf32>
    %220 = vector.shape_cast %219 : vector<1x1x4x8xf32> to vector<4x8xf32>
    %cst_219 = arith.constant dense<0.000000e+00> : vector<64x8xf32>
    %221 = tpu.matmul %218, %220, %cst_219 {dimension_numbers = #tpu.dot_dimension_numbers<[1], [0], [0], [1], [0, 0, 1, 1], [], []>} : vector<64x4xf32>, vector<4x8xf32>, vector<64x8xf32> -> vector<64x8xf32>
    %222 = arith.addf %216, %221 : vector<64x8xf32>
    %c1_220 = arith.constant 1 : index
    %c8_221 = arith.constant 8 : index
    %c0_222 = arith.constant 0 : index
    %223 = vector.load %arg16[%c1_220, %c8_221, %c0_222] : memref<10x24x4xf32, #tpu.memory_space<vmem>>, vector<8x8x4xf32>
    %224 = vector.shape_cast %223 : vector<8x8x4xf32> to vector<64x4xf32>
    %c1_223 = arith.constant 1 : index
    %c1_224 = arith.constant 1 : index
    %c0_225 = arith.constant 0 : index
    %c0_226 = arith.constant 0 : index
    %225 = vector.load %arg9[%c1_223, %c1_224, %c0_225, %c0_226] : memref<3x3x4x8xf32, #tpu.memory_space<vmem>>, vector<1x1x4x8xf32>
    %226 = vector.shape_cast %225 : vector<1x1x4x8xf32> to vector<4x8xf32>
    %cst_227 = arith.constant dense<0.000000e+00> : vector<64x8xf32>
    %227 = tpu.matmul %224, %226, %cst_227 {dimension_numbers = #tpu.dot_dimension_numbers<[1], [0], [0], [1], [0, 0, 1, 1], [], []>} : vector<64x4xf32>, vector<4x8xf32>, vector<64x8xf32> -> vector<64x8xf32>
    %228 = arith.addf %222, %227 : vector<64x8xf32>
    %c1_228 = arith.constant 1 : index
    %c9_229 = arith.constant 9 : index
    %c0_230 = arith.constant 0 : index
    %229 = vector.load %arg16[%c1_228, %c9_229, %c0_230] : memref<10x24x4xf32, #tpu.memory_space<vmem>>, vector<8x8x4xf32>
    %230 = vector.shape_cast %229 : vector<8x8x4xf32> to vector<64x4xf32>
    %c1_231 = arith.constant 1 : index
    %c2_232 = arith.constant 2 : index
    %c0_233 = arith.constant 0 : index
    %c0_234 = arith.constant 0 : index
    %231 = vector.load %arg9[%c1_231, %c2_232, %c0_233, %c0_234] : memref<3x3x4x8xf32, #tpu.memory_space<vmem>>, vector<1x1x4x8xf32>
    %232 = vector.shape_cast %231 : vector<1x1x4x8xf32> to vector<4x8xf32>
    %cst_235 = arith.constant dense<0.000000e+00> : vector<64x8xf32>
    %233 = tpu.matmul %230, %232, %cst_235 {dimension_numbers = #tpu.dot_dimension_numbers<[1], [0], [0], [1], [0, 0, 1, 1], [], []>} : vector<64x4xf32>, vector<4x8xf32>, vector<64x8xf32> -> vector<64x8xf32>
    %234 = arith.addf %228, %233 : vector<64x8xf32>
    %c2_236 = arith.constant 2 : index
    %c7_237 = arith.constant 7 : index
    %c0_238 = arith.constant 0 : index
    %235 = vector.load %arg16[%c2_236, %c7_237, %c0_238] : memref<10x24x4xf32, #tpu.memory_space<vmem>>, vector<8x8x4xf32>
    %236 = vector.shape_cast %235 : vector<8x8x4xf32> to vector<64x4xf32>
    %c2_239 = arith.constant 2 : index
    %c0_240 = arith.constant 0 : index
    %c0_241 = arith.constant 0 : index
    %c0_242 = arith.constant 0 : index
    %237 = vector.load %arg9[%c2_239, %c0_240, %c0_241, %c0_242] : memref<3x3x4x8xf32, #tpu.memory_space<vmem>>, vector<1x1x4x8xf32>
    %238 = vector.shape_cast %237 : vector<1x1x4x8xf32> to vector<4x8xf32>
    %cst_243 = arith.constant dense<0.000000e+00> : vector<64x8xf32>
    %239 = tpu.matmul %236, %238, %cst_243 {dimension_numbers = #tpu.dot_dimension_numbers<[1], [0], [0], [1], [0, 0, 1, 1], [], []>} : vector<64x4xf32>, vector<4x8xf32>, vector<64x8xf32> -> vector<64x8xf32>
    %240 = arith.addf %234, %239 : vector<64x8xf32>
    %c2_244 = arith.constant 2 : index
    %c8_245 = arith.constant 8 : index
    %c0_246 = arith.constant 0 : index
    %241 = vector.load %arg16[%c2_244, %c8_245, %c0_246] : memref<10x24x4xf32, #tpu.memory_space<vmem>>, vector<8x8x4xf32>
    %242 = vector.shape_cast %241 : vector<8x8x4xf32> to vector<64x4xf32>
    %c2_247 = arith.constant 2 : index
    %c1_248 = arith.constant 1 : index
    %c0_249 = arith.constant 0 : index
    %c0_250 = arith.constant 0 : index
    %243 = vector.load %arg9[%c2_247, %c1_248, %c0_249, %c0_250] : memref<3x3x4x8xf32, #tpu.memory_space<vmem>>, vector<1x1x4x8xf32>
    %244 = vector.shape_cast %243 : vector<1x1x4x8xf32> to vector<4x8xf32>
    %cst_251 = arith.constant dense<0.000000e+00> : vector<64x8xf32>
    %245 = tpu.matmul %242, %244, %cst_251 {dimension_numbers = #tpu.dot_dimension_numbers<[1], [0], [0], [1], [0, 0, 1, 1], [], []>} : vector<64x4xf32>, vector<4x8xf32>, vector<64x8xf32> -> vector<64x8xf32>
    %246 = arith.addf %240, %245 : vector<64x8xf32>
    %c2_252 = arith.constant 2 : index
    %c9_253 = arith.constant 9 : index
    %c0_254 = arith.constant 0 : index
    %247 = vector.load %arg16[%c2_252, %c9_253, %c0_254] : memref<10x24x4xf32, #tpu.memory_space<vmem>>, vector<8x8x4xf32>
    %248 = vector.shape_cast %247 : vector<8x8x4xf32> to vector<64x4xf32>
    %c2_255 = arith.constant 2 : index
    %c2_256 = arith.constant 2 : index
    %c0_257 = arith.constant 0 : index
    %c0_258 = arith.constant 0 : index
    %249 = vector.load %arg9[%c2_255, %c2_256, %c0_257, %c0_258] : memref<3x3x4x8xf32, #tpu.memory_space<vmem>>, vector<1x1x4x8xf32>
    %250 = vector.shape_cast %249 : vector<1x1x4x8xf32> to vector<4x8xf32>
    %cst_259 = arith.constant dense<0.000000e+00> : vector<64x8xf32>
    %251 = tpu.matmul %248, %250, %cst_259 {dimension_numbers = #tpu.dot_dimension_numbers<[1], [0], [0], [1], [0, 0, 1, 1], [], []>} : vector<64x4xf32>, vector<4x8xf32>, vector<64x8xf32> -> vector<64x8xf32>
    %252 = arith.addf %246, %251 : vector<64x8xf32>
    %253 = vector.shape_cast %252 : vector<64x8xf32> to vector<1x64x8xf32>
    %cst_260 = arith.constant dense<0.000000e+00> : vector<1xf32>
    %254 = vector.multi_reduction <add>, %253, %cst_260 [1, 2] : vector<1x64x8xf32> to vector<1xf32>
    %255 = vector.shape_cast %254 : vector<1xf32> to vector<1x1x1xf32>
    %256 = vector.extract %255[0, 0, 0] : f32 from vector<1x1x1xf32>
    %cst_261 = arith.constant 5.120000e+02 : f32
    %257 = arith.divf %256, %cst_261 : f32
    %258 = vector.broadcast %257 : f32 to vector<64x8xf32>
    %259 = arith.subf %252, %258 : vector<64x8xf32>
    %260 = arith.mulf %259, %259 : vector<64x8xf32>
    %261 = vector.shape_cast %260 : vector<64x8xf32> to vector<1x64x8xf32>
    %cst_262 = arith.constant dense<0.000000e+00> : vector<1xf32>
    %262 = vector.multi_reduction <add>, %261, %cst_262 [1, 2] : vector<1x64x8xf32> to vector<1xf32>
    %263 = vector.shape_cast %262 : vector<1xf32> to vector<1x1x1xf32>
    %264 = vector.extract %263[0, 0, 0] : f32 from vector<1x1x1xf32>
    %cst_263 = arith.constant 5.120000e+02 : f32
    %265 = arith.divf %264, %cst_263 : f32
    %266 = vector.broadcast %257 : f32 to vector<64x8xf32>
    %267 = arith.subf %252, %266 : vector<64x8xf32>
    %cst_264 = arith.constant 9.99999974E-6 : f32
    %268 = arith.addf %265, %cst_264 : f32
    %269 = math.rsqrt %268 : f32
    %270 = vector.broadcast %269 : f32 to vector<64x8xf32>
    %271 = arith.mulf %267, %270 : vector<64x8xf32>
    %c0_265 = arith.constant 0 : index
    %c0_266 = arith.constant 0 : index
    %272 = vector.load %arg10[%c0_265, %c0_266] : memref<1x8xf32, #tpu.memory_space<vmem>>, vector<1x8xf32>
    %273 = vector.broadcast %272 : vector<1x8xf32> to vector<64x8xf32>
    %274 = arith.mulf %271, %273 : vector<64x8xf32>
    %c0_267 = arith.constant 0 : index
    %c0_268 = arith.constant 0 : index
    %275 = vector.load %arg11[%c0_267, %c0_268] : memref<1x8xf32, #tpu.memory_space<vmem>>, vector<1x8xf32>
    %276 = vector.broadcast %275 : vector<1x8xf32> to vector<64x8xf32>
    %277 = arith.addf %274, %276 : vector<64x8xf32>
    %cst_269 = arith.constant 5.000000e-01 : f32
    %278 = vector.broadcast %cst_269 : f32 to vector<64x8xf32>
    %279 = arith.mulf %278, %277 : vector<64x8xf32>
    %cst_270 = arith.constant 0.707106769 : f32
    %280 = vector.broadcast %cst_270 : f32 to vector<64x8xf32>
    %281 = arith.mulf %277, %280 : vector<64x8xf32>
    %282 = math.erf %281 : vector<64x8xf32>
    %cst_271 = arith.constant 1.000000e+00 : f32
    %283 = vector.broadcast %cst_271 : f32 to vector<64x8xf32>
    %284 = arith.addf %283, %282 : vector<64x8xf32>
    %285 = arith.mulf %279, %284 : vector<64x8xf32>
    %286 = vector.shape_cast %285 : vector<64x8xf32> to vector<8x8x8xf32>
    %c1_272 = arith.constant 1 : index
    %c8_273 = arith.constant 8 : index
    %c0_274 = arith.constant 0 : index
    %287 = vector.load %arg17[%c1_272, %c8_273, %c0_274] : memref<10x24x8xf32, #tpu.memory_space<vmem>>, vector<8x8x8xf32>
    tpu.vector_store %arg17[%c1_272, %c8_273, %c0_274], %286 {strides = array<i32>} : memref<10x24x8xf32, #tpu.memory_space<vmem>>, vector<8x8x8xf32>,
    %cst_275 = arith.constant 0.000000e+00 : f32
    %288 = vector.broadcast %cst_275 : f32 to vector<64x8xf32>
    %c0_276 = arith.constant 0 : index
    %c7_277 = arith.constant 7 : index
    %c0_278 = arith.constant 0 : index
    %289 = vector.load %arg17[%c0_276, %c7_277, %c0_278] : memref<10x24x8xf32, #tpu.memory_space<vmem>>, vector<8x8x8xf32>
    %290 = vector.shape_cast %289 : vector<8x8x8xf32> to vector<64x8xf32>
    %c0_279 = arith.constant 0 : index
    %c0_280 = arith.constant 0 : index
    %c0_281 = arith.constant 0 : index
    %c0_282 = arith.constant 0 : index
    %291 = vector.load %arg12[%c0_279, %c0_280, %c0_281, %c0_282] : memref<3x3x8x8xf32, #tpu.memory_space<vmem>>, vector<1x1x8x8xf32>
    %292 = vector.shape_cast %291 : vector<1x1x8x8xf32> to vector<8x8xf32>
    %cst_283 = arith.constant dense<0.000000e+00> : vector<64x8xf32>
    %293 = tpu.matmul %290, %292, %cst_283 {dimension_numbers = #tpu.dot_dimension_numbers<[1], [0], [0], [1], [0, 0, 1, 1], [], []>} : vector<64x8xf32>, vector<8x8xf32>, vector<64x8xf32> -> vector<64x8xf32>
    %294 = arith.addf %288, %293 : vector<64x8xf32>
    %c0_284 = arith.constant 0 : index
    %c8_285 = arith.constant 8 : index
    %c0_286 = arith.constant 0 : index
    %295 = vector.load %arg17[%c0_284, %c8_285, %c0_286] : memref<10x24x8xf32, #tpu.memory_space<vmem>>, vector<8x8x8xf32>
    %296 = vector.shape_cast %295 : vector<8x8x8xf32> to vector<64x8xf32>
    %c0_287 = arith.constant 0 : index
    %c1_288 = arith.constant 1 : index
    %c0_289 = arith.constant 0 : index
    %c0_290 = arith.constant 0 : index
    %297 = vector.load %arg12[%c0_287, %c1_288, %c0_289, %c0_290] : memref<3x3x8x8xf32, #tpu.memory_space<vmem>>, vector<1x1x8x8xf32>
    %298 = vector.shape_cast %297 : vector<1x1x8x8xf32> to vector<8x8xf32>
    %cst_291 = arith.constant dense<0.000000e+00> : vector<64x8xf32>
    %299 = tpu.matmul %296, %298, %cst_291 {dimension_numbers = #tpu.dot_dimension_numbers<[1], [0], [0], [1], [0, 0, 1, 1], [], []>} : vector<64x8xf32>, vector<8x8xf32>, vector<64x8xf32> -> vector<64x8xf32>
    %300 = arith.addf %294, %299 : vector<64x8xf32>
    %c0_292 = arith.constant 0 : index
    %c9_293 = arith.constant 9 : index
    %c0_294 = arith.constant 0 : index
    %301 = vector.load %arg17[%c0_292, %c9_293, %c0_294] : memref<10x24x8xf32, #tpu.memory_space<vmem>>, vector<8x8x8xf32>
    %302 = vector.shape_cast %301 : vector<8x8x8xf32> to vector<64x8xf32>
    %c0_295 = arith.constant 0 : index
    %c2_296 = arith.constant 2 : index
    %c0_297 = arith.constant 0 : index
    %c0_298 = arith.constant 0 : index
    %303 = vector.load %arg12[%c0_295, %c2_296, %c0_297, %c0_298] : memref<3x3x8x8xf32, #tpu.memory_space<vmem>>, vector<1x1x8x8xf32>
    %304 = vector.shape_cast %303 : vector<1x1x8x8xf32> to vector<8x8xf32>
    %cst_299 = arith.constant dense<0.000000e+00> : vector<64x8xf32>
    %305 = tpu.matmul %302, %304, %cst_299 {dimension_numbers = #tpu.dot_dimension_numbers<[1], [0], [0], [1], [0, 0, 1, 1], [], []>} : vector<64x8xf32>, vector<8x8xf32>, vector<64x8xf32> -> vector<64x8xf32>
    %306 = arith.addf %300, %305 : vector<64x8xf32>
    %c1_300 = arith.constant 1 : index
    %c7_301 = arith.constant 7 : index
    %c0_302 = arith.constant 0 : index
    %307 = vector.load %arg17[%c1_300, %c7_301, %c0_302] : memref<10x24x8xf32, #tpu.memory_space<vmem>>, vector<8x8x8xf32>
    %308 = vector.shape_cast %307 : vector<8x8x8xf32> to vector<64x8xf32>
    %c1_303 = arith.constant 1 : index
    %c0_304 = arith.constant 0 : index
    %c0_305 = arith.constant 0 : index
    %c0_306 = arith.constant 0 : index
    %309 = vector.load %arg12[%c1_303, %c0_304, %c0_305, %c0_306] : memref<3x3x8x8xf32, #tpu.memory_space<vmem>>, vector<1x1x8x8xf32>
    %310 = vector.shape_cast %309 : vector<1x1x8x8xf32> to vector<8x8xf32>
    %cst_307 = arith.constant dense<0.000000e+00> : vector<64x8xf32>
    %311 = tpu.matmul %308, %310, %cst_307 {dimension_numbers = #tpu.dot_dimension_numbers<[1], [0], [0], [1], [0, 0, 1, 1], [], []>} : vector<64x8xf32>, vector<8x8xf32>, vector<64x8xf32> -> vector<64x8xf32>
    %312 = arith.addf %306, %311 : vector<64x8xf32>
    %c1_308 = arith.constant 1 : index
    %c8_309 = arith.constant 8 : index
    %c0_310 = arith.constant 0 : index
    %313 = vector.load %arg17[%c1_308, %c8_309, %c0_310] : memref<10x24x8xf32, #tpu.memory_space<vmem>>, vector<8x8x8xf32>
    %314 = vector.shape_cast %313 : vector<8x8x8xf32> to vector<64x8xf32>
    %c1_311 = arith.constant 1 : index
    %c1_312 = arith.constant 1 : index
    %c0_313 = arith.constant 0 : index
    %c0_314 = arith.constant 0 : index
    %315 = vector.load %arg12[%c1_311, %c1_312, %c0_313, %c0_314] : memref<3x3x8x8xf32, #tpu.memory_space<vmem>>, vector<1x1x8x8xf32>
    %316 = vector.shape_cast %315 : vector<1x1x8x8xf32> to vector<8x8xf32>
    %cst_315 = arith.constant dense<0.000000e+00> : vector<64x8xf32>
    %317 = tpu.matmul %314, %316, %cst_315 {dimension_numbers = #tpu.dot_dimension_numbers<[1], [0], [0], [1], [0, 0, 1, 1], [], []>} : vector<64x8xf32>, vector<8x8xf32>, vector<64x8xf32> -> vector<64x8xf32>
    %318 = arith.addf %312, %317 : vector<64x8xf32>
    %c1_316 = arith.constant 1 : index
    %c9_317 = arith.constant 9 : index
    %c0_318 = arith.constant 0 : index
    %319 = vector.load %arg17[%c1_316, %c9_317, %c0_318] : memref<10x24x8xf32, #tpu.memory_space<vmem>>, vector<8x8x8xf32>
    %320 = vector.shape_cast %319 : vector<8x8x8xf32> to vector<64x8xf32>
    %c1_319 = arith.constant 1 : index
    %c2_320 = arith.constant 2 : index
    %c0_321 = arith.constant 0 : index
    %c0_322 = arith.constant 0 : index
    %321 = vector.load %arg12[%c1_319, %c2_320, %c0_321, %c0_322] : memref<3x3x8x8xf32, #tpu.memory_space<vmem>>, vector<1x1x8x8xf32>
    %322 = vector.shape_cast %321 : vector<1x1x8x8xf32> to vector<8x8xf32>
    %cst_323 = arith.constant dense<0.000000e+00> : vector<64x8xf32>
    %323 = tpu.matmul %320, %322, %cst_323 {dimension_numbers = #tpu.dot_dimension_numbers<[1], [0], [0], [1], [0, 0, 1, 1], [], []>} : vector<64x8xf32>, vector<8x8xf32>, vector<64x8xf32> -> vector<64x8xf32>
    %324 = arith.addf %318, %323 : vector<64x8xf32>
    %c2_324 = arith.constant 2 : index
    %c7_325 = arith.constant 7 : index
    %c0_326 = arith.constant 0 : index
    %325 = vector.load %arg17[%c2_324, %c7_325, %c0_326] : memref<10x24x8xf32, #tpu.memory_space<vmem>>, vector<8x8x8xf32>
    %326 = vector.shape_cast %325 : vector<8x8x8xf32> to vector<64x8xf32>
    %c2_327 = arith.constant 2 : index
    %c0_328 = arith.constant 0 : index
    %c0_329 = arith.constant 0 : index
    %c0_330 = arith.constant 0 : index
    %327 = vector.load %arg12[%c2_327, %c0_328, %c0_329, %c0_330] : memref<3x3x8x8xf32, #tpu.memory_space<vmem>>, vector<1x1x8x8xf32>
    %328 = vector.shape_cast %327 : vector<1x1x8x8xf32> to vector<8x8xf32>
    %cst_331 = arith.constant dense<0.000000e+00> : vector<64x8xf32>
    %329 = tpu.matmul %326, %328, %cst_331 {dimension_numbers = #tpu.dot_dimension_numbers<[1], [0], [0], [1], [0, 0, 1, 1], [], []>} : vector<64x8xf32>, vector<8x8xf32>, vector<64x8xf32> -> vector<64x8xf32>
    %330 = arith.addf %324, %329 : vector<64x8xf32>
    %c2_332 = arith.constant 2 : index
    %c8_333 = arith.constant 8 : index
    %c0_334 = arith.constant 0 : index
    %331 = vector.load %arg17[%c2_332, %c8_333, %c0_334] : memref<10x24x8xf32, #tpu.memory_space<vmem>>, vector<8x8x8xf32>
    %332 = vector.shape_cast %331 : vector<8x8x8xf32> to vector<64x8xf32>
    %c2_335 = arith.constant 2 : index
    %c1_336 = arith.constant 1 : index
    %c0_337 = arith.constant 0 : index
    %c0_338 = arith.constant 0 : index
    %333 = vector.load %arg12[%c2_335, %c1_336, %c0_337, %c0_338] : memref<3x3x8x8xf32, #tpu.memory_space<vmem>>, vector<1x1x8x8xf32>
    %334 = vector.shape_cast %333 : vector<1x1x8x8xf32> to vector<8x8xf32>
    %cst_339 = arith.constant dense<0.000000e+00> : vector<64x8xf32>
    %335 = tpu.matmul %332, %334, %cst_339 {dimension_numbers = #tpu.dot_dimension_numbers<[1], [0], [0], [1], [0, 0, 1, 1], [], []>} : vector<64x8xf32>, vector<8x8xf32>, vector<64x8xf32> -> vector<64x8xf32>
    %336 = arith.addf %330, %335 : vector<64x8xf32>
    %c2_340 = arith.constant 2 : index
    %c9_341 = arith.constant 9 : index
    %c0_342 = arith.constant 0 : index
    %337 = vector.load %arg17[%c2_340, %c9_341, %c0_342] : memref<10x24x8xf32, #tpu.memory_space<vmem>>, vector<8x8x8xf32>
    %338 = vector.shape_cast %337 : vector<8x8x8xf32> to vector<64x8xf32>
    %c2_343 = arith.constant 2 : index
    %c2_344 = arith.constant 2 : index
    %c0_345 = arith.constant 0 : index
    %c0_346 = arith.constant 0 : index
    %339 = vector.load %arg12[%c2_343, %c2_344, %c0_345, %c0_346] : memref<3x3x8x8xf32, #tpu.memory_space<vmem>>, vector<1x1x8x8xf32>
    %340 = vector.shape_cast %339 : vector<1x1x8x8xf32> to vector<8x8xf32>
    %cst_347 = arith.constant dense<0.000000e+00> : vector<64x8xf32>
    %341 = tpu.matmul %338, %340, %cst_347 {dimension_numbers = #tpu.dot_dimension_numbers<[1], [0], [0], [1], [0, 0, 1, 1], [], []>} : vector<64x8xf32>, vector<8x8xf32>, vector<64x8xf32> -> vector<64x8xf32>
    %342 = arith.addf %336, %341 : vector<64x8xf32>
    %343 = vector.shape_cast %342 : vector<64x8xf32> to vector<1x64x8xf32>
    %cst_348 = arith.constant dense<0.000000e+00> : vector<1xf32>
    %344 = vector.multi_reduction <add>, %343, %cst_348 [1, 2] : vector<1x64x8xf32> to vector<1xf32>
    %345 = vector.shape_cast %344 : vector<1xf32> to vector<1x1x1xf32>
    %346 = vector.extract %345[0, 0, 0] : f32 from vector<1x1x1xf32>
    %cst_349 = arith.constant 5.120000e+02 : f32
    %347 = arith.divf %346, %cst_349 : f32
    %348 = vector.broadcast %347 : f32 to vector<64x8xf32>
    %349 = arith.subf %342, %348 : vector<64x8xf32>
    %350 = arith.mulf %349, %349 : vector<64x8xf32>
    %351 = vector.shape_cast %350 : vector<64x8xf32> to vector<1x64x8xf32>
    %cst_350 = arith.constant dense<0.000000e+00> : vector<1xf32>
    %352 = vector.multi_reduction <add>, %351, %cst_350 [1, 2] : vector<1x64x8xf32> to vector<1xf32>
    %353 = vector.shape_cast %352 : vector<1xf32> to vector<1x1x1xf32>
    %354 = vector.extract %353[0, 0, 0] : f32 from vector<1x1x1xf32>
    %cst_351 = arith.constant 5.120000e+02 : f32
    %355 = arith.divf %354, %cst_351 : f32
    %356 = vector.broadcast %347 : f32 to vector<64x8xf32>
    %357 = arith.subf %342, %356 : vector<64x8xf32>
    %cst_352 = arith.constant 9.99999974E-6 : f32
    %358 = arith.addf %355, %cst_352 : f32
    %359 = math.rsqrt %358 : f32
    %360 = vector.broadcast %359 : f32 to vector<64x8xf32>
    %361 = arith.mulf %357, %360 : vector<64x8xf32>
    %c0_353 = arith.constant 0 : index
    %c0_354 = arith.constant 0 : index
    %362 = vector.load %arg13[%c0_353, %c0_354] : memref<1x8xf32, #tpu.memory_space<vmem>>, vector<1x8xf32>
    %363 = vector.broadcast %362 : vector<1x8xf32> to vector<64x8xf32>
    %364 = arith.mulf %361, %363 : vector<64x8xf32>
    %c0_355 = arith.constant 0 : index
    %c0_356 = arith.constant 0 : index
    %365 = vector.load %arg14[%c0_355, %c0_356] : memref<1x8xf32, #tpu.memory_space<vmem>>, vector<1x8xf32>
    %366 = vector.broadcast %365 : vector<1x8xf32> to vector<64x8xf32>
    %367 = arith.addf %364, %366 : vector<64x8xf32>
    %c0_357 = arith.constant 0 : index
    %c0_358 = arith.constant 0 : index
    %c0_359 = arith.constant 0 : index
    %368 = vector.load %arg2[%c0_357, %c0_358, %c0_359] : memref<1x1x16xf32, #tpu.memory_space<vmem>>, vector<1x1x16xf32>
    %369 = vector.shape_cast %368 : vector<1x1x16xf32> to vector<1x16xf32>
    %370 = vector.extract_strided_slice %369 {offsets = [0, 0], sizes = [1, 8], strides = [1, 1]} : vector<1x16xf32> to vector<1x8xf32>
    %371 = vector.broadcast %370 : vector<1x8xf32> to vector<64x8xf32>
    %372 = arith.mulf %367, %371 : vector<64x8xf32>
    %373 = vector.extract_strided_slice %369 {offsets = [0, 8], sizes = [1, 8], strides = [1, 1]} : vector<1x16xf32> to vector<1x8xf32>
    %374 = vector.broadcast %373 : vector<1x8xf32> to vector<64x8xf32>
    %375 = arith.addf %372, %374 : vector<64x8xf32>
    %376 = vector.shape_cast %375 : vector<64x8xf32> to vector<1x8x8x8xf32>
    %c0_360 = arith.constant 0 : index
    %c0_361 = arith.constant 0 : index
    %c0_362 = arith.constant 0 : index
    %c0_363 = arith.constant 0 : index
    %377 = vector.load %arg15[%c0_360, %c0_361, %c0_362, %c0_363] : memref<1x8x8x8xf32, #tpu.memory_space<vmem>>, vector<1x8x8x8xf32>
    tpu.vector_store %arg15[%c0_360, %c0_361, %c0_362, %c0_363], %376 {strides = array<i32>} : memref<1x8x8x8xf32, #tpu.memory_space<vmem>>, vector<1x8x8x8xf32>,
    return
  }
  func.func @transform_0(%arg0: i32) -> (i32, i32, i32, i32) {
    %c0_i32 = arith.constant 0 : i32
    %c0_i32_0 = arith.constant 0 : i32
    %c0_i32_1 = arith.constant 0 : i32
    %c0_i32_2 = arith.constant 0 : i32
    return %arg0, %c0_i32, %c0_i32_0, %c0_i32_1 : i32, i32, i32, i32
  }
  func.func @transform_1(%arg0: i32) -> (i32, i32, i32) {
    %c0_i32 = arith.constant 0 : i32
    %c0_i32_0 = arith.constant 0 : i32
    %c0_i32_1 = arith.constant 0 : i32
    return %arg0, %c0_i32, %c0_i32_0 : i32, i32, i32
  }
  func.func @transform_2(%arg0: i32) -> (i32, i32, i32, i32) {
    %c0_i32 = arith.constant 0 : i32
    %c0_i32_0 = arith.constant 0 : i32
    %c0_i32_1 = arith.constant 0 : i32
    %c0_i32_2 = arith.constant 0 : i32
    %c0_i32_3 = arith.constant 0 : i32
    return %c0_i32, %c0_i32_0, %c0_i32_1, %c0_i32_2 : i32, i32, i32, i32
  }
  func.func @transform_3(%arg0: i32) -> (i32, i32) {
    %c0_i32 = arith.constant 0 : i32
    %c0_i32_0 = arith.constant 0 : i32
    %c0_i32_1 = arith.constant 0 : i32
    return %c0_i32, %c0_i32_0 : i32, i32
  }
  func.func @transform_4(%arg0: i32) -> (i32, i32) {
    %c0_i32 = arith.constant 0 : i32
    %c0_i32_0 = arith.constant 0 : i32
    %c0_i32_1 = arith.constant 0 : i32
    return %c0_i32, %c0_i32_0 : i32, i32
  }
  func.func @transform_5(%arg0: i32) -> (i32, i32, i32, i32) {
    %c0_i32 = arith.constant 0 : i32
    %c0_i32_0 = arith.constant 0 : i32
    %c0_i32_1 = arith.constant 0 : i32
    %c0_i32_2 = arith.constant 0 : i32
    %c0_i32_3 = arith.constant 0 : i32
    return %c0_i32, %c0_i32_0, %c0_i32_1, %c0_i32_2 : i32, i32, i32, i32
  }
  func.func @transform_6(%arg0: i32) -> (i32, i32) {
    %c0_i32 = arith.constant 0 : i32
    %c0_i32_0 = arith.constant 0 : i32
    %c0_i32_1 = arith.constant 0 : i32
    return %c0_i32, %c0_i32_0 : i32, i32
  }
  func.func @transform_7(%arg0: i32) -> (i32, i32) {
    %c0_i32 = arith.constant 0 : i32
    %c0_i32_0 = arith.constant 0 : i32
    %c0_i32_1 = arith.constant 0 : i32
    return %c0_i32, %c0_i32_0 : i32, i32
  }
  func.func @transform_8(%arg0: i32) -> (i32, i32, i32, i32) {
    %c0_i32 = arith.constant 0 : i32
    %c0_i32_0 = arith.constant 0 : i32
    %c0_i32_1 = arith.constant 0 : i32
    %c0_i32_2 = arith.constant 0 : i32
    %c0_i32_3 = arith.constant 0 : i32
    return %c0_i32, %c0_i32_0, %c0_i32_1, %c0_i32_2 : i32, i32, i32, i32
  }
  func.func @transform_9(%arg0: i32) -> (i32, i32) {
    %c0_i32 = arith.constant 0 : i32
    %c0_i32_0 = arith.constant 0 : i32
    %c0_i32_1 = arith.constant 0 : i32
    return %c0_i32, %c0_i32_0 : i32, i32
  }
  func.func @transform_10(%arg0: i32) -> (i32, i32) {
    %c0_i32 = arith.constant 0 : i32
    %c0_i32_0 = arith.constant 0 : i32
    %c0_i32_1 = arith.constant 0 : i32
    return %c0_i32, %c0_i32_0 : i32, i32
  }
  func.func @transform_11(%arg0: i32) -> (i32, i32, i32, i32) {
    %c0_i32 = arith.constant 0 : i32
    %c0_i32_0 = arith.constant 0 : i32
    %c0_i32_1 = arith.constant 0 : i32
    %c0_i32_2 = arith.constant 0 : i32
    %c0_i32_3 = arith.constant 0 : i32
    return %c0_i32, %c0_i32_0, %c0_i32_1, %c0_i32_2 : i32, i32, i32, i32
  }
  func.func @transform_12(%arg0: i32) -> (i32, i32) {
    %c0_i32 = arith.constant 0 : i32
    %c0_i32_0 = arith.constant 0 : i32
    %c0_i32_1 = arith.constant 0 : i32
    return %c0_i32, %c0_i32_0 : i32, i32
  }
  func.func @transform_13(%arg0: i32) -> (i32, i32) {
    %c0_i32 = arith.constant 0 : i32
    %c0_i32_0 = arith.constant 0 : i32
    %c0_i32_1 = arith.constant 0 : i32
    return %c0_i32, %c0_i32_0 : i32, i32
  }
  func.func @transform_14(%arg0: i32) -> (i32, i32, i32, i32) {
    %c0_i32 = arith.constant 0 : i32
    %c0_i32_0 = arith.constant 0 : i32
    %c0_i32_1 = arith.constant 0 : i32
    %c0_i32_2 = arith.constant 0 : i32
    return %arg0, %c0_i32, %c0_i32_0, %c0_i32_1 : i32, i32, i32, i32
  }
}

</mosaic_0001>

<bundles_post_ra>
// kernel: down_forward.1
= control target key start
LH: loop header
LB: loop body
LE: loop exit
PB: predicated region body
PF: predicated region fallthrough
CT: control target
= control target key end

     0   :  { %s8302_s29 = smov 0   ;;  %s9517_s0 = inlined_call_operand.vmem [shape: f32[2,16,8,8], index: 0, kind: input, shape index: {}]   ;;  %s9518_s1 = inlined_call_operand.vmem [shape: f32[2,1,16], index: 1, kind: input, shape index: {}]   ;;  %s9519_s2 = inlined_call_operand.vmem [shape: f32[3,3,4,4], index: 2, kind: input, shape index: {}]   ;;  %s9520_s3 = inlined_call_operand.vmem [shape: f32[1,4], index: 3, kind: input, shape index: {}]   ;;  %s9521_s4 = inlined_call_operand.vmem [shape: f32[1,4], index: 4, kind: input, shape index: {}]   ;;  %s9522_s5 = inlined_call_operand.vmem [shape: f32[3,3,4,4], index: 5, kind: input, shape index: {}]   ;;  %s9523_s6 = inlined_call_operand.vmem [shape: f32[1,4], index: 6, kind: input, shape index: {}]   ;;  %s9524_s7 = inlined_call_operand.vmem [shape: f32[1,4], index: 7, kind: input, shape index: {}]   ;;  %s9525_s8 = inlined_call_operand.vmem [shape: f32[3,3,4,8], index: 8, kind: input, shape index: {}]   ;;  %s9526_s9 = inlined_call_operand.vmem [shape: f32[1,8], index: 9, kind: input, shape index: {}]   ;;  %s9527_s10 = inlined_call_operand.vmem [shape: f32[1,8], index: 10, kind: input, shape index: {}]   ;;  %s9528_s11 = inlined_call_operand.vmem [shape: f32[3,3,8,8], index: 11, kind: input, shape index: {}]   ;;  %s9529_s12 = inlined_call_operand.vmem [shape: f32[1,8], index: 12, kind: input, shape index: {}]   ;;  %s9530_s13 = inlined_call_operand.vmem [shape: f32[1,8], index: 13, kind: input, shape index: {}]   ;;  %s9531_s14 = inlined_call_operand.vmem [shape: f32[2,8,8,8], index: 14, kind: output, shape index: {}]  }
   0x1 LB: > { %s6672_s30 = sadd.s32 4294967295, %s8222_s29   ;;  %p6676_p0 = scmp.ge.s32.totalorder %s8222_s29, 1  ;;  %s8222_s29 = sphi %s8302_s29, %s24_s29  }
   0x2   : > { %p420_p1 = scmp.lt.s32.totalorder %s8222_s29, 3 }
   0x4   : > { %p421_p2 = pnand %p6676_p0, %p420_p1 }
   0x5   : > { %p8312_p3 = scmp.lt.s32.totalorder (!%p421_p2), %s6672_s30, 1  ;;  %vm482_vm0 = vcmask (!%p421_p2), 31744   ;;  %v8224_v0 = vmov (!%p421_p2), 0.0   ;;  %s8225_s20 = smov (!%p421_p2), 124   ;;  %vm700_vm1 = vcmask (!%p421_p2), 1043456   ;;  %vm513_vm2 = vcmask (!%p421_p2), 64512  }
   0x6   : > { %424 = sbr.rel (%p421_p2) target bundleno = 3685 (0xe65), region = 76  ;;  %490 = vst.msk [vmem:[#allocation2 + $0x38] sm:$0xff] (!%p421_p2), %vm482_vm0, %v8224_v0  ;;  %483 = vst.msk [vmem:[#allocation2] sm:$0xff] (!%p421_p2), %vm482_vm0, %v8224_v0  ;;  %v6681_v8 = vld [vmem:[%s9519_s2 + $0x4] sm:$0xf] (!%p421_p2) }
   0x7   : > { %484 = vst.msk [vmem:[#allocation2 + $0x8] sm:$0xff] (!%p421_p2), %vm482_vm0, %v8224_v0  ;;  %485 = vst.msk [vmem:[#allocation2 + $0x10] sm:$0xff] (!%p421_p2), %vm482_vm0, %v8224_v0  ;;  %7365 = vmatprep.subr.msk.mxu0 (!%p421_p2), %vm700_vm1, %v6681_v8  ;;  %v665_v11 = vld [vmem:[%s9519_s2] sm:$0xf] (!%p421_p2)  ;;  %v6700_v44 = vld [vmem:[%s9519_s2 + $0x8] sm:$0xf] (!%p421_p2) }
   0x8   : > { %486 = vst.msk [vmem:[#allocation2 + $0x18] sm:$0xff] (!%p421_p2), %vm482_vm0, %v8224_v0  ;;  %487 = vst.msk [vmem:[#allocation2 + $0x20] sm:$0xff] (!%p421_p2), %vm482_vm0, %v8224_v0  ;;  %7366 = vmatpush3.msk.msra.mxu0 (!%p421_p2), %vm700_vm1, %v6681_v8 }
   0x9   : > { %488 = vst.msk [vmem:[#allocation2 + $0x28] sm:$0xff] (!%p421_p2), %vm482_vm0, %v8224_v0  ;;  %489 = vst.msk [vmem:[#allocation2 + $0x30] sm:$0xff] (!%p421_p2), %vm482_vm0, %v8224_v0  ;;  %7379 = vmatprep.subr.msk.mxu0 (!%p421_p2), %vm700_vm1, %v665_v11 }
   0xa   : > { %491 = vst.msk [vmem:[#allocation2 + $0x40] sm:$0xff] (!%p421_p2), %vm482_vm0, %v8224_v0  ;;  %492 = vst.msk [vmem:[#allocation2 + $0x48] sm:$0xff] (!%p421_p2), %vm482_vm0, %v8224_v0 }
   0xb   : > { %493 = vst.msk [vmem:[#allocation2 + $0x50] sm:$0xff] (!%p421_p2), %vm482_vm0, %v8224_v0  ;;  %494 = vst.msk [vmem:[#allocation2 + $0x58] sm:$0xff] (!%p421_p2), %vm482_vm0, %v8224_v0 }
   0xc   : > { %495 = vst.msk [vmem:[#allocation2 + $0x60] sm:$0xff] (!%p421_p2), %vm482_vm0, %v8224_v0  ;;  %496 = vst.msk [vmem:[#allocation2 + $0x68] sm:$0xff] (!%p421_p2), %vm482_vm0, %v8224_v0 }
   0xd   : > { %497 = vst.msk [vmem:[#allocation2 + $0x70] sm:$0xff] %vm482_vm0, %v8224_v0  ;;  %498 = vst.msk [vmem:[#allocation2 + $0x78] sm:$0xff] %vm482_vm0, %v8224_v0  ;;  %s9534_s30 = smov (!%p8312_p3, %s6672_s30), 1 }
   0xe   : > { %499 = vst.msk [vmem:[#allocation2 + $0x80] sm:$0xff] %vm482_vm0, %v8224_v0  ;;  %500 = vst.msk [vmem:[#allocation2 + $0x88] sm:$0xff] %vm482_vm0, %v8224_v0  ;;  %s7039_s16 = sshll.u32 %s9534_s30, 7  ;;  %v666_v5 = vld [vmem:[#allocation2 + $0x8] sm:$0xff]  ;;  %s476_s15 = scalar_lea.vmem %s9518_s1, %s9534_s30 }
   0xf   : > { %501 = vst.msk [vmem:[#allocation2 + $0x90] sm:$0xff] %vm482_vm0, %v8224_v0  ;;  %502 = vst.msk [vmem:[#allocation2 + $0x98] sm:$0xff] %vm482_vm0, %v8224_v0  ;;  %s8386_s19 = scalar_lea.vmem %s9517_s0, %s7039_s16  ;;  %7367 = vmatprep.mubr.msk.f32.mxu0 %vm482_vm0, %v666_v5  ;;  %7493 = vmatprep.mubr.msk.f32.mxu1 %vm482_vm0, %v666_v5  ;;  %s8226_s16 = smov 120  }
  0x10   : > { %503 = vst.msk [vmem:[#allocation2 + $0xa0] sm:$0xff] %vm482_vm0, %v8224_v0  ;;  %504 = vst.msk [vmem:[#allocation2 + $0xa8] sm:$0xff] %vm482_vm0, %v8224_v0  ;;  %v546_v1 = vld [vmem:[%s8386_s19 + $0x10] sm:$0xff]  ;;  %v544_v2 = vld [vmem:[%s8386_s19] sm:$0xff] }
  0x11   : > { %505 = vst.msk [vmem:[#allocation2 + $0xb0] sm:$0xff] %vm482_vm0, %v8224_v0  ;;  %506 = vst.msk [vmem:[#allocation2 + $0xb8] sm:$0xff] %vm482_vm0, %v8224_v0  ;;  %580 = vrot.lane.b32.xlu1 %v546_v1, %s8225_s20  ;;  %576 = vrot.lane.b32.xlu0 %v544_v2, %s8225_s20  ;;  %v547_v3 = vld [vmem:[%s8386_s19 + $0x18] sm:$0xff]  ;;  %v545_v4 = vld [vmem:[%s8386_s19 + $0x8] sm:$0xff] }
  0x12   : > { %507 = vst.msk [vmem:[#allocation2 + $0xc0] sm:$0xff] %vm482_vm0, %v8224_v0  ;;  %508 = vst.msk [vmem:[#allocation2 + $0xc8] sm:$0xff] %vm482_vm0, %v8224_v0  ;;  %v549_v6 = vld [vmem:[%s8386_s19 + $0x28] sm:$0xff]  ;;  %v548_v7 = vld [vmem:[%s8386_s19 + $0x20] sm:$0xff] }
  0x13   : > { %509 = vst.msk [vmem:[#allocation2 + $0xd0] sm:$0xff] %vm482_vm0, %v8224_v0  ;;  %510 = vst.msk [vmem:[#allocation2 + $0xd8] sm:$0xff] %vm482_vm0, %v8224_v0  ;;  %v551_v9 = vld [vmem:[%s8386_s19 + $0x38] sm:$0xff]  ;;  %v550_v10 = vld [vmem:[%s8386_s19 + $0x30] sm:$0xff] }
  0x14   : > { %511 = vst.msk [vmem:[#allocation2 + $0xe0] sm:$0xff] %vm482_vm0, %v8224_v0  ;;  %512 = vst.msk [vmem:[#allocation2 + $0xe8] sm:$0xff] %vm482_vm0, %v8224_v0  ;;  %v553_v12 = vld [vmem:[%s8386_s19 + $0x48] sm:$0xff]  ;;  %v552_v13 = vld [vmem:[%s8386_s19 + $0x40] sm:$0xff] }
  0x15   : > { %582 = vrot.lane.b32.xlu1 %v547_v3, %s8225_s20  ;;  %578 = vrot.lane.b32.xlu0 %v545_v4, %s8225_s20  ;;  %v555_v14 = vld [vmem:[%s8386_s19 + $0x58] sm:$0xff]  ;;  %v554_v15 = vld [vmem:[%s8386_s19 + $0x50] sm:$0xff]  ;;  %514 = vst.msk [vmem:[#allocation3] sm:$0xff] %vm513_vm2, %v8224_v0  ;;  %515 = vst.msk [vmem:[#allocation3 + $0x8] sm:$0xff] %vm513_vm2, %v8224_v0 }
  0x16   : > { %v557_v16 = vld [vmem:[%s8386_s19 + $0x68] sm:$0xff]  ;;  %v556_v17 = vld [vmem:[%s8386_s19 + $0x60] sm:$0xff]  ;;  %v8428_v18 = vld [vmem:[%s8386_s19 + $0x78] sm:$0xff]  ;;  %516 = vst.msk [vmem:[#allocation3 + $0x10] sm:$0xff] %vm513_vm2, %v8224_v0 }
  0x17   : > { %v8431_v19 = vld [vmem:[%s8386_s19 + $0x70] sm:$0xff]  ;;  %517 = vst.msk [vmem:[#allocation3 + $0x18] sm:$0xff] %vm513_vm2, %v8224_v0  ;;  %518 = vst.msk [vmem:[#allocation3 + $0x20] sm:$0xff] %vm513_vm2, %v8224_v0 }
  0x18   : > { %519 = vst.msk [vmem:[#allocation3 + $0x28] sm:$0xff] %vm513_vm2, %v8224_v0  ;;  %520 = vst.msk [vmem:[#allocation3 + $0x30] sm:$0xff] %vm513_vm2, %v8224_v0 }
  0x19   : > { %586 = vrot.lane.b32.xlu1 %v549_v6, %s8225_s20  ;;  %584 = vrot.lane.b32.xlu0 %v548_v7, %s8225_s20  ;;  %521 = vst.msk [vmem:[#allocation3 + $0x38] sm:$0xff] %vm513_vm2, %v8224_v0  ;;  %522 = vst.msk [vmem:[#allocation3 + $0x40] sm:$0xff] %vm513_vm2, %v8224_v0 }
  0x1a   : > { %523 = vst.msk [vmem:[#allocation3 + $0x48] sm:$0xff] %vm513_vm2, %v8224_v0  ;;  %524 = vst.msk [vmem:[#allocation3 + $0x50] sm:$0xff] %vm513_vm2, %v8224_v0 }
  0x1b   : > { %525 = vst.msk [vmem:[#allocation3 + $0x58] sm:$0xff] %vm513_vm2, %v8224_v0  ;;  %526 = vst.msk [vmem:[#allocation3 + $0x60] sm:$0xff] %vm513_vm2, %v8224_v0 }
  0x1c   : > { %527 = vst.msk [vmem:[#allocation3 + $0x68] sm:$0xff] %vm513_vm2, %v8224_v0  ;;  %528 = vst.msk [vmem:[#allocation3 + $0x70] sm:$0xff] %vm513_vm2, %v8224_v0 }
  0x1d   : > { %590 = vrot.lane.b32.xlu1 %v551_v9, %s8225_s20  ;;  %588 = vrot.lane.b32.xlu0 %v550_v10, %s8225_s20  ;;  %529 = vst.msk [vmem:[#allocation3 + $0x78] sm:$0xff] %vm513_vm2, %v8224_v0  ;;  %530 = vst.msk [vmem:[#allocation3 + $0x80] sm:$0xff] %vm513_vm2, %v8224_v0 }
  0x1e   : > { %531 = vst.msk [vmem:[#allocation3 + $0x88] sm:$0xff] %vm513_vm2, %v8224_v0  ;;  %532 = vst.msk [vmem:[#allocation3 + $0x90] sm:$0xff] %vm513_vm2, %v8224_v0 }
  0x1f   : > { %533 = vst.msk [vmem:[#allocation3 + $0x98] sm:$0xff] %vm513_vm2, %v8224_v0  ;;  %534 = vst.msk [vmem:[#allocation3 + $0xa0] sm:$0xff] %vm513_vm2, %v8224_v0 }
  0x20   : > { %535 = vst.msk [vmem:[#allocation3 + $0xa8] sm:$0xff] %vm513_vm2, %v8224_v0  ;;  %536 = vst.msk [vmem:[#allocation3 + $0xb0] sm:$0xff] %vm513_vm2, %v8224_v0 }
  0x21   : > { %594 = vrot.lane.b32.xlu1 %v553_v12, %s8225_s20  ;;  %592 = vrot.lane.b32.xlu0 %v552_v13, %s8225_s20  ;;  %537 = vst.msk [vmem:[#allocation3 + $0xb8] sm:$0xff] %vm513_vm2, %v8224_v0  ;;  %538 = vst.msk [vmem:[#allocation3 + $0xc0] sm:$0xff] %vm513_vm2, %v8224_v0 }
  0x22   : > { %539 = vst.msk [vmem:[#allocation3 + $0xc8] sm:$0xff] %vm513_vm2, %v8224_v0  ;;  %540 = vst.msk [vmem:[#allocation3 + $0xd0] sm:$0xff] %vm513_vm2, %v8224_v0 }
  0x23   : > { %541 = vst.msk [vmem:[#allocation3 + $0xd8] sm:$0xff] %vm513_vm2, %v8224_v0  ;;  %542 = vst.msk [vmem:[#allocation3 + $0xe0] sm:$0xff] %vm513_vm2, %v8224_v0 }
  0x24   : > { %543 = vst.msk [vmem:[#allocation3 + $0xe8] sm:$0xff] %vm513_vm2, %v8224_v0 }
  0x25   : > { %598 = vrot.lane.b32.xlu1 %v555_v14, %s8225_s20  ;;  %596 = vrot.lane.b32.xlu0 %v554_v15, %s8225_s20 }
  0x29   : > { %602 = vrot.lane.b32.xlu1 %v557_v16, %s8225_s20  ;;  %600 = vrot.lane.b32.xlu0 %v556_v17, %s8225_s20 }
  0x2d   : > { %606 = vrot.lane.b32.xlu1 %v8428_v18, %s8225_s20  ;;  %604 = vrot.lane.b32.xlu0 %v8431_v19, %s8225_s20 }
  0x83   : > { %v581_v20 = vpop.permute.xlu1 %580  ;;  %v577_v21 = vpop.permute.xlu0 %576 }
  0x84   : > { %v626_v24 = vmax.f32 %v546_v1, %v581_v20  ;;  %v624_v25 = vmax.f32 %v544_v2, %v577_v21 }
  0x87   : > { %v583_v22 = vpop.permute.xlu1 %582  ;;  %v579_v23 = vpop.permute.xlu0 %578 }
  0x88   : > { %v627_v26 = vmax.f32 %v547_v3, %v583_v22  ;;  %v625_v27 = vmax.f32 %v545_v4, %v579_v23  ;;  %v8500_v4 = vld [vmem:[#allocation2 + $0x7] sm:$0xff]  ;;  %v6730_v23 = vld [vmem:[%s9519_s2 + $0x14] sm:$0xf] }
  0x8a   : > { %v8437_v28 = vmax.f32 %v626_v24, %v627_v26  ;;  %v8439_v29 = vmax.f32 %v624_v25, %v625_v27  ;;  %v6740_v25 = vld [vmem:[%s9519_s2 + $0x18] sm:$0xf]  ;;  %v6750_v27 = vld [vmem:[%s9519_s2 + $0x1c] sm:$0xf] }
  0x8b   : > { %v587_v30 = vpop.permute.xlu1 %586  ;;  %v585_v31 = vpop.permute.xlu0 %584 }
  0x8c   : > { %650 = vst.msk [vmem:[#allocation2 + $0x38] sm:$0xff] %vm482_vm0, %v8437_v28  ;;  %649 = vst.msk [vmem:[#allocation2 + $0x20] sm:$0xff] %vm482_vm0, %v8439_v29  ;;  %v629_v32 = vmax.f32 %v549_v6, %v587_v30  ;;  %v628_v33 = vmax.f32 %v548_v7, %v585_v31  ;;  %v6710_v7 = vld [vmem:[%s9519_s2 + $0xc] sm:$0xf]  ;;  %v6760_v31 = vld [vmem:[%s9519_s2 + $0x20] sm:$0xf] }
  0x8e   : > { %v8445_v34 = vmax.f32 %v628_v33, %v629_v32  ;;  %v8648_v32 = vld [vmem:[#allocation2 + $0xdf] sm:$0xff] }
  0x8f   : > { %v591_v35 = vpop.permute.xlu1 %590  ;;  %v589_v36 = vpop.permute.xlu0 %588  ;;  %v8666_v33 = vld [vmem:[#allocation2 + $0xe0] sm:$0xff] }
  0x90   : > { %651 = vst.msk [vmem:[#allocation2 + $0x50] sm:$0xff] %vm482_vm0, %v8445_v34  ;;  %v631_v37 = vmax.f32 %v551_v9, %v591_v35  ;;  %v630_v38 = vmax.f32 %v550_v10, %v589_v36  ;;  %v8683_v35 = vld [vmem:[#allocation2 + $0xe1] sm:$0xff] }
  0x92   : > { %v8449_v39 = vmax.f32 %v630_v38, %v631_v37 }
  0x93   : > { %v595_v40 = vpop.permute.xlu1 %594  ;;  %v593_v41 = vpop.permute.xlu0 %592  ;;  %v8451_v42 = vld [vmem:[#allocation2 + $0x20] sm:$0xff]  ;;  %v8453_v43 = vld [vmem:[#allocation2 + $0x38] sm:$0xff] }
  0x94   : > { %652 = vst.msk [vmem:[#allocation2 + $0x68] sm:$0xff] %vm482_vm0, %v8449_v39  ;;  %v633_v45 = vmax.f32 %v553_v12, %v595_v40  ;;  %v632_v46 = vmax.f32 %v552_v13, %v593_v41  ;;  %7368 = vmatmul.mubr.msk.f32.vlgmr.msra.gmra.mrb[0].mxu0 %vm482_vm0, %v8451_v42  ;;  %v658_v6 = vld [vmem:[#allocation2 + $0x1f] sm:$0xff]  ;;  %v8512_v8 = vld [vmem:[#allocation2 + $0x37] sm:$0xff]  ;;  %v8534_v13 = vld [vmem:[#allocation2 + $0x9] sm:$0xff] }
  0x95   : > { %7370 = vmatprep.mubr.msk.f32.mxu0 %vm482_vm0, %v8453_v43  ;;  %7380 = vmatpush3.msk.msra.mxu0 %vm700_vm1, %v665_v11 }
  0x96   : > { %v8465_v47 = vmax.f32 %v632_v46, %v633_v45  ;;  %7393 = vmatprep.subr.msk.mxu0 %vm700_vm1, %v6700_v44 }
  0x97   : > { %v599_v48 = vpop.permute.xlu1 %598  ;;  %v597_v49 = vpop.permute.xlu0 %596  ;;  %v8468_v50 = vld [vmem:[#allocation2 + $0x50] sm:$0xff] }
  0x98   : > { %653 = vst.msk [vmem:[#allocation2 + $0x80] sm:$0xff] %vm482_vm0, %v8465_v47  ;;  %v635_v51 = vmax.f32 %v555_v14, %v599_v48  ;;  %v634_v52 = vmax.f32 %v554_v15, %v597_v49  ;;  %7371 = vmatmul.mubr.msk.f32.gmra.mrb[2].mxu0 %vm482_vm0, %v8468_v50  ;;  %v8518_v9 = vld [vmem:[#allocation2 + $0x4f] sm:$0xff]  ;;  %v942_v15 = vld [vmem:[#allocation2 + $0x21] sm:$0xff] }
  0x9a   : > { %v8474_v53 = vmax.f32 %v634_v52, %v635_v51 }
  0x9b   : > { %v603_v54 = vpop.permute.xlu1 %602  ;;  %v601_v55 = vpop.permute.xlu0 %600  ;;  %v8476_v56 = vld [vmem:[#allocation2 + $0x68] sm:$0xff] }
  0x9c   : > { %654 = vst.msk [vmem:[#allocation2 + $0x98] sm:$0xff] %vm482_vm0, %v8474_v53  ;;  %v637_v57 = vmax.f32 %v557_v16, %v603_v54  ;;  %v636_v58 = vmax.f32 %v556_v17, %v601_v55  ;;  %7373 = vmatprep.mubr.msk.f32.mxu0 %vm482_vm0, %v8476_v56  ;;  %v8522_v10 = vld [vmem:[#allocation2 + $0x67] sm:$0xff]  ;;  %v6720_v16 = vld [vmem:[%s9519_s2 + $0x10] sm:$0xf]  ;;  %v8546_v17 = vld [vmem:[#allocation2 + $0x39] sm:$0xff] }
  0x9e   : > { %v8482_v59 = vmax.f32 %v636_v58, %v637_v57 }
  0x9f   : > { %v8484_v60 = vld [vmem:[#allocation2 + $0x80] sm:$0xff]  ;;  %v607_v61 = vpop.permute.xlu1 %606  ;;  %v605_v62 = vpop.permute.xlu0 %604 }
  0xa0   : > { %655 = vst.msk [vmem:[#allocation2 + $0xb0] sm:$0xff] %vm482_vm0, %v8482_v59  ;;  %7374 = vmatmul.mubr.msk.f32.gmra.mrb[4].mxu0 %vm482_vm0, %v8484_v60  ;;  %v639_v63 = vmax.f32 %v8428_v18, %v607_v61  ;;  %v638_v1 = vmax.f32 %v8431_v19, %v605_v62  ;;  %v8526_v11 = vld [vmem:[#allocation2 + $0x7f] sm:$0xff]  ;;  %v8552_v18 = vld [vmem:[#allocation2 + $0x51] sm:$0xff]  ;;  %v8556_v19 = vld [vmem:[#allocation2 + $0x69] sm:$0xff] }
  0xa1   : > { %v8560_v20 = vld [vmem:[#allocation2 + $0x81] sm:$0xff] }
  0xa2   : > { %v8492_v2 = vmax.f32 %v638_v1, %v639_v63 }
  0xa3   : > { %v8494_v3 = vld [vmem:[#allocation2 + $0x98] sm:$0xff] }
  0xa4   : > { %7376 = vmatprep.mubr.msk.f32.mxu0 %vm482_vm0, %v8494_v3  ;;  %656 = vst.msk [vmem:[#allocation2 + $0xc8] sm:$0xff] %vm482_vm0, %v8492_v2  ;;  %v8530_v12 = vld [vmem:[#allocation2 + $0x97] sm:$0xff] }
  0xa5   : > { %v8564_v21 = vld [vmem:[#allocation2 + $0x99] sm:$0xff] }
  0xa7   : > { %v8502_v5 = vld [vmem:[#allocation2 + $0xb0] sm:$0xff] }
  0xa8   : > { %7377 = vmatmul.mubr.msk.f32.gmra.mrb[6].mxu0 %vm482_vm0, %v8502_v5  ;;  %v8536_v14 = vld [vmem:[#allocation2 + $0xaf] sm:$0xff] }
  0xa9   : > { %7381 = vmatprep.mubr.msk.f32.mxu0 %vm482_vm0, %v8500_v4  ;;  %v8568_v22 = vld [vmem:[#allocation2 + $0xb1] sm:$0xff] }
  0xab   : > { %v1098_v24 = vld [vmem:[#allocation2 + $0xc7] sm:$0xff] }
  0xac   : > { %7382 = vmatmul.mubr.msk.f32.vlgmr.msra.gmra.mrb[0].mxu0 %vm482_vm0, %v658_v6  ;;  %v1248_v26 = vld [vmem:[#allocation2 + $0xc8] sm:$0xff] }
  0xad   : > { %7394 = vmatpush3.msk.msra.mxu0 %vm700_vm1, %v6700_v44  ;;  %7384 = vmatprep.mubr.msk.f32.mxu0 %vm482_vm0, %v8512_v8  ;;  %v1398_v30 = vld [vmem:[#allocation2 + $0xc9] sm:$0xff] }
  0xae   : > { %7407 = vmatprep.subr.msk.mxu0 %vm700_vm1, %v6710_v7 }
  0xb0   : > { %7385 = vmatmul.mubr.msk.f32.gmra.mrb[2].mxu0 %vm482_vm0, %v8518_v9 }
  0xb1   : > { %7387 = vmatprep.mubr.msk.f32.mxu0 %vm482_vm0, %v8522_v10 }
  0xb4   : > { %7388 = vmatmul.mubr.msk.f32.gmra.mrb[4].mxu0 %vm482_vm0, %v8526_v11 }
  0xb5   : > { %7390 = vmatprep.mubr.msk.f32.mxu0 %vm482_vm0, %v8530_v12 }
  0xb8   : > { %7391 = vmatmul.mubr.msk.f32.gmra.mrb[6].mxu0 %vm482_vm0, %v8536_v14 }
  0xb9   : > { %7395 = vmatprep.mubr.msk.f32.mxu0 %vm482_vm0, %v8534_v13 }
  0xbc   : > { %7396 = vmatmul.mubr.msk.f32.vlgmr.msra.gmra.mrb[0].mxu0 %vm482_vm0, %v942_v15 }
  0xbd   : > { %7408 = vmatpush3.msk.msra.mxu0 %vm700_vm1, %v6710_v7  ;;  %7398 = vmatprep.mubr.msk.f32.mxu0 %vm482_vm0, %v8546_v17 }
  0xbe   : > { %7421 = vmatprep.subr.msk.mxu0 %vm700_vm1, %v6720_v16 }
  0xc0   : > { %7399 = vmatmul.mubr.msk.f32.gmra.mrb[2].mxu0 %vm482_vm0, %v8552_v18 }
  0xc1   : > { %7401 = vmatprep.mubr.msk.f32.mxu0 %vm482_vm0, %v8556_v19 }
  0xc4   : > { %7402 = vmatmul.mubr.msk.f32.gmra.mrb[4].mxu0 %vm482_vm0, %v8560_v20 }
  0xc5   : > { %7404 = vmatprep.mubr.msk.f32.mxu0 %vm482_vm0, %v8564_v21 }
  0xc8   : > { %7405 = vmatmul.mubr.msk.f32.gmra.mrb[6].mxu0 %vm482_vm0, %v8568_v22 }
  0xc9   : > { %7409 = vmatprep.mubr.msk.f32.mxu0 %vm482_vm0, %v658_v6 }
  0xcc   : > { %7410 = vmatmul.mubr.msk.f32.vlgmr.msra.gmra.mrb[0].mxu0 %vm482_vm0, %v8512_v8 }
  0xcd   : > { %7422 = vmatpush3.msk.msra.mxu0 %vm700_vm1, %v6720_v16  ;;  %7412 = vmatprep.mubr.msk.f32.mxu0 %vm482_vm0, %v8518_v9 }
  0xce   : > { %7435 = vmatprep.subr.msk.mxu0 %vm700_vm1, %v6730_v23 }
  0xd0   : > { %7413 = vmatmul.mubr.msk.f32.gmra.mrb[2].mxu0 %vm482_vm0, %v8522_v10 }
  0xd1   : > { %7415 = vmatprep.mubr.msk.f32.mxu0 %vm482_vm0, %v8526_v11 }
  0xd4   : > { %7416 = vmatmul.mubr.msk.f32.gmra.mrb[4].mxu0 %vm482_vm0, %v8530_v12 }
  0xd5   : > { %7418 = vmatprep.mubr.msk.f32.mxu0 %vm482_vm0, %v8536_v14 }
  0xd8   : > { %7419 = vmatmul.mubr.msk.f32.gmra.mrb[6].mxu0 %vm482_vm0, %v1098_v24 }
  0xd9   : > { %7423 = vmatprep.mubr.msk.f32.mxu0 %vm482_vm0, %v8451_v42 }
  0xdc   : > { %7424 = vmatmul.mubr.msk.f32.vlgmr.msra.gmra.mrb[0].mxu0 %vm482_vm0, %v8453_v43 }
  0xdd   : > { %7436 = vmatpush3.msk.msra.mxu0 %vm700_vm1, %v6730_v23  ;;  %7426 = vmatprep.mubr.msk.f32.mxu0 %vm482_vm0, %v8468_v50 }
  0xde   : > { %7449 = vmatprep.subr.msk.mxu0 %vm700_vm1, %v6740_v25 }
  0xe0   : > { %7427 = vmatmul.mubr.msk.f32.gmra.mrb[2].mxu0 %vm482_vm0, %v8476_v56 }
  0xe1   : > { %7429 = vmatprep.mubr.msk.f32.mxu0 %vm482_vm0, %v8484_v60 }
  0xe4   : > { %7430 = vmatmul.mubr.msk.f32.gmra.mrb[4].mxu0 %vm482_vm0, %v8494_v3 }
  0xe5   : > { %7432 = vmatprep.mubr.msk.f32.mxu0 %vm482_vm0, %v8502_v5 }
  0xe8   : > { %7433 = vmatmul.mubr.msk.f32.gmra.mrb[6].mxu0 %vm482_vm0, %v1248_v26 }
  0xe9   : > { %7437 = vmatprep.mubr.msk.f32.mxu0 %vm482_vm0, %v942_v15 }
  0xec   : > { %7438 = vmatmul.mubr.msk.f32.vlgmr.msra.gmra.mrb[0].mxu0 %vm482_vm0, %v8546_v17 }
  0xed   : > { %7450 = vmatpush3.msk.msra.mxu0 %vm700_vm1, %v6740_v25  ;;  %7440 = vmatprep.mubr.msk.f32.mxu0 %vm482_vm0, %v8552_v18 }
  0xee   : > { %7463 = vmatprep.subr.msk.mxu0 %vm700_vm1, %v6750_v27 }
  0xf0   : > { %7441 = vmatmul.mubr.msk.f32.gmra.mrb[2].mxu0 %vm482_vm0, %v8556_v19 }
  0xf1   : > { %7443 = vmatprep.mubr.msk.f32.mxu0 %vm482_vm0, %v8560_v20 }
  0xf4   : > { %7444 = vmatmul.mubr.msk.f32.gmra.mrb[4].mxu0 %vm482_vm0, %v8564_v21 }
  0xf5   : > { %7446 = vmatprep.mubr.msk.f32.mxu0 %vm482_vm0, %v8568_v22 }
  0xf8   : > { %7447 = vmatmul.mubr.msk.f32.gmra.mrb[6].mxu0 %vm482_vm0, %v1398_v30 }
  0xf9   : > { %7451 = vmatprep.mubr.msk.f32.mxu0 %vm482_vm0, %v8512_v8 }
  0xfc   : > { %7452 = vmatmul.mubr.msk.f32.vlgmr.msra.gmra.mrb[0].mxu0 %vm482_vm0, %v8518_v9 }
  0xfd   : > { %7464 = vmatpush3.msk.msra.mxu0 %vm700_vm1, %v6750_v27  ;;  %7454 = vmatprep.mubr.msk.f32.mxu0 %vm482_vm0, %v8522_v10 }
  0xfe   : > { %7477 = vmatprep.subr.msk.mxu0 %vm700_vm1, %v6760_v31 }
 0x100   : > { %7455 = vmatmul.mubr.msk.f32.gmra.mrb[2].mxu0 %vm482_vm0, %v8526_v11 }
 0x101   : > { %7457 = vmatprep.mubr.msk.f32.mxu0 %vm482_vm0, %v8530_v12 }
 0x104   : > { %7458 = vmatmul.mubr.msk.f32.gmra.mrb[4].mxu0 %vm482_vm0, %v8536_v14 }
 0x105   : > { %7460 = vmatprep.mubr.msk.f32.mxu0 %vm482_vm0, %v1098_v24 }
 0x108   : > { %7461 = vmatmul.mubr.msk.f32.gmra.mrb[6].mxu0 %vm482_vm0, %v8648_v32 }
 0x109   : > { %7465 = vmatprep.mubr.msk.f32.mxu0 %vm482_vm0, %v8453_v43 }
 0x10c   : > { %7466 = vmatmul.mubr.msk.f32.vlgmr.msra.gmra.mrb[0].mxu0 %vm482_vm0, %v8468_v50 }
 0x10d   : > { %7478 = vmatpush3.msk.msra.mxu0 %vm700_vm1, %v6760_v31  ;;  %7468 = vmatprep.mubr.msk.f32.mxu0 %vm482_vm0, %v8476_v56 }
 0x110   : > { %7469 = vmatmul.mubr.msk.f32.gmra.mrb[2].mxu0 %vm482_vm0, %v8484_v60 }
 0x111   : > { %7471 = vmatprep.mubr.msk.f32.mxu0 %vm482_vm0, %v8494_v3 }
 0x114   : > { %7472 = vmatmul.mubr.msk.f32.gmra.mrb[4].mxu0 %vm482_vm0, %v8502_v5 }
 0x115   : > { %7474 = vmatprep.mubr.msk.f32.mxu0 %vm482_vm0, %v1248_v26 }
 0x118   : > { %7475 = vmatmul.mubr.msk.f32.gmra.mrb[6].mxu0 %vm482_vm0, %v8666_v33 }
 0x119   : > { %7479 = vmatprep.mubr.msk.f32.mxu0 %vm482_vm0, %v8546_v17 }
 0x11c   : > { %7480 = vmatmul.mubr.msk.f32.vlgmr.msra.gmra.mrb[0].mxu0 %vm482_vm0, %v8552_v18 }
 0x11d   : > { %7482 = vmatprep.mubr.msk.f32.mxu0 %vm482_vm0, %v8556_v19 }
 0x120   : > { %7483 = vmatmul.mubr.msk.f32.gmra.mrb[2].mxu0 %vm482_vm0, %v8560_v20 }
 0x121   : > { %7485 = vmatprep.mubr.msk.f32.mxu0 %vm482_vm0, %v8564_v21 }
 0x124   : > { %7486 = vmatmul.mubr.msk.f32.gmra.mrb[4].mxu0 %vm482_vm0, %v8568_v22 }
 0x125   : > { %7488 = vmatprep.mubr.msk.f32.mxu0 %vm482_vm0, %v1398_v30 }
 0x128   : > { %7489 = vmatmul.mubr.msk.f32.gmra.mrb[6].mxu0 %vm482_vm0, %v8683_v35 }
 0x1ef   : > { %v7481_v36 = vpop.f32.mrb[0].mxu0 }
 0x1f0   : > { %v1993_v37 = vsel %vm482_vm0, %v7481_v36, 0.0  ;;  %v1945_v38 = vpop.f32.mrb[1].mxu0 }
 0x1f1   : > { %v1992_v40 = vsel %vm482_vm0, %v1945_v38, 0.0 }
 0x1f2   : > { %v1994_v41 = vadd.f32 %v1993_v37, %v1992_v40 }
 0x1f3   : > { %v7484_v42 = vpop.f32.mrb[2].mxu0 }
 0x1f4   : > { %v1955_v43 = vpop.f32.mrb[3].mxu0  ;;  %v1997_v46 = vsel %vm482_vm0, %v7484_v42, 0.0 }
 0x1f5   : > { %v1995_v44 = vsel %vm482_vm0, %v1955_v43, 0.0 }
 0x1f6   : > { %v1996_v45 = vadd.f32 %v1995_v44, %v1994_v41 }
 0x1f7   : > { %v7487_v48 = vpop.f32.mrb[4].mxu0 }
 0x1f8   : > { %v1965_v49 = vpop.f32.mrb[5].mxu0  ;;  %v1998_v50 = vadd.f32 %v1997_v46, %v1996_v45  ;;  %v2001_v54 = vsel %vm482_vm0, %v7487_v48, 0.0 }
 0x1f9   : > { %v1999_v51 = vsel %vm482_vm0, %v1965_v49, 0.0 }
 0x1fa   : > { %v2000_v52 = vadd.f32 %v1999_v51, %v1998_v50 }
 0x1fb   : > { %v7490_v55 = vpop.f32.mrb[6].mxu0 }
 0x1fc   : > { %v1975_v56 = vpop.f32.mrb[7].mxu0  ;;  %v2002_v57 = vadd.f32 %v2001_v54, %v2000_v52  ;;  %v2005_v61 = vsel %vm482_vm0, %v7490_v55, 0.0 }
 0x1fd   : > { %v2003_v58 = vsel %vm482_vm0, %v1975_v56, 0.0 }
 0x1fe   : > { %v2004_v60 = vadd.f32 %v2003_v58, %v2002_v57  ;;  %v6772_v58 = vld [vmem:[%s9522_s5 + $0x4] sm:$0xf] }
 0x1ff   : > { %7491 = vmatprep.subr.msk.mxu1 %vm700_vm1, %v6772_v58 }
 0x200   : > { %v2006_v62 = vadd.f32 %v2005_v61, %v2004_v60  ;;  %v8709_v60 = vld [vmem:[%s9522_s5] sm:$0xf]  ;;  %7492 = vmatpush3.msk.msra.mxu1 %vm700_vm1, %v6772_v58 }
 0x201   : > { %7505 = vmatprep.subr.msk.mxu1 %vm700_vm1, %v8709_v60 }
 0x202   : > { %2007 = vadd.xlane.f32.xlu0 %v2006_v62 }
 0x28f   : > { %v2008_v63 = vpop.xlane.xlu0 %2007 }
 0x290   : > { %v2009_v1 = vrot.slane %v2008_v63, 4 }
 0x292   : > { %v2010_v3 = vadd.f32 %v2009_v1, %v2008_v63  ;;  %v6770_v1 = vld [vmem:[%s9520_s3] ss:$0 sm:$0xff] }
 0x294   : > { %v2011_v5 = vrot.slane %v2010_v3, 2 }
 0x296   : > { %v2012_v6 = vadd.f32 %v2011_v5, %v2010_v3 }
 0x298   : > { %v2013_v7 = vrot.slane %v2012_v6, 1 }
 0x29a   : > { %v2014_v8 = vadd.f32 %v2013_v7, %v2012_v6 }
 0x29c   : > { %8125 = vpush %v2014_v8 }
 0x2cd   : > { %s8126_s25 = spop %8125 }
 0x2ce   : > { %s2018_s26 = smul.f32 0.00390625, %s8126_s25 }
 0x2d0   : > { %v2019_v9 = vstv %s2018_s26 }
 0x2d1   : > { %v2020_v10 = vsub.f32 %v1945_v38, %v2019_v9  ;;  %v2021_v11 = vsub.f32 %v7481_v36, %v2019_v9  ;;  %v2022_v12 = vsub.f32 %v1955_v43, %v2019_v9  ;;  %v2023_v14 = vsub.f32 %v7484_v42, %v2019_v9 }
 0x2d2   : > { %v2024_v15 = vsub.f32 %v1965_v49, %v2019_v9  ;;  %v2025_v19 = vsub.f32 %v7487_v48, %v2019_v9  ;;  %v2026_v24 = vsub.f32 %v1975_v56, %v2019_v9  ;;  %v2027_v30 = vsub.f32 %v7490_v55, %v2019_v9 }
 0x2d3   : > { %v2028_v16 = vmul.f32 %v2020_v10, %v2020_v10  ;;  %v2029_v17 = vmul.f32 %v2021_v11, %v2021_v11  ;;  %v2030_v18 = vmul.f32 %v2022_v12, %v2022_v12  ;;  %v2031_v20 = vmul.f32 %v2023_v14, %v2023_v14 }
 0x2d4   : > { %v2032_v25 = vmul.f32 %v2024_v15, %v2024_v15  ;;  %v2033_v31 = vmul.f32 %v2025_v19, %v2025_v19  ;;  %v2034_v38 = vmul.f32 %v2026_v24, %v2026_v24  ;;  %v2035_v42 = vmul.f32 %v2027_v30, %v2027_v30 }
 0x2d5   : > { %v2036_v21 = vsel %vm482_vm0, %v2028_v16, 0.0  ;;  %v2037_v22 = vsel %vm482_vm0, %v2029_v17, 0.0  ;;  %v2039_v26 = vsel %vm482_vm0, %v2030_v18, 0.0  ;;  %v2041_v36 = vsel %vm482_vm0, %v2031_v20, 0.0  ;;  %v6771_v18 = vld [vmem:[%s9521_s4] ss:$0 sm:$0xff] }
 0x2d6   : > { %v2038_v23 = vadd.f32 %v2037_v22, %v2036_v21  ;;  %v2043_v40 = vsel %vm482_vm0, %v2032_v25, 0.0  ;;  %v2045_v43 = vsel %vm482_vm0, %v2033_v31, 0.0  ;;  %v2047_v45 = vsel %vm482_vm0, %v2034_v38, 0.0 }
 0x2d7   : > { %v2049_v48 = vsel %vm482_vm0, %v2035_v42, 0.0 }
 0x2d8   : > { %v2040_v27 = vadd.f32 %v2039_v26, %v2038_v23 }
 0x2da   : > { %v2042_v37 = vadd.f32 %v2041_v36, %v2040_v27 }
 0x2dc   : > { %v2044_v41 = vadd.f32 %v2043_v40, %v2042_v37 }
 0x2de   : > { %v2046_v44 = vadd.f32 %v2045_v43, %v2044_v41 }
 0x2e0   : > { %v2048_v46 = vadd.f32 %v2047_v45, %v2046_v44 }
 0x2e2   : > { %v2050_v49 = vadd.f32 %v2049_v48, %v2048_v46 }
 0x2e4   : > { %2051 = vadd.xlane.f32.xlu1 %v2050_v49 }
 0x371   : > { %v2052_v50 = vpop.xlane.xlu1 %2051 }
 0x372   : > { %v2053_v51 = vrot.slane %v2052_v50, 4 }
 0x374   : > { %v2054_v52 = vadd.f32 %v2053_v51, %v2052_v50 }
 0x376   : > { %v2055_v54 = vrot.slane %v2054_v52, 2 }
 0x378   : > { %v2056_v55 = vadd.f32 %v2055_v54, %v2054_v52 }
 0x37a   : > { %v2057_v56 = vrot.slane %v2056_v55, 1 }
 0x37c   : > { %v2058_v57 = vadd.f32 %v2057_v56, %v2056_v55 }
 0x37e   : > { %8127 = vpush %v2058_v57 }
 0x3af   : > { %s8128_s17 = spop %8127 }
 0x3b0   : > { %s2062_s18 = smul.f32 0.00390625, %s8128_s17 }
 0x3b2   : > { %s2063_s19 = sadd.f32 1e-05, %s2062_s18 }
 0x3b4   : > { %v2064_v61 = vstv %s2063_s19 }
 0x3b5   : > { %8160 = vrsqrt.f32 %v2064_v61 }
 0x3bf   : > { %v8161_v62 = vpop.eup %8160 }
 0x3c0   : > { %8129 = vpush %v8161_v62 }
 0x3f1   : > { %s8130_s20 = spop %8129 }
 0x3f2   : > { %v2067_v63 = vstv %s8130_s20 }
 0x3f3   : > { %v2068_v3 = vmul.f32 %v2067_v63, %v2020_v10  ;;  %v2069_v5 = vmul.f32 %v2067_v63, %v2021_v11  ;;  %v2070_v6 = vmul.f32 %v2067_v63, %v2022_v12  ;;  %v2071_v7 = vmul.f32 %v2067_v63, %v2023_v14 }
 0x3f4   : > { %v2072_v8 = vmul.f32 %v2067_v63, %v2024_v15  ;;  %v2073_v9 = vmul.f32 %v2067_v63, %v2025_v19  ;;  %v2074_v16 = vmul.f32 %v2067_v63, %v2026_v24  ;;  %v2075_v17 = vmul.f32 %v2067_v63, %v2027_v30 }
 0x3f5   : > { %v2083_v20 = vmul.f32 %v6770_v1, %v2068_v3  ;;  %v2084_v21 = vmul.f32 %v6770_v1, %v2069_v5  ;;  %v2085_v22 = vmul.f32 %v6770_v1, %v2070_v6  ;;  %v2086_v23 = vmul.f32 %v6770_v1, %v2071_v7 }
 0x3f6   : > { %v2087_v25 = vmul.f32 %v6770_v1, %v2072_v8  ;;  %v2088_v26 = vmul.f32 %v6770_v1, %v2073_v9  ;;  %v2089_v27 = vmul.f32 %v6770_v1, %v2074_v16  ;;  %v2090_v12 = vmul.f32 %v6770_v1, %v2075_v17 }
 0x3f7   : > { %v2098_v31 = vadd.f32 %v6771_v18, %v2083_v20  ;;  %v2099_v10 = vadd.f32 %v6771_v18, %v2084_v21  ;;  %v2100_v11 = vadd.f32 %v6771_v18, %v2085_v22  ;;  %v2101_v14 = vadd.f32 %v6771_v18, %v2086_v23 }
 0x3f8   : > { %v2102_v15 = vadd.f32 %v6771_v18, %v2087_v25  ;;  %v2103_v19 = vadd.f32 %v6771_v18, %v2088_v26  ;;  %v2104_v24 = vadd.f32 %v6771_v18, %v2089_v27  ;;  %v2105_v38 = vadd.f32 %v6771_v18, %v2090_v12 }
 0x3f9   : > { %v2114_v30 = vmul.f32 0.70710677, %v2098_v31  ;;  %v2115_v36 = vmul.f32 0.70710677, %v2099_v10  ;;  %v2116_v37 = vmul.f32 0.70710677, %v2100_v11 }
 0x3fa   : > { %v2117_v40 = vmul.f32 0.70710677, %v2101_v14  ;;  %v2118_v41 = vmul.f32 0.70710677, %v2102_v15  ;;  %v2119_v42 = vmul.f32 0.70710677, %v2103_v19 }
 0x3fb   : > { %8162 = verf.f32 %v2114_v30  ;;  %v2120_v43 = vmul.f32 0.70710677, %v2104_v24  ;;  %v2121_v44 = vmul.f32 0.70710677, %v2105_v38  ;;  %v2106_v48 = vmul.f32 0.5, %v2098_v31 }
 0x3fc   : > { %8164 = verf.f32 %v2115_v36  ;;  %v2107_v51 = vmul.f32 0.5, %v2099_v10  ;;  %v2108_v55 = vmul.f32 0.5, %v2100_v11  ;;  %v2109_v61 = vmul.f32 0.5, %v2101_v14  ;;  %v6791_v10 = vld [vmem:[%s9522_s5 + $0x8] sm:$0xf] }
 0x3fd   : > { %8166 = verf.f32 %v2116_v37  ;;  %v2110_v3 = vmul.f32 0.5, %v2102_v15  ;;  %v2111_v8 = vmul.f32 0.5, %v2103_v19  ;;  %v2112_v18 = vmul.f32 0.5, %v2104_v24  ;;  %v6801_v30 = vld [vmem:[%s9522_s5 + $0xc] sm:$0xf] }
 0x3fe   : > { %8168 = verf.f32 %v2117_v40  ;;  %v2113_v22 = vmul.f32 0.5, %v2105_v38 }
 0x3ff   : > { %8170 = verf.f32 %v2118_v41 }
 0x400   : > { %8172 = verf.f32 %v2119_v42 }
 0x401   : > { %8174 = verf.f32 %v2120_v43  ;;  %v6811_v43 = vld [vmem:[%s9522_s5 + $0x10] sm:$0xf] }
 0x402   : > { %8176 = verf.f32 %v2121_v44 }
 0x405   : > { %v8163_v45 = vpop.eup %8162 }
 0x406   : > { %v8165_v46 = vpop.eup %8164  ;;  %v2130_v49 = vadd.f32 1.0, %v8163_v45 }
 0x407   : > { %v8167_v50 = vpop.eup %8166  ;;  %v2131_v52 = vadd.f32 1.0, %v8165_v46 }
 0x408   : > { %v8169_v54 = vpop.eup %8168  ;;  %v2132_v56 = vadd.f32 1.0, %v8167_v50  ;;  %v2138_v57 = vmul.f32 %v2130_v49, %v2106_v48  ;;  %v6821_v50 = vld [vmem:[%s9522_s5 + $0x14] sm:$0xf] }
 0x409   : > { %v8171_v58 = vpop.eup %8170  ;;  %v2133_v62 = vadd.f32 1.0, %v8169_v54  ;;  %v2139_v63 = vmul.f32 %v2131_v52, %v2107_v51  ;;  %v6831_v52 = vld [vmem:[%s9522_s5 + $0x18] sm:$0xf] }
 0x40a   : > { %v8173_v1 = vpop.eup %8172  ;;  %v2134_v5 = vadd.f32 1.0, %v8171_v58  ;;  %v2140_v6 = vmul.f32 %v2132_v56, %v2108_v55  ;;  %2146 = vst.msk [vmem:[#allocation2 + $0x20] sm:$0xff] %vm482_vm0, %v2138_v57  ;;  %v6841_v55 = vld [vmem:[%s9522_s5 + $0x1c] sm:$0xf]  ;;  %v6851_v57 = vld [vmem:[%s9522_s5 + $0x20] sm:$0xf] }
 0x40b   : > { %v8175_v7 = vpop.eup %8174  ;;  %v2135_v9 = vadd.f32 1.0, %v8173_v1  ;;  %v2141_v16 = vmul.f32 %v2133_v62, %v2109_v61  ;;  %2147 = vst.msk [vmem:[#allocation2 + $0x38] sm:$0xff] %vm482_vm0, %v2139_v63 }
 0x40c   : > { %v8177_v17 = vpop.eup %8176  ;;  %v2136_v20 = vadd.f32 1.0, %v8175_v7  ;;  %v2142_v21 = vmul.f32 %v2134_v5, %v2110_v3  ;;  %2148 = vst.msk [vmem:[#allocation2 + $0x50] sm:$0xff] %vm482_vm0, %v2140_v6 }
 0x40d   : > { %v2137_v23 = vadd.f32 1.0, %v8177_v17  ;;  %v2143_v25 = vmul.f32 %v2135_v9, %v2111_v8  ;;  %2149 = vst.msk [vmem:[#allocation2 + $0x68] sm:$0xff] %vm482_vm0, %v2141_v16 }
 0x40e   : > { %v2144_v26 = vmul.f32 %v2136_v20, %v2112_v18  ;;  %2150 = vst.msk [vmem:[#allocation2 + $0x80] sm:$0xff] %vm482_vm0, %v2142_v21 }
 0x40f   : > { %v2145_v27 = vmul.f32 %v2137_v23, %v2113_v22  ;;  %2151 = vst.msk [vmem:[#allocation2 + $0x98] sm:$0xff] %vm482_vm0, %v2143_v25 }
 0x410   : > { %2152 = vst.msk [vmem:[#allocation2 + $0xb0] sm:$0xff] %vm482_vm0, %v2144_v26 }
 0x411   : > { %2153 = vst.msk [vmem:[#allocation2 + $0xc8] sm:$0xff] %vm482_vm0, %v2145_v27  ;;  %v8729_v31 = vld [vmem:[#allocation2 + $0x20] sm:$0xff] }
 0x412   : > { %7494 = vmatmul.mubr.msk.f32.vlgmr.msra.gmra.mrb[0].mxu1 %vm482_vm0, %v8729_v31  ;;  %v8736_v11 = vld [vmem:[#allocation2 + $0x38] sm:$0xff]  ;;  %v2438_v42 = vld [vmem:[#allocation2 + $0x21] sm:$0xff] }
 0x413   : > { %7506 = vmatpush3.msk.msra.mxu1 %vm700_vm1, %v8709_v60  ;;  %7496 = vmatprep.mubr.msk.f32.mxu1 %vm482_vm0, %v8736_v11  ;;  %v8743_v12 = vld [vmem:[#allocation2 + $0x50] sm:$0xff]  ;;  %v2155_v24 = vld [vmem:[#allocation2 + $0x1f] sm:$0xff] }
 0x414   : > { %7519 = vmatprep.subr.msk.mxu1 %vm700_vm1, %v6791_v10  ;;  %v8747_v14 = vld [vmem:[#allocation2 + $0x68] sm:$0xff]  ;;  %v8769_v36 = vld [vmem:[#allocation2 + $0x37] sm:$0xff] }
 0x415   : > { %v8751_v15 = vld [vmem:[#allocation2 + $0x80] sm:$0xff]  ;;  %v8775_v37 = vld [vmem:[#allocation2 + $0x4f] sm:$0xff] }
 0x416   : > { %7497 = vmatmul.mubr.msk.f32.gmra.mrb[2].mxu1 %vm482_vm0, %v8743_v12  ;;  %v8755_v60 = vld [vmem:[#allocation2 + $0x98] sm:$0xff]  ;;  %v8815_v46 = vld [vmem:[#allocation2 + $0x81] sm:$0xff] }
 0x417   : > { %7499 = vmatprep.mubr.msk.f32.mxu1 %vm482_vm0, %v8747_v14  ;;  %v8759_v19 = vld [vmem:[#allocation2 + $0xb0] sm:$0xff]  ;;  %v8783_v38 = vld [vmem:[#allocation2 + $0x7f] sm:$0xff] }
 0x418   : > { %v8787_v40 = vld [vmem:[#allocation2 + $0x97] sm:$0xff]  ;;  %v8791_v41 = vld [vmem:[#allocation2 + $0xaf] sm:$0xff]  ;;  %v2594_v51 = vld [vmem:[#allocation2 + $0xc7] sm:$0xff] }
 0x419   : > { %v8801_v44 = vld [vmem:[#allocation2 + $0x39] sm:$0xff]  ;;  %v8807_v45 = vld [vmem:[#allocation2 + $0x51] sm:$0xff]  ;;  %v2744_v54 = vld [vmem:[#allocation2 + $0xc8] sm:$0xff] }
 0x41a   : > { %7500 = vmatmul.mubr.msk.f32.gmra.mrb[4].mxu1 %vm482_vm0, %v8751_v15  ;;  %v8819_v48 = vld [vmem:[#allocation2 + $0x99] sm:$0xff]  ;;  %v8823_v49 = vld [vmem:[#allocation2 + $0xb1] sm:$0xff]  ;;  %v2894_v56 = vld [vmem:[#allocation2 + $0xc9] sm:$0xff] }
 0x41b   : > { %7502 = vmatprep.mubr.msk.f32.mxu1 %vm482_vm0, %v8755_v60 }
 0x41e   : > { %7503 = vmatmul.mubr.msk.f32.gmra.mrb[6].mxu1 %vm482_vm0, %v8759_v19 }
 0x41f   : > { %7507 = vmatprep.mubr.msk.f32.mxu1 %vm482_vm0, %v8500_v4  ;;  %v8779_v4 = vld [vmem:[#allocation2 + $0x67] sm:$0xff] }
 0x422   : > { %7508 = vmatmul.mubr.msk.f32.vlgmr.msra.gmra.mrb[0].mxu1 %vm482_vm0, %v2155_v24 }
 0x423   : > { %7520 = vmatpush3.msk.msra.mxu1 %vm700_vm1, %v6791_v10  ;;  %7510 = vmatprep.mubr.msk.f32.mxu1 %vm482_vm0, %v8769_v36 }
 0x424   : > { %7533 = vmatprep.subr.msk.mxu1 %vm700_vm1, %v6801_v30 }
 0x426   : > { %7511 = vmatmul.mubr.msk.f32.gmra.mrb[2].mxu1 %vm482_vm0, %v8775_v37 }
 0x427   : > { %7513 = vmatprep.mubr.msk.f32.mxu1 %vm482_vm0, %v8779_v4 }
 0x42a   : > { %7514 = vmatmul.mubr.msk.f32.gmra.mrb[4].mxu1 %vm482_vm0, %v8783_v38 }
 0x42b   : > { %7516 = vmatprep.mubr.msk.f32.mxu1 %vm482_vm0, %v8787_v40 }
 0x42e   : > { %7517 = vmatmul.mubr.msk.f32.gmra.mrb[6].mxu1 %vm482_vm0, %v8791_v41 }
 0x42f   : > { %7521 = vmatprep.mubr.msk.f32.mxu1 %vm482_vm0, %v8534_v13  ;;  %v8811_v13 = vld [vmem:[#allocation2 + $0x69] sm:$0xff] }
 0x432   : > { %7522 = vmatmul.mubr.msk.f32.vlgmr.msra.gmra.mrb[0].mxu1 %vm482_vm0, %v2438_v42 }
 0x433   : > { %7534 = vmatpush3.msk.msra.mxu1 %vm700_vm1, %v6801_v30  ;;  %7524 = vmatprep.mubr.msk.f32.mxu1 %vm482_vm0, %v8801_v44 }
 0x434   : > { %7547 = vmatprep.subr.msk.mxu1 %vm700_vm1, %v6811_v43 }
 0x436   : > { %7525 = vmatmul.mubr.msk.f32.gmra.mrb[2].mxu1 %vm482_vm0, %v8807_v45 }
 0x437   : > { %7527 = vmatprep.mubr.msk.f32.mxu1 %vm482_vm0, %v8811_v13 }
 0x43a   : > { %7528 = vmatmul.mubr.msk.f32.gmra.mrb[4].mxu1 %vm482_vm0, %v8815_v46 }
 0x43b   : > { %7530 = vmatprep.mubr.msk.f32.mxu1 %vm482_vm0, %v8819_v48 }
 0x43e   : > { %7531 = vmatmul.mubr.msk.f32.gmra.mrb[6].mxu1 %vm482_vm0, %v8823_v49 }
 0x43f   : > { %7535 = vmatprep.mubr.msk.f32.mxu1 %vm482_vm0, %v2155_v24 }
 0x442   : > { %7536 = vmatmul.mubr.msk.f32.vlgmr.msra.gmra.mrb[0].mxu1 %vm482_vm0, %v8769_v36 }
 0x443   : > { %7548 = vmatpush3.msk.msra.mxu1 %vm700_vm1, %v6811_v43  ;;  %7538 = vmatprep.mubr.msk.f32.mxu1 %vm482_vm0, %v8775_v37 }
 0x444   : > { %7561 = vmatprep.subr.msk.mxu1 %vm700_vm1, %v6821_v50 }
 0x446   : > { %7539 = vmatmul.mubr.msk.f32.gmra.mrb[2].mxu1 %vm482_vm0, %v8779_v4 }
 0x447   : > { %7541 = vmatprep.mubr.msk.f32.mxu1 %vm482_vm0, %v8783_v38 }
 0x44a   : > { %7542 = vmatmul.mubr.msk.f32.gmra.mrb[4].mxu1 %vm482_vm0, %v8787_v40 }
 0x44b   : > { %7544 = vmatprep.mubr.msk.f32.mxu1 %vm482_vm0, %v8791_v41 }
 0x44e   : > { %7545 = vmatmul.mubr.msk.f32.gmra.mrb[6].mxu1 %vm482_vm0, %v2594_v51 }
 0x44f   : > { %7549 = vmatprep.mubr.msk.f32.mxu1 %vm482_vm0, %v8729_v31 }
 0x452   : > { %7550 = vmatmul.mubr.msk.f32.vlgmr.msra.gmra.mrb[0].mxu1 %vm482_vm0, %v8736_v11 }
 0x453   : > { %7562 = vmatpush3.msk.msra.mxu1 %vm700_vm1, %v6821_v50  ;;  %7552 = vmatprep.mubr.msk.f32.mxu1 %vm482_vm0, %v8743_v12 }
 0x454   : > { %7575 = vmatprep.subr.msk.mxu1 %vm700_vm1, %v6831_v52 }
 0x456   : > { %7553 = vmatmul.mubr.msk.f32.gmra.mrb[2].mxu1 %vm482_vm0, %v8747_v14 }
 0x457   : > { %7555 = vmatprep.mubr.msk.f32.mxu1 %vm482_vm0, %v8751_v15 }
 0x45a   : > { %7556 = vmatmul.mubr.msk.f32.gmra.mrb[4].mxu1 %vm482_vm0, %v8755_v60 }
 0x45b   : > { %7558 = vmatprep.mubr.msk.f32.mxu1 %vm482_vm0, %v8759_v19 }
 0x45e   : > { %7559 = vmatmul.mubr.msk.f32.gmra.mrb[6].mxu1 %vm482_vm0, %v2744_v54 }
 0x45f   : > { %7563 = vmatprep.mubr.msk.f32.mxu1 %vm482_vm0, %v2438_v42 }
 0x462   : > { %7564 = vmatmul.mubr.msk.f32.vlgmr.msra.gmra.mrb[0].mxu1 %vm482_vm0, %v8801_v44 }
 0x463   : > { %7576 = vmatpush3.msk.msra.mxu1 %vm700_vm1, %v6831_v52  ;;  %7566 = vmatprep.mubr.msk.f32.mxu1 %vm482_vm0, %v8807_v45 }
 0x464   : > { %7589 = vmatprep.subr.msk.mxu1 %vm700_vm1, %v6841_v55 }
 0x466   : > { %7567 = vmatmul.mubr.msk.f32.gmra.mrb[2].mxu1 %vm482_vm0, %v8811_v13 }
 0x467   : > { %7569 = vmatprep.mubr.msk.f32.mxu1 %vm482_vm0, %v8815_v46 }
 0x46a   : > { %7570 = vmatmul.mubr.msk.f32.gmra.mrb[4].mxu1 %vm482_vm0, %v8819_v48 }
 0x46b   : > { %7572 = vmatprep.mubr.msk.f32.mxu1 %vm482_vm0, %v8823_v49 }
 0x46e   : > { %7573 = vmatmul.mubr.msk.f32.gmra.mrb[6].mxu1 %vm482_vm0, %v2894_v56 }
 0x46f   : > { %7577 = vmatprep.mubr.msk.f32.mxu1 %vm482_vm0, %v8769_v36 }
 0x472   : > { %7578 = vmatmul.mubr.msk.f32.vlgmr.msra.gmra.mrb[0].mxu1 %vm482_vm0, %v8775_v37 }
 0x473   : > { %7590 = vmatpush3.msk.msra.mxu1 %vm700_vm1, %v6841_v55  ;;  %7580 = vmatprep.mubr.msk.f32.mxu1 %vm482_vm0, %v8779_v4 }
 0x474   : > { %7603 = vmatprep.subr.msk.mxu1 %vm700_vm1, %v6851_v57 }
 0x476   : > { %7581 = vmatmul.mubr.msk.f32.gmra.mrb[2].mxu1 %vm482_vm0, %v8783_v38 }
 0x477   : > { %7583 = vmatprep.mubr.msk.f32.mxu1 %vm482_vm0, %v8787_v40 }
 0x47a   : > { %7584 = vmatmul.mubr.msk.f32.gmra.mrb[4].mxu1 %vm482_vm0, %v8791_v41 }
 0x47b   : > { %7586 = vmatprep.mubr.msk.f32.mxu1 %vm482_vm0, %v2594_v51 }
 0x47e   : > { %7587 = vmatmul.mubr.msk.f32.gmra.mrb[6].mxu1 %vm482_vm0, %v8648_v32 }
 0x47f   : > { %7591 = vmatprep.mubr.msk.f32.mxu1 %vm482_vm0, %v8736_v11 }
 0x482   : > { %7592 = vmatmul.mubr.msk.f32.vlgmr.msra.gmra.mrb[0].mxu1 %vm482_vm0, %v8743_v12 }
 0x483   : > { %7604 = vmatpush3.msk.msra.mxu1 %vm700_vm1, %v6851_v57  ;;  %7594 = vmatprep.mubr.msk.f32.mxu1 %vm482_vm0, %v8747_v14 }
 0x486   : > { %7595 = vmatmul.mubr.msk.f32.gmra.mrb[2].mxu1 %vm482_vm0, %v8751_v15 }
 0x487   : > { %7597 = vmatprep.mubr.msk.f32.mxu1 %vm482_vm0, %v8755_v60 }
 0x48a   : > { %7598 = vmatmul.mubr.msk.f32.gmra.mrb[4].mxu1 %vm482_vm0, %v8759_v19 }
 0x48b   : > { %7600 = vmatprep.mubr.msk.f32.mxu1 %vm482_vm0, %v2744_v54 }
 0x48e   : > { %7601 = vmatmul.mubr.msk.f32.gmra.mrb[6].mxu1 %vm482_vm0, %v8666_v33 }
 0x48f   : > { %7605 = vmatprep.mubr.msk.f32.mxu1 %vm482_vm0, %v8801_v44 }
 0x492   : > { %7606 = vmatmul.mubr.msk.f32.vlgmr.msra.gmra.mrb[0].mxu1 %vm482_vm0, %v8807_v45 }
 0x493   : > { %7608 = vmatprep.mubr.msk.f32.mxu1 %vm482_vm0, %v8811_v13 }
 0x496   : > { %7609 = vmatmul.mubr.msk.f32.gmra.mrb[2].mxu1 %vm482_vm0, %v8815_v46 }
 0x497   : > { %7611 = vmatprep.mubr.msk.f32.mxu1 %vm482_vm0, %v8819_v48 }
 0x49a   : > { %7612 = vmatmul.mubr.msk.f32.gmra.mrb[4].mxu1 %vm482_vm0, %v8823_v49 }
 0x49b   : > { %7614 = vmatprep.mubr.msk.f32.mxu1 %vm482_vm0, %v2894_v56 }
 0x49e   : > { %7615 = vmatmul.mubr.msk.f32.gmra.mrb[6].mxu1 %vm482_vm0, %v8683_v35 }
 0x565   : > { %v7607_v32 = vpop.f32.mrb[0].mxu1 }
 0x566   : > { %v3488_v33 = vsel %vm482_vm0, %v7607_v32, 0.0  ;;  %v3440_v58 = vpop.f32.mrb[1].mxu1 }
 0x567   : > { %v3487_v61 = vsel %vm482_vm0, %v3440_v58, 0.0 }
 0x568   : > { %v3489_v62 = vadd.f32 %v3488_v33, %v3487_v61 }
 0x569   : > { %v7610_v63 = vpop.f32.mrb[2].mxu1 }
 0x56a   : > { %v3450_v1 = vpop.f32.mrb[3].mxu1  ;;  %v3492_v6 = vsel %vm482_vm0, %v7610_v63, 0.0 }
 0x56b   : > { %v3490_v3 = vsel %vm482_vm0, %v3450_v1, 0.0 }
 0x56c   : > { %v3491_v5 = vadd.f32 %v3490_v3, %v3489_v62 }
 0x56d   : > { %v7613_v7 = vpop.f32.mrb[4].mxu1 }
 0x56e   : > { %v3460_v8 = vpop.f32.mrb[5].mxu1  ;;  %v3493_v9 = vadd.f32 %v3492_v6, %v3491_v5  ;;  %v3496_v17 = vsel %vm482_vm0, %v7613_v7, 0.0 }
 0x56f   : > { %v3494_v16 = vsel %vm482_vm0, %v3460_v8, 0.0 }
 0x570   : > { %v3495_v35 = vadd.f32 %v3494_v16, %v3493_v9 }
 0x571   : > { %v7616_v18 = vpop.f32.mrb[6].mxu1 }
 0x572   : > { %v3470_v20 = vpop.f32.mrb[7].mxu1  ;;  %v3497_v21 = vadd.f32 %v3496_v17, %v3495_v35  ;;  %v3500_v25 = vsel %vm482_vm0, %v7616_v18, 0.0  ;;  %v6863_v35 = vld [vmem:[%s9525_s8 + $0x4] sm:$0xf]  ;;  %v3666_v17 = vld [vmem:[#allocation2 + $0x8] sm:$0xff] }
 0x573   : > { %v3498_v22 = vsel %vm482_vm0, %v3470_v20, 0.0  ;;  %7617 = vmatprep.subr.msk.mxu0 %vm700_vm1, %v6863_v35  ;;  %7619 = vmatprep.mubr.msk.f32.mxu0 %vm482_vm0, %v3666_v17 }
 0x574   : > { %v3499_v23 = vadd.f32 %v3498_v22, %v3497_v21  ;;  %7618 = vmatpush3.msk.msra.mxu0 %vm700_vm1, %v6863_v35 }
 0x576   : > { %v3501_v26 = vadd.f32 %v3500_v25, %v3499_v23  ;;  %v6861_v23 = vld [vmem:[%s9523_s6] ss:$0 sm:$0xff] }
 0x578   : > { %3502 = vadd.xlane.f32.xlu0 %v3501_v26 }
 0x605   : > { %v3503_v27 = vpop.xlane.xlu0 %3502 }
 0x606   : > { %v3504_v31 = vrot.slane %v3503_v27, 4 }
 0x608   : > { %v3505_v10 = vadd.f32 %v3504_v31, %v3503_v27 }
 0x60a   : > { %v3506_v11 = vrot.slane %v3505_v10, 2 }
 0x60c   : > { %v3507_v12 = vadd.f32 %v3506_v11, %v3505_v10 }
 0x60e   : > { %v3508_v14 = vrot.slane %v3507_v12, 1 }
 0x610   : > { %v3509_v15 = vadd.f32 %v3508_v14, %v3507_v12 }
 0x612   : > { %8131 = vpush %v3509_v15  ;;  %v6862_v15 = vld [vmem:[%s9524_s7] ss:$0 sm:$0xff] }
 0x643   : > { %s8132_s25 = spop %8131 }
 0x644   : > { %s3513_s26 = smul.f32 0.00390625, %s8132_s25 }
 0x646   : > { %v3514_v60 = vstv %s3513_s26 }
 0x647   : > { %v3515_v19 = vsub.f32 %v3440_v58, %v3514_v60  ;;  %v3516_v24 = vsub.f32 %v7607_v32, %v3514_v60  ;;  %v3517_v30 = vsub.f32 %v3450_v1, %v3514_v60  ;;  %v3518_v36 = vsub.f32 %v7610_v63, %v3514_v60 }
 0x648   : > { %v3519_v37 = vsub.f32 %v3460_v8, %v3514_v60  ;;  %v3520_v41 = vsub.f32 %v7613_v7, %v3514_v60  ;;  %v3521_v13 = vsub.f32 %v3470_v20, %v3514_v60  ;;  %v3522_v50 = vsub.f32 %v7616_v18, %v3514_v60  ;;  %v8958_v18 = vld [vmem:[%s9525_s8] sm:$0xf] }
 0x649   : > { %v3523_v4 = vmul.f32 %v3515_v19, %v3515_v19  ;;  %v3524_v38 = vmul.f32 %v3516_v24, %v3516_v24  ;;  %v3525_v40 = vmul.f32 %v3517_v30, %v3517_v30  ;;  %v3526_v42 = vmul.f32 %v3518_v36, %v3518_v36  ;;  %7631 = vmatprep.subr.msk.mxu0 %vm700_vm1, %v8958_v18 }
 0x64a   : > { %v3527_v46 = vmul.f32 %v3519_v37, %v3519_v37  ;;  %v3528_v51 = vmul.f32 %v3520_v41, %v3520_v41  ;;  %v3529_v55 = vmul.f32 %v3521_v13, %v3521_v13  ;;  %v3530_v32 = vmul.f32 %v3522_v50, %v3522_v50 }
 0x64b   : > { %v3531_v43 = vsel %vm482_vm0, %v3523_v4, 0.0  ;;  %v3532_v44 = vsel %vm482_vm0, %v3524_v38, 0.0  ;;  %v3534_v48 = vsel %vm482_vm0, %v3525_v40, 0.0  ;;  %v3536_v52 = vsel %vm482_vm0, %v3526_v42, 0.0 }
 0x64c   : > { %v3533_v45 = vadd.f32 %v3532_v44, %v3531_v43  ;;  %v3538_v56 = vsel %vm482_vm0, %v3527_v46, 0.0  ;;  %v3540_v33 = vsel %vm482_vm0, %v3528_v51, 0.0  ;;  %v3542_v61 = vsel %vm482_vm0, %v3529_v55, 0.0 }
 0x64d   : > { %v3544_v63 = vsel %vm482_vm0, %v3530_v32, 0.0 }
 0x64e   : > { %v3535_v49 = vadd.f32 %v3534_v48, %v3533_v45 }
 0x650   : > { %v3537_v54 = vadd.f32 %v3536_v52, %v3535_v49 }
 0x652   : > { %v3539_v57 = vadd.f32 %v3538_v56, %v3537_v54 }
 0x654   : > { %v3541_v58 = vadd.f32 %v3540_v33, %v3539_v57 }
 0x656   : > { %v3543_v62 = vadd.f32 %v3542_v61, %v3541_v58 }
 0x658   : > { %v3545_v1 = vadd.f32 %v3544_v63, %v3543_v62 }
 0x65a   : > { %3546 = vadd.xlane.f32.xlu0 %v3545_v1 }
 0x6e7   : > { %v3547_v3 = vpop.xlane.xlu0 %3546 }
 0x6e8   : > { %v3548_v5 = vrot.slane %v3547_v3, 4 }
 0x6ea   : > { %v3549_v6 = vadd.f32 %v3548_v5, %v3547_v3 }
 0x6ec   : > { %v3550_v7 = vrot.slane %v3549_v6, 2 }
 0x6ee   : > { %v3551_v8 = vadd.f32 %v3550_v7, %v3549_v6 }
 0x6f0   : > { %v3552_v9 = vrot.slane %v3551_v8, 1 }
 0x6f2   : > { %v3553_v16 = vadd.f32 %v3552_v9, %v3551_v8 }
 0x6f4   : > { %8133 = vpush %v3553_v16 }
 0x725   : > { %s8134_s17 = spop %8133 }
 0x726   : > { %s3557_s18 = smul.f32 0.00390625, %s8134_s17 }
 0x728   : > { %s3558_s19 = sadd.f32 1e-05, %s3557_s18 }
 0x72a   : > { %v3559_v20 = vstv %s3558_s19 }
 0x72b   : > { %8178 = vrsqrt.f32 %v3559_v20 }
 0x735   : > { %v8179_v21 = vpop.eup %8178 }
 0x736   : > { %8135 = vpush %v8179_v21 }
 0x767   : > { %s8136_s20 = spop %8135 }
 0x768   : > { %v3562_v22 = vstv %s8136_s20 }
 0x769   : > { %v3563_v25 = vmul.f32 %v3562_v22, %v3515_v19  ;;  %v3564_v26 = vmul.f32 %v3562_v22, %v3516_v24  ;;  %v3565_v27 = vmul.f32 %v3562_v22, %v3517_v30  ;;  %v3566_v31 = vmul.f32 %v3562_v22, %v3518_v36 }
 0x76a   : > { %v3567_v10 = vmul.f32 %v3562_v22, %v3519_v37  ;;  %v3568_v11 = vmul.f32 %v3562_v22, %v3520_v41  ;;  %v3569_v12 = vmul.f32 %v3562_v22, %v3521_v13  ;;  %v3570_v14 = vmul.f32 %v3562_v22, %v3522_v50 }
 0x76b   : > { %v3578_v60 = vmul.f32 %v6861_v23, %v3563_v25  ;;  %v3579_v4 = vmul.f32 %v6861_v23, %v3564_v26  ;;  %v3580_v38 = vmul.f32 %v6861_v23, %v3565_v27  ;;  %v3581_v40 = vmul.f32 %v6861_v23, %v3566_v31 }
 0x76c   : > { %v3582_v42 = vmul.f32 %v6861_v23, %v3567_v10  ;;  %v3583_v43 = vmul.f32 %v6861_v23, %v3568_v11  ;;  %v3584_v44 = vmul.f32 %v6861_v23, %v3569_v12  ;;  %v3585_v45 = vmul.f32 %v6861_v23, %v3570_v14 }
 0x76d   : > { %v3593_v19 = vadd.f32 %v6862_v15, %v3578_v60  ;;  %v3594_v24 = vadd.f32 %v6862_v15, %v3579_v4  ;;  %v3595_v30 = vadd.f32 %v6862_v15, %v3580_v38  ;;  %v3596_v36 = vadd.f32 %v6862_v15, %v3581_v40  ;;  %v6882_v40 = vld [vmem:[%s9525_s8 + $0x8] sm:$0xf] }
 0x76e   : > { %v3597_v37 = vadd.f32 %v6862_v15, %v3582_v42  ;;  %v3598_v41 = vadd.f32 %v6862_v15, %v3583_v43  ;;  %v3599_v13 = vadd.f32 %v6862_v15, %v3584_v44  ;;  %v3600_v50 = vadd.f32 %v6862_v15, %v3585_v45 }
 0x76f   : > { %v3601_v46 = vadd.f32 %v3593_v19, %v8439_v29  ;;  %v3602_v48 = vadd.f32 %v3594_v24, %v8437_v28  ;;  %v3603_v49 = vadd.f32 %v3595_v30, %v8445_v34  ;;  %v3604_v51 = vadd.f32 %v3596_v36, %v8449_v39  ;;  %v3657_v19 = vld [vmem:[#allocation2 + $0x7] sm:$0xff] }
 0x770   : > { %v3605_v52 = vadd.f32 %v3597_v37, %v8465_v47  ;;  %v3606_v54 = vadd.f32 %v3598_v41, %v8474_v53  ;;  %v3607_v55 = vadd.f32 %v3599_v13, %v8482_v59  ;;  %v3608_v33 = vadd.f32 %v3600_v50, %v8492_v2  ;;  %v6892_v36 = vld [vmem:[%s9525_s8 + $0xc] sm:$0xf] }
 0x771   : > { %v3617_v56 = vmul.f32 0.70710677, %v3601_v46  ;;  %v3618_v57 = vmul.f32 0.70710677, %v3602_v48  ;;  %v3619_v32 = vmul.f32 0.70710677, %v3603_v49 }
 0x772   : > { %v3620_v58 = vmul.f32 0.70710677, %v3604_v51  ;;  %v3621_v29 = vmul.f32 0.70710677, %v3605_v52  ;;  %v3622_v28 = vmul.f32 0.70710677, %v3606_v54 }
 0x773   : > { %8180 = verf.f32 %v3617_v56  ;;  %v3623_v34 = vmul.f32 0.70710677, %v3607_v55  ;;  %v3624_v61 = vmul.f32 0.70710677, %v3608_v33  ;;  %v3609_v53 = vmul.f32 0.5, %v3601_v46 }
 0x774   : > { %8182 = verf.f32 %v3618_v57  ;;  %v3610_v63 = vmul.f32 0.5, %v3602_v48  ;;  %v3611_v3 = vmul.f32 0.5, %v3603_v49  ;;  %v3612_v8 = vmul.f32 0.5, %v3604_v51  ;;  %v3940_v48 = vld [vmem:[#allocation2 + $0x9] sm:$0xff] }
 0x775   : > { %8184 = verf.f32 %v3619_v32  ;;  %v3613_v17 = vmul.f32 0.5, %v3605_v52  ;;  %v3614_v23 = vmul.f32 0.5, %v3606_v54  ;;  %v3615_v31 = vmul.f32 0.5, %v3607_v55  ;;  %v6902_v51 = vld [vmem:[%s9525_s8 + $0x10] sm:$0xf] }
 0x776   : > { %8186 = verf.f32 %v3620_v58  ;;  %v3616_v12 = vmul.f32 0.5, %v3608_v33  ;;  %v6912_v33 = vld [vmem:[%s9525_s8 + $0x14] sm:$0xf] }
 0x777   : > { %8188 = verf.f32 %v3621_v29  ;;  %v6922_v29 = vld [vmem:[%s9525_s8 + $0x18] sm:$0xf] }
 0x778   : > { %8190 = verf.f32 %v3622_v28 }
 0x779   : > { %8192 = verf.f32 %v3623_v34  ;;  %v6932_v34 = vld [vmem:[%s9525_s8 + $0x1c] sm:$0xf] }
 0x77a   : > { %8194 = verf.f32 %v3624_v61 }
 0x77d   : > { %v8181_v39 = vpop.eup %8180 }
 0x77e   : > { %v8183_v47 = vpop.eup %8182  ;;  %v3633_v59 = vadd.f32 1.0, %v8181_v39  ;;  %v6942_v39 = vld [vmem:[%s9525_s8 + $0x20] sm:$0xf] }
 0x77f   : > { %v8185_v62 = vpop.eup %8184  ;;  %v3634_v2 = vadd.f32 1.0, %v8183_v47  ;;  %v4547_v47 = vld [vmem:[#allocation2 + $0xdf] sm:$0xff] }
 0x780   : > { %v8187_v1 = vpop.eup %8186  ;;  %v3635_v5 = vadd.f32 1.0, %v8185_v62  ;;  %v3641_v6 = vmul.f32 %v3633_v59, %v3609_v53  ;;  %v4697_v53 = vld [vmem:[#allocation2 + $0xe0] sm:$0xff] }
 0x781   : > { %v8189_v7 = vpop.eup %8188  ;;  %v3636_v9 = vadd.f32 1.0, %v8187_v1  ;;  %v3642_v16 = vmul.f32 %v3634_v2, %v3610_v63  ;;  %v4847_v59 = vld [vmem:[#allocation2 + $0xe1] sm:$0xff] }
 0x782   : > { %v8191_v35 = vpop.eup %8190  ;;  %v3637_v20 = vadd.f32 1.0, %v8189_v7  ;;  %v3643_v21 = vmul.f32 %v3635_v5, %v3611_v3  ;;  %3649 = vst.msk [vmem:[#allocation2 + $0x20] sm:$0xff] %vm482_vm0, %v3641_v6 }
 0x783   : > { %v8193_v22 = vpop.eup %8192  ;;  %v3638_v25 = vadd.f32 1.0, %v8191_v35  ;;  %v3644_v26 = vmul.f32 %v3636_v9, %v3612_v8  ;;  %3650 = vst.msk [vmem:[#allocation2 + $0x38] sm:$0xff] %vm482_vm0, %v3642_v16 }
 0x784   : > { %v8195_v27 = vpop.eup %8194  ;;  %v3639_v10 = vadd.f32 1.0, %v8193_v22  ;;  %v3645_v11 = vmul.f32 %v3637_v20, %v3613_v17  ;;  %3651 = vst.msk [vmem:[#allocation2 + $0x50] sm:$0xff] %vm482_vm0, %v3643_v21 }
 0x785   : > { %v3640_v14 = vadd.f32 1.0, %v8195_v27  ;;  %v3646_v15 = vmul.f32 %v3638_v25, %v3614_v23  ;;  %3652 = vst.msk [vmem:[#allocation2 + $0x68] sm:$0xff] %vm482_vm0, %v3644_v26 }
 0x786   : > { %v3647_v60 = vmul.f32 %v3639_v10, %v3615_v31  ;;  %3653 = vst.msk [vmem:[#allocation2 + $0x80] sm:$0xff] %vm482_vm0, %v3645_v11 }
 0x787   : > { %v3648_v4 = vmul.f32 %v3640_v14, %v3616_v12  ;;  %3654 = vst.msk [vmem:[#allocation2 + $0x98] sm:$0xff] %vm482_vm0, %v3646_v15 }
 0x788   : > { %3655 = vst.msk [vmem:[#allocation2 + $0xb0] sm:$0xff] %vm482_vm0, %v3647_v60 }
 0x789   : > { %3656 = vst.msk [vmem:[#allocation2 + $0xc8] sm:$0xff] %vm482_vm0, %v3648_v4  ;;  %v8987_v38 = vld [vmem:[#allocation2 + $0x20] sm:$0xff] }
 0x78a   : > { %7620 = vmatmul.mubr.msk.f32.vlgmr.msra.gmra.mrb[8].mxu0 %vm482_vm0, %v8987_v38  ;;  %v8994_v42 = vld [vmem:[#allocation2 + $0x38] sm:$0xff]  ;;  %v3941_v50 = vld [vmem:[#allocation2 + $0x21] sm:$0xff] }
 0x78b   : > { %7632 = vmatpush3.msk.msra.mxu0 %vm700_vm1, %v8958_v18  ;;  %7622 = vmatprep.mubr.msk.f32.mxu0 %vm482_vm0, %v8994_v42  ;;  %v9001_v43 = vld [vmem:[#allocation2 + $0x50] sm:$0xff]  ;;  %v3658_v30 = vld [vmem:[#allocation2 + $0x1f] sm:$0xff] }
 0x78c   : > { %7645 = vmatprep.subr.msk.mxu0 %vm700_vm1, %v6882_v40  ;;  %v9005_v44 = vld [vmem:[#allocation2 + $0x68] sm:$0xff]  ;;  %v9086_v37 = vld [vmem:[#allocation2 + $0x37] sm:$0xff] }
 0x78d   : > { %v9009_v45 = vld [vmem:[#allocation2 + $0x80] sm:$0xff]  ;;  %v9092_v41 = vld [vmem:[#allocation2 + $0x4f] sm:$0xff] }
 0x78e   : > { %7623 = vmatmul.mubr.msk.f32.gmra.mrb[10].mxu0 %vm482_vm0, %v9001_v43  ;;  %v9013_v18 = vld [vmem:[#allocation2 + $0x98] sm:$0xff]  ;;  %v9096_v0 = vld [vmem:[#allocation2 + $0x67] sm:$0xff] }
 0x78f   : > { %7625 = vmatprep.mubr.msk.f32.mxu0 %vm482_vm0, %v9005_v44  ;;  %v9017_v24 = vld [vmem:[#allocation2 + $0xb0] sm:$0xff]  ;;  %v9100_v13 = vld [vmem:[#allocation2 + $0x7f] sm:$0xff] }
 0x790   : > { %v9104_v46 = vld [vmem:[#allocation2 + $0x97] sm:$0xff]  ;;  %v9108_v49 = vld [vmem:[#allocation2 + $0xaf] sm:$0xff]  ;;  %v9131_v56 = vld [vmem:[#allocation2 + $0x81] sm:$0xff] }
 0x791   : > { %v9117_v52 = vld [vmem:[#allocation2 + $0x39] sm:$0xff]  ;;  %v9123_v54 = vld [vmem:[#allocation2 + $0x51] sm:$0xff]  ;;  %v9127_v55 = vld [vmem:[#allocation2 + $0x69] sm:$0xff] }
 0x792   : > { %7626 = vmatmul.mubr.msk.f32.gmra.mrb[12].mxu0 %vm482_vm0, %v9009_v45  ;;  %v9135_v57 = vld [vmem:[#allocation2 + $0x99] sm:$0xff]  ;;  %v9139_v32 = vld [vmem:[#allocation2 + $0xb1] sm:$0xff]  ;;  %v4097_v58 = vld [vmem:[#allocation2 + $0xc7] sm:$0xff] }
 0x793   : > { %7628 = vmatprep.mubr.msk.f32.mxu0 %vm482_vm0, %v9013_v18  ;;  %v4247_v28 = vld [vmem:[#allocation2 + $0xc8] sm:$0xff] }
 0x794   : > { %v4397_v61 = vld [vmem:[#allocation2 + $0xc9] sm:$0xff] }
 0x796   : > { %7629 = vmatmul.mubr.msk.f32.gmra.mrb[14].mxu0 %vm482_vm0, %v9017_v24 }
 0x797   : > { %7633 = vmatprep.mubr.msk.f32.mxu0 %vm482_vm0, %v3657_v19 }
 0x79a   : > { %7634 = vmatmul.mubr.msk.f32.vlgmr.msra.gmra.mrb[8].mxu0 %vm482_vm0, %v3658_v30 }
 0x79b   : > { %7646 = vmatpush3.msk.msra.mxu0 %vm700_vm1, %v6882_v40  ;;  %7636 = vmatprep.mubr.msk.f32.mxu0 %vm482_vm0, %v9086_v37 }
 0x79c   : > { %7659 = vmatprep.subr.msk.mxu0 %vm700_vm1, %v6892_v36 }
 0x79e   : > { %7637 = vmatmul.mubr.msk.f32.gmra.mrb[10].mxu0 %vm482_vm0, %v9092_v41 }
 0x79f   : > { %7639 = vmatprep.mubr.msk.f32.mxu0 %vm482_vm0, %v9096_v0 }
 0x7a2   : > { %7640 = vmatmul.mubr.msk.f32.gmra.mrb[12].mxu0 %vm482_vm0, %v9100_v13 }
 0x7a3   : > { %7642 = vmatprep.mubr.msk.f32.mxu0 %vm482_vm0, %v9104_v46 }
 0x7a6   : > { %7643 = vmatmul.mubr.msk.f32.gmra.mrb[14].mxu0 %vm482_vm0, %v9108_v49 }
 0x7a7   : > { %7647 = vmatprep.mubr.msk.f32.mxu0 %vm482_vm0, %v3940_v48 }
 0x7aa   : > { %7648 = vmatmul.mubr.msk.f32.vlgmr.msra.gmra.mrb[8].mxu0 %vm482_vm0, %v3941_v50 }
 0x7ab   : > { %7660 = vmatpush3.msk.msra.mxu0 %vm700_vm1, %v6892_v36  ;;  %7650 = vmatprep.mubr.msk.f32.mxu0 %vm482_vm0, %v9117_v52 }
 0x7ac   : > { %7673 = vmatprep.subr.msk.mxu0 %vm700_vm1, %v6902_v51 }
 0x7ae   : > { %7651 = vmatmul.mubr.msk.f32.gmra.mrb[10].mxu0 %vm482_vm0, %v9123_v54 }
 0x7af   : > { %7653 = vmatprep.mubr.msk.f32.mxu0 %vm482_vm0, %v9127_v55 }
 0x7b2   : > { %7654 = vmatmul.mubr.msk.f32.gmra.mrb[12].mxu0 %vm482_vm0, %v9131_v56 }
 0x7b3   : > { %7656 = vmatprep.mubr.msk.f32.mxu0 %vm482_vm0, %v9135_v57 }
 0x7b6   : > { %7657 = vmatmul.mubr.msk.f32.gmra.mrb[14].mxu0 %vm482_vm0, %v9139_v32 }
 0x7b7   : > { %7661 = vmatprep.mubr.msk.f32.mxu0 %vm482_vm0, %v3658_v30 }
 0x7ba   : > { %7662 = vmatmul.mubr.msk.f32.vlgmr.msra.gmra.mrb[8].mxu0 %vm482_vm0, %v9086_v37 }
 0x7bb   : > { %7674 = vmatpush3.msk.msra.mxu0 %vm700_vm1, %v6902_v51  ;;  %7664 = vmatprep.mubr.msk.f32.mxu0 %vm482_vm0, %v9092_v41 }
 0x7bc   : > { %7687 = vmatprep.subr.msk.mxu0 %vm700_vm1, %v6912_v33 }
 0x7be   : > { %7665 = vmatmul.mubr.msk.f32.gmra.mrb[10].mxu0 %vm482_vm0, %v9096_v0 }
 0x7bf   : > { %7667 = vmatprep.mubr.msk.f32.mxu0 %vm482_vm0, %v9100_v13 }
 0x7c2   : > { %7668 = vmatmul.mubr.msk.f32.gmra.mrb[12].mxu0 %vm482_vm0, %v9104_v46 }
 0x7c3   : > { %7670 = vmatprep.mubr.msk.f32.mxu0 %vm482_vm0, %v9108_v49 }
 0x7c6   : > { %7671 = vmatmul.mubr.msk.f32.gmra.mrb[14].mxu0 %vm482_vm0, %v4097_v58 }
 0x7c7   : > { %7675 = vmatprep.mubr.msk.f32.mxu0 %vm482_vm0, %v8987_v38 }
 0x7ca   : > { %7676 = vmatmul.mubr.msk.f32.vlgmr.msra.gmra.mrb[8].mxu0 %vm482_vm0, %v8994_v42 }
 0x7cb   : > { %7688 = vmatpush3.msk.msra.mxu0 %vm700_vm1, %v6912_v33  ;;  %7678 = vmatprep.mubr.msk.f32.mxu0 %vm482_vm0, %v9001_v43 }
 0x7cc   : > { %7701 = vmatprep.subr.msk.mxu0 %vm700_vm1, %v6922_v29 }
 0x7ce   : > { %7679 = vmatmul.mubr.msk.f32.gmra.mrb[10].mxu0 %vm482_vm0, %v9005_v44 }
 0x7cf   : > { %7681 = vmatprep.mubr.msk.f32.mxu0 %vm482_vm0, %v9009_v45 }
 0x7d2   : > { %7682 = vmatmul.mubr.msk.f32.gmra.mrb[12].mxu0 %vm482_vm0, %v9013_v18 }
 0x7d3   : > { %7684 = vmatprep.mubr.msk.f32.mxu0 %vm482_vm0, %v9017_v24 }
 0x7d6   : > { %7685 = vmatmul.mubr.msk.f32.gmra.mrb[14].mxu0 %vm482_vm0, %v4247_v28 }
 0x7d7   : > { %7689 = vmatprep.mubr.msk.f32.mxu0 %vm482_vm0, %v3941_v50 }
 0x7da   : > { %7690 = vmatmul.mubr.msk.f32.vlgmr.msra.gmra.mrb[8].mxu0 %vm482_vm0, %v9117_v52 }
 0x7db   : > { %7702 = vmatpush3.msk.msra.mxu0 %vm700_vm1, %v6922_v29  ;;  %7692 = vmatprep.mubr.msk.f32.mxu0 %vm482_vm0, %v9123_v54 }
 0x7dc   : > { %7715 = vmatprep.subr.msk.mxu0 %vm700_vm1, %v6932_v34 }
 0x7de   : > { %7693 = vmatmul.mubr.msk.f32.gmra.mrb[10].mxu0 %vm482_vm0, %v9127_v55 }
 0x7df   : > { %7695 = vmatprep.mubr.msk.f32.mxu0 %vm482_vm0, %v9131_v56 }
 0x7e2   : > { %7696 = vmatmul.mubr.msk.f32.gmra.mrb[12].mxu0 %vm482_vm0, %v9135_v57 }
 0x7e3   : > { %7698 = vmatprep.mubr.msk.f32.mxu0 %vm482_vm0, %v9139_v32 }
 0x7e6   : > { %7699 = vmatmul.mubr.msk.f32.gmra.mrb[14].mxu0 %vm482_vm0, %v4397_v61 }
 0x7e7   : > { %7703 = vmatprep.mubr.msk.f32.mxu0 %vm482_vm0, %v9086_v37 }
 0x7ea   : > { %7704 = vmatmul.mubr.msk.f32.vlgmr.msra.gmra.mrb[8].mxu0 %vm482_vm0, %v9092_v41 }
 0x7eb   : > { %7716 = vmatpush3.msk.msra.mxu0 %vm700_vm1, %v6932_v34  ;;  %7706 = vmatprep.mubr.msk.f32.mxu0 %vm482_vm0, %v9096_v0 }
 0x7ec   : > { %7729 = vmatprep.subr.msk.mxu0 %vm700_vm1, %v6942_v39 }
 0x7ee   : > { %7707 = vmatmul.mubr.msk.f32.gmra.mrb[10].mxu0 %vm482_vm0, %v9100_v13 }
 0x7ef   : > { %7709 = vmatprep.mubr.msk.f32.mxu0 %vm482_vm0, %v9104_v46 }
 0x7f2   : > { %7710 = vmatmul.mubr.msk.f32.gmra.mrb[12].mxu0 %vm482_vm0, %v9108_v49 }
 0x7f3   : > { %7712 = vmatprep.mubr.msk.f32.mxu0 %vm482_vm0, %v4097_v58 }
 0x7f6   : > { %7713 = vmatmul.mubr.msk.f32.gmra.mrb[14].mxu0 %vm482_vm0, %v4547_v47 }
 0x7f7   : > { %7717 = vmatprep.mubr.msk.f32.mxu0 %vm482_vm0, %v8994_v42 }
 0x7fa   : > { %7718 = vmatmul.mubr.msk.f32.vlgmr.msra.gmra.mrb[8].mxu0 %vm482_vm0, %v9001_v43 }
 0x7fb   : > { %7730 = vmatpush3.msk.msra.mxu0 %vm700_vm1, %v6942_v39  ;;  %7720 = vmatprep.mubr.msk.f32.mxu0 %vm482_vm0, %v9005_v44 }
 0x7fe   : > { %7721 = vmatmul.mubr.msk.f32.gmra.mrb[10].mxu0 %vm482_vm0, %v9009_v45 }
 0x7ff   : > { %7723 = vmatprep.mubr.msk.f32.mxu0 %vm482_vm0, %v9013_v18 }
 0x802   : > { %7724 = vmatmul.mubr.msk.f32.gmra.mrb[12].mxu0 %vm482_vm0, %v9017_v24 }
 0x803   : > { %7726 = vmatprep.mubr.msk.f32.mxu0 %vm482_vm0, %v4247_v28 }
 0x806   : > { %7727 = vmatmul.mubr.msk.f32.gmra.mrb[14].mxu0 %vm482_vm0, %v4697_v53 }
 0x807   : > { %7731 = vmatprep.mubr.msk.f32.mxu0 %vm482_vm0, %v9117_v52 }
 0x80a   : > { %7732 = vmatmul.mubr.msk.f32.vlgmr.msra.gmra.mrb[8].mxu0 %vm482_vm0, %v9123_v54 }
 0x80b   : > { %7734 = vmatprep.mubr.msk.f32.mxu0 %vm482_vm0, %v9127_v55 }
 0x80e   : > { %7735 = vmatmul.mubr.msk.f32.gmra.mrb[10].mxu0 %vm482_vm0, %v9131_v56 }
 0x80f   : > { %7737 = vmatprep.mubr.msk.f32.mxu0 %vm482_vm0, %v9135_v57 }
 0x812   : > { %7738 = vmatmul.mubr.msk.f32.gmra.mrb[12].mxu0 %vm482_vm0, %v9139_v32 }
 0x813   : > { %7740 = vmatprep.mubr.msk.f32.mxu0 %vm482_vm0, %v4397_v61 }
 0x816   : > { %7741 = vmatmul.mubr.msk.f32.gmra.mrb[14].mxu0 %vm482_vm0, %v4847_v59 }
 0x8dd   : > { %v7733_v62 = vpop.f32.mrb[8].mxu0 }
 0x8de   : > { %v4991_v63 = vsel %vm513_vm2, %v7733_v62, 0.0  ;;  %v4943_v2 = vpop.f32.mrb[9].mxu0 }
 0x8df   : > { %v4990_v1 = vsel %vm513_vm2, %v4943_v2, 0.0 }
 0x8e0   : > { %v4992_v3 = vadd.f32 %v4991_v63, %v4990_v1 }
 0x8e1   : > { %v7736_v5 = vpop.f32.mrb[10].mxu0 }
 0x8e2   : > { %v4953_v6 = vpop.f32.mrb[11].mxu0  ;;  %v4995_v9 = vsel %vm513_vm2, %v7736_v5, 0.0 }
 0x8e3   : > { %v4993_v7 = vsel %vm513_vm2, %v4953_v6, 0.0 }
 0x8e4   : > { %v4994_v8 = vadd.f32 %v4993_v7, %v4992_v3  ;;  %v9271_v7 = vld [vmem:[%s9528_s11] sm:$0xff] }
 0x8e5   : > { %v7739_v16 = vpop.f32.mrb[12].mxu0 }
 0x8e6   : > { %v4963_v35 = vpop.f32.mrb[13].mxu0  ;;  %v4996_v17 = vadd.f32 %v4995_v9, %v4994_v8  ;;  %v4999_v22 = vsel %vm513_vm2, %v7739_v16, 0.0 }
 0x8e7   : > { %v4997_v20 = vsel %vm513_vm2, %v4963_v35, 0.0 }
 0x8e8   : > { %v4998_v21 = vadd.f32 %v4997_v20, %v4996_v17 }
 0x8e9   : > { %v7742_v23 = vpop.f32.mrb[14].mxu0 }
 0x8ea   : > { %v4973_v25 = vpop.f32.mrb[15].mxu0  ;;  %v5000_v26 = vadd.f32 %v4999_v22, %v4998_v21  ;;  %v5003_v10 = vsel %vm513_vm2, %v7742_v23, 0.0 }
 0x8eb   : > { %v5001_v27 = vsel %vm513_vm2, %v4973_v25, 0.0 }
 0x8ec   : > { %v5002_v31 = vadd.f32 %v5001_v27, %v5000_v26 }
 0x8ee   : > { %v5004_v11 = vadd.f32 %v5003_v10, %v5002_v31  ;;  %v6953_v31 = vld [vmem:[%s9527_s10] ss:$0 sm:$0xff] }
 0x8f0   : > { %5005 = vadd.xlane.f32.xlu1 %v5004_v11 }
 0x97d   : > { %v5006_v12 = vpop.xlane.xlu1 %5005 }
 0x97e   : > { %v5007_v14 = vrot.slane %v5006_v12, 4 }
 0x980   : > { %v5008_v15 = vadd.f32 %v5007_v14, %v5006_v12 }
 0x982   : > { %v5009_v60 = vrot.slane %v5008_v15, 2 }
 0x984   : > { %v5010_v4 = vadd.f32 %v5009_v60, %v5008_v15 }
 0x986   : > { %v5011_v38 = vrot.slane %v5010_v4, 1 }
 0x988   : > { %v5012_v40 = vadd.f32 %v5011_v38, %v5010_v4 }
 0x98a   : > { %8137 = vpush %v5012_v40 }
 0x9bb   : > { %s8138_s25 = spop %8137 }
 0x9bc   : > { %s5016_s26 = smul.f32 0.001953125, %s8138_s25 }
 0x9be   : > { %v5017_v42 = vstv %s5016_s26 }
 0x9bf   : > { %v5018_v43 = vsub.f32 %v4943_v2, %v5017_v42  ;;  %v5019_v44 = vsub.f32 %v7733_v62, %v5017_v42  ;;  %v5020_v45 = vsub.f32 %v4953_v6, %v5017_v42  ;;  %v5021_v18 = vsub.f32 %v7736_v5, %v5017_v42  ;;  %v6954_v5 = vld [vmem:[%s9528_s11 + $0x8] sm:$0xff]  ;;  %v5162_v6 = vld [vmem:[#allocation3 + $0x8] sm:$0xff] }
 0x9c0   : > { %v5022_v19 = vsub.f32 %v4963_v35, %v5017_v42  ;;  %v5023_v37 = vsub.f32 %v7739_v16, %v5017_v42  ;;  %v5024_v48 = vsub.f32 %v4973_v25, %v5017_v42  ;;  %v5025_v52 = vsub.f32 %v7742_v23, %v5017_v42  ;;  %7743 = vmatprep.subr.mxu1 %v6954_v5  ;;  %v6952_v35 = vld [vmem:[%s9526_s9] ss:$0 sm:$0xff] }
 0x9c1   : > { %v5026_v24 = vmul.f32 %v5018_v43, %v5018_v43  ;;  %v5027_v30 = vmul.f32 %v5019_v44, %v5019_v44  ;;  %v5028_v36 = vmul.f32 %v5020_v45, %v5020_v45  ;;  %v5029_v41 = vmul.f32 %v5021_v18, %v5021_v18  ;;  %7745 = vmatprep.mubr.msk.f32.mxu1 %vm513_vm2, %v5162_v6 }
 0x9c2   : > { %v5030_v49 = vmul.f32 %v5022_v19, %v5022_v19  ;;  %v5031_v54 = vmul.f32 %v5023_v37, %v5023_v37  ;;  %v5032_v57 = vmul.f32 %v5024_v48, %v5024_v48  ;;  %v5033_v58 = vmul.f32 %v5025_v52, %v5025_v52  ;;  %7744 = vmatpush3.msra.mxu1 %v6954_v5 }
 0x9c3   : > { %v5034_v0 = vsel %vm513_vm2, %v5026_v24, 0.0  ;;  %v5035_v13 = vsel %vm513_vm2, %v5027_v30, 0.0  ;;  %v5037_v50 = vsel %vm513_vm2, %v5028_v36, 0.0  ;;  %v5039_v55 = vsel %vm513_vm2, %v5029_v41, 0.0  ;;  %7757 = vmatprep.subr.mxu1 %v9271_v7 }
 0x9c4   : > { %v5036_v46 = vadd.f32 %v5035_v13, %v5034_v0  ;;  %v5041_v32 = vsel %vm513_vm2, %v5030_v49, 0.0  ;;  %v5043_v29 = vsel %vm513_vm2, %v5031_v54, 0.0  ;;  %v5045_v34 = vsel %vm513_vm2, %v5032_v57, 0.0 }
 0x9c5   : > { %v5047_v39 = vsel %vm513_vm2, %v5033_v58, 0.0 }
 0x9c6   : > { %v5038_v51 = vadd.f32 %v5037_v50, %v5036_v46 }
 0x9c8   : > { %v5040_v56 = vadd.f32 %v5039_v55, %v5038_v51 }
 0x9ca   : > { %v5042_v33 = vadd.f32 %v5041_v32, %v5040_v56 }
 0x9cc   : > { %v5044_v28 = vadd.f32 %v5043_v29, %v5042_v33 }
 0x9ce   : > { %v5046_v61 = vadd.f32 %v5045_v34, %v5044_v28 }
 0x9d0   : > { %v5048_v47 = vadd.f32 %v5047_v39, %v5046_v61 }
 0x9d2   : > { %5049 = vadd.xlane.f32.xlu0 %v5048_v47 }
 0xa5f   : > { %v5050_v53 = vpop.xlane.xlu0 %5049 }
 0xa60   : > { %v5051_v59 = vrot.slane %v5050_v53, 4 }
 0xa62   : > { %v5052_v62 = vadd.f32 %v5051_v59, %v5050_v53 }
 0xa64   : > { %v5053_v63 = vrot.slane %v5052_v62, 2 }
 0xa66   : > { %v5054_v2 = vadd.f32 %v5053_v63, %v5052_v62 }
 0xa68   : > { %v5055_v1 = vrot.slane %v5054_v2, 1 }
 0xa6a   : > { %v5056_v3 = vadd.f32 %v5055_v1, %v5054_v2 }
 0xa6c   : > { %8139 = vpush %v5056_v3 }
 0xa9d   : > { %s8140_s17 = spop %8139 }
 0xa9e   : > { %s5060_s18 = smul.f32 0.001953125, %s8140_s17 }
 0xaa0   : > { %s5061_s19 = sadd.f32 1e-05, %s5060_s18 }
 0xaa2   : > { %v5062_v8 = vstv %s5061_s19 }
 0xaa3   : > { %8196 = vrsqrt.f32 %v5062_v8 }
 0xaad   : > { %v8197_v9 = vpop.eup %8196 }
 0xaae   : > { %8141 = vpush %v8197_v9 }
 0xadf   : > { %s8142_s20 = spop %8141 }
 0xae0   : > { %v5065_v16 = vstv %s8142_s20 }
 0xae1   : > { %v5066_v17 = vmul.f32 %v5065_v16, %v5018_v43  ;;  %v5067_v20 = vmul.f32 %v5065_v16, %v5019_v44  ;;  %v5068_v21 = vmul.f32 %v5065_v16, %v5020_v45  ;;  %v5069_v22 = vmul.f32 %v5065_v16, %v5021_v18 }
 0xae2   : > { %v5070_v23 = vmul.f32 %v5065_v16, %v5022_v19  ;;  %v5071_v25 = vmul.f32 %v5065_v16, %v5023_v37  ;;  %v5072_v26 = vmul.f32 %v5065_v16, %v5024_v48  ;;  %v5073_v27 = vmul.f32 %v5065_v16, %v5025_v52 }
 0xae3   : > { %v5081_v10 = vmul.f32 %v6952_v35, %v5066_v17  ;;  %v5082_v11 = vmul.f32 %v6952_v35, %v5067_v20  ;;  %v5083_v12 = vmul.f32 %v6952_v35, %v5068_v21  ;;  %v5084_v14 = vmul.f32 %v6952_v35, %v5069_v22  ;;  %v6971_v22 = vld [vmem:[%s9528_s11 + $0x10] sm:$0xff] }
 0xae4   : > { %v5085_v15 = vmul.f32 %v6952_v35, %v5070_v23  ;;  %v5086_v60 = vmul.f32 %v6952_v35, %v5071_v25  ;;  %v5087_v4 = vmul.f32 %v6952_v35, %v5072_v26  ;;  %v5088_v43 = vmul.f32 %v6952_v35, %v5073_v27 }
 0xae5   : > { %v5096_v38 = vadd.f32 %v6953_v31, %v5081_v10  ;;  %v5097_v40 = vadd.f32 %v6953_v31, %v5082_v11  ;;  %v5098_v42 = vadd.f32 %v6953_v31, %v5083_v12  ;;  %v5099_v44 = vadd.f32 %v6953_v31, %v5084_v14  ;;  %v6980_v12 = vld [vmem:[%s9528_s11 + $0x18] sm:$0xff] }
 0xae6   : > { %v5100_v45 = vadd.f32 %v6953_v31, %v5085_v15  ;;  %v5101_v18 = vadd.f32 %v6953_v31, %v5086_v60  ;;  %v5102_v19 = vadd.f32 %v6953_v31, %v5087_v4  ;;  %v5103_v37 = vadd.f32 %v6953_v31, %v5088_v43  ;;  %v5153_v31 = vld [vmem:[#allocation3 + $0x7] sm:$0xff] }
 0xae7   : > { %v5112_v24 = vmul.f32 0.70710677, %v5096_v38  ;;  %v5113_v30 = vmul.f32 0.70710677, %v5097_v40  ;;  %v5114_v36 = vmul.f32 0.70710677, %v5098_v42 }
 0xae8   : > { %v5115_v41 = vmul.f32 0.70710677, %v5099_v44  ;;  %v5116_v0 = vmul.f32 0.70710677, %v5100_v45  ;;  %v5117_v13 = vmul.f32 0.70710677, %v5101_v18 }
 0xae9   : > { %8198 = verf.f32 %v5112_v24  ;;  %v5118_v46 = vmul.f32 0.70710677, %v5102_v19  ;;  %v5119_v48 = vmul.f32 0.70710677, %v5103_v37  ;;  %v5104_v51 = vmul.f32 0.5, %v5096_v38 }
 0xaea   : > { %8200 = verf.f32 %v5113_v30  ;;  %v5105_v55 = vmul.f32 0.5, %v5097_v40  ;;  %v5106_v32 = vmul.f32 0.5, %v5098_v42  ;;  %v5107_v28 = vmul.f32 0.5, %v5099_v44  ;;  %v5430_v40 = vld [vmem:[#allocation3 + $0x9] sm:$0xff] }
 0xaeb   : > { %8202 = verf.f32 %v5114_v36  ;;  %v5108_v47 = vmul.f32 0.5, %v5100_v45  ;;  %v5109_v63 = vmul.f32 0.5, %v5101_v18  ;;  %v5110_v5 = vmul.f32 0.5, %v5102_v19  ;;  %v6989_v44 = vld [vmem:[%s9528_s11 + $0x20] sm:$0xff] }
 0xaec   : > { %8204 = verf.f32 %v5115_v41  ;;  %v5111_v9 = vmul.f32 0.5, %v5103_v37  ;;  %v6998_v37 = vld [vmem:[%s9528_s11 + $0x28] sm:$0xff] }
 0xaed   : > { %8206 = verf.f32 %v5116_v0  ;;  %v7007_v0 = vld [vmem:[%s9528_s11 + $0x30] sm:$0xff] }
 0xaee   : > { %8208 = verf.f32 %v5117_v13 }
 0xaef   : > { %8210 = verf.f32 %v5118_v46  ;;  %v7016_v46 = vld [vmem:[%s9528_s11 + $0x38] sm:$0xff] }
 0xaf0   : > { %8212 = verf.f32 %v5119_v48 }
 0xaf3   : > { %v8199_v49 = vpop.eup %8198 }
 0xaf4   : > { %v8201_v50 = vpop.eup %8200  ;;  %v5128_v52 = vadd.f32 1.0, %v8199_v49  ;;  %v7025_v49 = vld [vmem:[%s9528_s11 + $0x40] sm:$0xff] }
 0xaf5   : > { %v8203_v54 = vpop.eup %8202  ;;  %v5129_v56 = vadd.f32 1.0, %v8201_v50  ;;  %v6026_v50 = vld [vmem:[#allocation3 + $0xdf] sm:$0xff] }
 0xaf6   : > { %v8205_v57 = vpop.eup %8204  ;;  %v5130_v33 = vadd.f32 1.0, %v8203_v54  ;;  %v5136_v58 = vmul.f32 %v5128_v52, %v5104_v51  ;;  %v6173_v51 = vld [vmem:[#allocation3 + $0xe0] sm:$0xff] }
 0xaf7   : > { %v8207_v29 = vpop.eup %8206  ;;  %v5131_v34 = vadd.f32 1.0, %v8205_v57  ;;  %v5137_v61 = vmul.f32 %v5129_v56, %v5105_v55  ;;  %v6320_v52 = vld [vmem:[#allocation3 + $0xe1] sm:$0xff] }
 0xaf8   : > { %v8209_v39 = vpop.eup %8208  ;;  %v5132_v53 = vadd.f32 1.0, %v8207_v29  ;;  %v5138_v59 = vmul.f32 %v5130_v33, %v5106_v32  ;;  %5145 = vst.msk [vmem:[#allocation3 + $0x20] sm:$0xff] %vm513_vm2, %v5136_v58 }
 0xaf9   : > { %v8211_v62 = vpop.eup %8210  ;;  %v5133_v2 = vadd.f32 1.0, %v8209_v39  ;;  %v5139_v1 = vmul.f32 %v5131_v34, %v5107_v28  ;;  %5146 = vst.msk [vmem:[#allocation3 + $0x38] sm:$0xff] %vm513_vm2, %v5137_v61 }
 0xafa   : > { %v8213_v3 = vpop.eup %8212  ;;  %v5134_v6 = vadd.f32 1.0, %v8211_v62  ;;  %v5140_v8 = vmul.f32 %v5132_v53, %v5108_v47  ;;  %5147 = vst.msk [vmem:[#allocation3 + $0x50] sm:$0xff] %vm513_vm2, %v5138_v59 }
 0xafb   : > { %v5135_v16 = vadd.f32 1.0, %v8213_v3  ;;  %v5141_v35 = vmul.f32 %v5133_v2, %v5109_v63  ;;  %5148 = vst.msk [vmem:[#allocation3 + $0x68] sm:$0xff] %vm513_vm2, %v5139_v1 }
 0xafc   : > { %v5142_v17 = vmul.f32 %v5134_v6, %v5110_v5  ;;  %5149 = vst.msk [vmem:[#allocation3 + $0x80] sm:$0xff] %vm513_vm2, %v5140_v8 }
 0xafd   : > { %v5143_v20 = vmul.f32 %v5135_v16, %v5111_v9  ;;  %5150 = vst.msk [vmem:[#allocation3 + $0x98] sm:$0xff] %vm513_vm2, %v5141_v35 }
 0xafe   : > { %5151 = vst.msk [vmem:[#allocation3 + $0xb0] sm:$0xff] %vm513_vm2, %v5142_v17 }
 0xaff   : > { %5152 = vst.msk [vmem:[#allocation3 + $0xc8] sm:$0xff] %vm513_vm2, %v5143_v20  ;;  %v9289_v21 = vld [vmem:[#allocation3 + $0x20] sm:$0xff] }
 0xb00   : > { %7746 = vmatmul.mubr.msk.f32.vlgmr.msra.gmra.mrb[8].mxu1 %vm513_vm2, %v9289_v21  ;;  %v9296_v23 = vld [vmem:[#allocation3 + $0x38] sm:$0xff]  ;;  %v5431_v43 = vld [vmem:[#allocation3 + $0x21] sm:$0xff] }
 0xb01   : > { %7758 = vmatpush3.msra.mxu1 %v9271_v7  ;;  %7748 = vmatprep.mubr.msk.f32.mxu1 %vm513_vm2, %v9296_v23  ;;  %v9301_v25 = vld [vmem:[#allocation3 + $0x50] sm:$0xff]  ;;  %v5154_v11 = vld [vmem:[#allocation3 + $0x1f] sm:$0xff] }
 0xb02   : > { %7771 = vmatprep.subr.mxu1 %v6971_v22  ;;  %v9305_v26 = vld [vmem:[#allocation3 + $0x68] sm:$0xff]  ;;  %v9326_v14 = vld [vmem:[#allocation3 + $0x37] sm:$0xff] }
 0xb03   : > { %v9309_v27 = vld [vmem:[#allocation3 + $0x80] sm:$0xff]  ;;  %v9330_v15 = vld [vmem:[#allocation3 + $0x4f] sm:$0xff] }
 0xb04   : > { %7749 = vmatmul.mubr.msk.f32.gmra.mrb[10].mxu1 %vm513_vm2, %v9301_v25  ;;  %v9313_v7 = vld [vmem:[#allocation3 + $0x98] sm:$0xff]  ;;  %v9334_v60 = vld [vmem:[#allocation3 + $0x67] sm:$0xff] }
 0xb05   : > { %7751 = vmatprep.mubr.msk.f32.mxu1 %vm513_vm2, %v9305_v26  ;;  %v9317_v10 = vld [vmem:[#allocation3 + $0xb0] sm:$0xff]  ;;  %v9338_v4 = vld [vmem:[#allocation3 + $0x7f] sm:$0xff] }
 0xb06   : > { %v9342_v38 = vld [vmem:[#allocation3 + $0x97] sm:$0xff]  ;;  %v9346_v42 = vld [vmem:[#allocation3 + $0xaf] sm:$0xff]  ;;  %v9367_v24 = vld [vmem:[#allocation3 + $0x81] sm:$0xff] }
 0xb07   : > { %v9355_v45 = vld [vmem:[#allocation3 + $0x39] sm:$0xff]  ;;  %v9359_v18 = vld [vmem:[#allocation3 + $0x51] sm:$0xff]  ;;  %v9363_v19 = vld [vmem:[#allocation3 + $0x69] sm:$0xff] }
 0xb08   : > { %7752 = vmatmul.mubr.msk.f32.gmra.mrb[12].mxu1 %vm513_vm2, %v9309_v27  ;;  %v9371_v30 = vld [vmem:[#allocation3 + $0x99] sm:$0xff]  ;;  %v9375_v36 = vld [vmem:[#allocation3 + $0xb1] sm:$0xff]  ;;  %v5584_v41 = vld [vmem:[#allocation3 + $0xc7] sm:$0xff] }
 0xb09   : > { %7754 = vmatprep.mubr.msk.f32.mxu1 %vm513_vm2, %v9313_v7  ;;  %v5731_v13 = vld [vmem:[#allocation3 + $0xc8] sm:$0xff] }
 0xb0a   : > { %v5878_v48 = vld [vmem:[#allocation3 + $0xc9] sm:$0xff] }
 0xb0c   : > { %7755 = vmatmul.mubr.msk.f32.gmra.mrb[14].mxu1 %vm513_vm2, %v9317_v10 }
 0xb0d   : > { %7759 = vmatprep.mubr.msk.f32.mxu1 %vm513_vm2, %v5153_v31 }
 0xb10   : > { %7760 = vmatmul.mubr.msk.f32.vlgmr.msra.gmra.mrb[8].mxu1 %vm513_vm2, %v5154_v11 }
 0xb11   : > { %7772 = vmatpush3.msra.mxu1 %v6971_v22  ;;  %7762 = vmatprep.mubr.msk.f32.mxu1 %vm513_vm2, %v9326_v14 }
 0xb12   : > { %7785 = vmatprep.subr.mxu1 %v6980_v12 }
 0xb14   : > { %7763 = vmatmul.mubr.msk.f32.gmra.mrb[10].mxu1 %vm513_vm2, %v9330_v15 }
 0xb15   : > { %7765 = vmatprep.mubr.msk.f32.mxu1 %vm513_vm2, %v9334_v60 }
 0xb18   : > { %7766 = vmatmul.mubr.msk.f32.gmra.mrb[12].mxu1 %vm513_vm2, %v9338_v4 }
 0xb19   : > { %7768 = vmatprep.mubr.msk.f32.mxu1 %vm513_vm2, %v9342_v38 }
 0xb1c   : > { %7769 = vmatmul.mubr.msk.f32.gmra.mrb[14].mxu1 %vm513_vm2, %v9346_v42 }
 0xb1d   : > { %7773 = vmatprep.mubr.msk.f32.mxu1 %vm513_vm2, %v5430_v40 }
 0xb20   : > { %7774 = vmatmul.mubr.msk.f32.vlgmr.msra.gmra.mrb[8].mxu1 %vm513_vm2, %v5431_v43 }
 0xb21   : > { %7786 = vmatpush3.msra.mxu1 %v6980_v12  ;;  %7776 = vmatprep.mubr.msk.f32.mxu1 %vm513_vm2, %v9355_v45 }
 0xb22   : > { %7799 = vmatprep.subr.mxu1 %v6989_v44 }
 0xb24   : > { %7777 = vmatmul.mubr.msk.f32.gmra.mrb[10].mxu1 %vm513_vm2, %v9359_v18 }
 0xb25   : > { %7779 = vmatprep.mubr.msk.f32.mxu1 %vm513_vm2, %v9363_v19 }
 0xb28   : > { %7780 = vmatmul.mubr.msk.f32.gmra.mrb[12].mxu1 %vm513_vm2, %v9367_v24 }
 0xb29   : > { %7782 = vmatprep.mubr.msk.f32.mxu1 %vm513_vm2, %v9371_v30 }
 0xb2c   : > { %7783 = vmatmul.mubr.msk.f32.gmra.mrb[14].mxu1 %vm513_vm2, %v9375_v36 }
 0xb2d   : > { %7787 = vmatprep.mubr.msk.f32.mxu1 %vm513_vm2, %v5154_v11 }
 0xb30   : > { %7788 = vmatmul.mubr.msk.f32.vlgmr.msra.gmra.mrb[8].mxu1 %vm513_vm2, %v9326_v14 }
 0xb31   : > { %7800 = vmatpush3.msra.mxu1 %v6989_v44  ;;  %7790 = vmatprep.mubr.msk.f32.mxu1 %vm513_vm2, %v9330_v15 }
 0xb32   : > { %7813 = vmatprep.subr.mxu1 %v6998_v37 }
 0xb34   : > { %7791 = vmatmul.mubr.msk.f32.gmra.mrb[10].mxu1 %vm513_vm2, %v9334_v60 }
 0xb35   : > { %7793 = vmatprep.mubr.msk.f32.mxu1 %vm513_vm2, %v9338_v4 }
 0xb38   : > { %7794 = vmatmul.mubr.msk.f32.gmra.mrb[12].mxu1 %vm513_vm2, %v9342_v38 }
 0xb39   : > { %7796 = vmatprep.mubr.msk.f32.mxu1 %vm513_vm2, %v9346_v42 }
 0xb3c   : > { %7797 = vmatmul.mubr.msk.f32.gmra.mrb[14].mxu1 %vm513_vm2, %v5584_v41 }
 0xb3d   : > { %7801 = vmatprep.mubr.msk.f32.mxu1 %vm513_vm2, %v9289_v21 }
 0xb40   : > { %7802 = vmatmul.mubr.msk.f32.vlgmr.msra.gmra.mrb[8].mxu1 %vm513_vm2, %v9296_v23 }
 0xb41   : > { %7814 = vmatpush3.msra.mxu1 %v6998_v37  ;;  %7804 = vmatprep.mubr.msk.f32.mxu1 %vm513_vm2, %v9301_v25 }
 0xb42   : > { %7827 = vmatprep.subr.mxu1 %v7007_v0 }
 0xb44   : > { %7805 = vmatmul.mubr.msk.f32.gmra.mrb[10].mxu1 %vm513_vm2, %v9305_v26 }
 0xb45   : > { %7807 = vmatprep.mubr.msk.f32.mxu1 %vm513_vm2, %v9309_v27 }
 0xb48   : > { %7808 = vmatmul.mubr.msk.f32.gmra.mrb[12].mxu1 %vm513_vm2, %v9313_v7 }
 0xb49   : > { %7810 = vmatprep.mubr.msk.f32.mxu1 %vm513_vm2, %v9317_v10 }
 0xb4c   : > { %7811 = vmatmul.mubr.msk.f32.gmra.mrb[14].mxu1 %vm513_vm2, %v5731_v13 }
 0xb4d   : > { %7815 = vmatprep.mubr.msk.f32.mxu1 %vm513_vm2, %v5431_v43 }
 0xb50   : > { %7816 = vmatmul.mubr.msk.f32.vlgmr.msra.gmra.mrb[8].mxu1 %vm513_vm2, %v9355_v45 }
 0xb51   : > { %7828 = vmatpush3.msra.mxu1 %v7007_v0  ;;  %7818 = vmatprep.mubr.msk.f32.mxu1 %vm513_vm2, %v9359_v18 }
 0xb52   : > { %7841 = vmatprep.subr.mxu1 %v7016_v46 }
 0xb54   : > { %7819 = vmatmul.mubr.msk.f32.gmra.mrb[10].mxu1 %vm513_vm2, %v9363_v19 }
 0xb55   : > { %7821 = vmatprep.mubr.msk.f32.mxu1 %vm513_vm2, %v9367_v24 }
 0xb58   : > { %7822 = vmatmul.mubr.msk.f32.gmra.mrb[12].mxu1 %vm513_vm2, %v9371_v30 }
 0xb59   : > { %7824 = vmatprep.mubr.msk.f32.mxu1 %vm513_vm2, %v9375_v36 }
 0xb5c   : > { %7825 = vmatmul.mubr.msk.f32.gmra.mrb[14].mxu1 %vm513_vm2, %v5878_v48 }
 0xb5d   : > { %7829 = vmatprep.mubr.msk.f32.mxu1 %vm513_vm2, %v9326_v14 }
 0xb60   : > { %7830 = vmatmul.mubr.msk.f32.vlgmr.msra.gmra.mrb[8].mxu1 %vm513_vm2, %v9330_v15 }
 0xb61   : > { %7842 = vmatpush3.msra.mxu1 %v7016_v46  ;;  %7832 = vmatprep.mubr.msk.f32.mxu1 %vm513_vm2, %v9334_v60 }
 0xb62   : > { %7855 = vmatprep.subr.mxu1 %v7025_v49 }
 0xb64   : > { %7833 = vmatmul.mubr.msk.f32.gmra.mrb[10].mxu1 %vm513_vm2, %v9338_v4 }
 0xb65   : > { %7835 = vmatprep.mubr.msk.f32.mxu1 %vm513_vm2, %v9342_v38 }
 0xb68   : > { %7836 = vmatmul.mubr.msk.f32.gmra.mrb[12].mxu1 %vm513_vm2, %v9346_v42 }
 0xb69   : > { %7838 = vmatprep.mubr.msk.f32.mxu1 %vm513_vm2, %v5584_v41 }
 0xb6c   : > { %7839 = vmatmul.mubr.msk.f32.gmra.mrb[14].mxu1 %vm513_vm2, %v6026_v50 }
 0xb6d   : > { %7843 = vmatprep.mubr.msk.f32.mxu1 %vm513_vm2, %v9296_v23 }
 0xb70   : > { %7844 = vmatmul.mubr.msk.f32.vlgmr.msra.gmra.mrb[8].mxu1 %vm513_vm2, %v9301_v25 }
 0xb71   : > { %7856 = vmatpush3.msra.mxu1 %v7025_v49  ;;  %7846 = vmatprep.mubr.msk.f32.mxu1 %vm513_vm2, %v9305_v26 }
 0xb74   : > { %7847 = vmatmul.mubr.msk.f32.gmra.mrb[10].mxu1 %vm513_vm2, %v9309_v27 }
 0xb75   : > { %7849 = vmatprep.mubr.msk.f32.mxu1 %vm513_vm2, %v9313_v7 }
 0xb78   : > { %7850 = vmatmul.mubr.msk.f32.gmra.mrb[12].mxu1 %vm513_vm2, %v9317_v10 }
 0xb79   : > { %7852 = vmatprep.mubr.msk.f32.mxu1 %vm513_vm2, %v5731_v13 }
 0xb7c   : > { %7853 = vmatmul.mubr.msk.f32.gmra.mrb[14].mxu1 %vm513_vm2, %v6173_v51  ;;  %v7036_v51 = vld [vmem:[%s476_s15] ss:$0 sm:$0xff] }
 0xb7d   : > { %7857 = vmatprep.mubr.msk.f32.mxu1 %vm513_vm2, %v9355_v45 }
 0xb80   : > { %7858 = vmatmul.mubr.msk.f32.vlgmr.msra.gmra.mrb[8].mxu1 %vm513_vm2, %v9359_v18 }
 0xb81   : > { %7860 = vmatprep.mubr.msk.f32.mxu1 %vm513_vm2, %v9363_v19 }
 0xb84   : > { %7861 = vmatmul.mubr.msk.f32.gmra.mrb[10].mxu1 %vm513_vm2, %v9367_v24 }
 0xb85   : > { %7863 = vmatprep.mubr.msk.f32.mxu1 %vm513_vm2, %v9371_v30 }
 0xb88   : > { %7864 = vmatmul.mubr.msk.f32.gmra.mrb[12].mxu1 %vm513_vm2, %v9375_v36 }
 0xb89   : > { %7866 = vmatprep.mubr.msk.f32.mxu1 %vm513_vm2, %v5878_v48 }
 0xb8c   : > { %7867 = vmatmul.mubr.msk.f32.gmra.mrb[14].mxu1 %vm513_vm2, %v6320_v52 }
 0xc53   : > { %v7859_v54 = vpop.f32.mrb[8].mxu1 }
 0xc54   : > { %v6461_v55 = vsel %vm513_vm2, %v7859_v54, 0.0  ;;  %v6413_v56 = vpop.f32.mrb[9].mxu1 }
 0xc55   : > { %v6460_v57 = vsel %vm513_vm2, %v6413_v56, 0.0 }
 0xc56   : > { %v6462_v32 = vadd.f32 %v6461_v55, %v6460_v57 }
 0xc57   : > { %v7862_v33 = vpop.f32.mrb[10].mxu1 }
 0xc58   : > { %v6423_v58 = vpop.f32.mrb[11].mxu1  ;;  %v6465_v34 = vsel %vm513_vm2, %v7862_v33, 0.0 }
 0xc59   : > { %v6463_v29 = vsel %vm513_vm2, %v6423_v58, 0.0 }
 0xc5a   : > { %v6464_v28 = vadd.f32 %v6463_v29, %v6462_v32 }
 0xc5b   : > { %v7865_v61 = vpop.f32.mrb[12].mxu1 }
 0xc5c   : > { %v6433_v39 = vpop.f32.mrb[13].mxu1  ;;  %v6466_v47 = vadd.f32 %v6465_v34, %v6464_v28  ;;  %v6469_v62 = vsel %vm513_vm2, %v7865_v61, 0.0  ;;  %v7034_v34 = vld [vmem:[%s9529_s12] ss:$0 sm:$0xff] }
 0xc5d   : > { %v6467_v53 = vsel %vm513_vm2, %v6433_v39, 0.0 }
 0xc5e   : > { %v6468_v59 = vadd.f32 %v6467_v53, %v6466_v47 }
 0xc5f   : > { %v7868_v63 = vpop.f32.mrb[14].mxu1 }
 0xc60   : > { %v6443_v2 = vpop.f32.mrb[15].mxu1  ;;  %v6470_v1 = vadd.f32 %v6469_v62, %v6468_v59  ;;  %v6473_v6 = vsel %vm513_vm2, %v7868_v63, 0.0 }
 0xc61   : > { %v6471_v3 = vsel %vm513_vm2, %v6443_v2, 0.0 }
 0xc62   : > { %v6472_v5 = vadd.f32 %v6471_v3, %v6470_v1  ;;  %v7035_v1 = vld [vmem:[%s9530_s13] ss:$0 sm:$0xff] }
 0xc64   : > { %v6474_v8 = vadd.f32 %v6473_v6, %v6472_v5 }
 0xc66   : > { %6475 = vadd.xlane.f32.xlu1 %v6474_v8 }
 0xc77   : > { %6589 = vrot.lane.b32.xlu1 %v7036_v51, %s8226_s16 }
 0xcf3   : > { %v6476_v9 = vpop.xlane.xlu1 %6475 }
 0xcf4   : > { %v6477_v16 = vrot.slane %v6476_v9, 4 }
 0xcf6   : > { %v6478_v35 = vadd.f32 %v6477_v16, %v6476_v9 }
 0xcf8   : > { %v6479_v17 = vrot.slane %v6478_v35, 2 }
 0xcfa   : > { %v6480_v20 = vadd.f32 %v6479_v17, %v6478_v35 }
 0xcfc   : > { %v6481_v21 = vrot.slane %v6480_v20, 1 }
 0xcfe   : > { %v6482_v22 = vadd.f32 %v6481_v21, %v6480_v20 }
 0xd00   : > { %8143 = vpush %v6482_v22 }
 0xd31   : > { %s8144_s25 = spop %8143 }
 0xd32   : > { %s6486_s26 = smul.f32 0.001953125, %s8144_s25  ;;  %s7040_s25 = sshll.u32 %s9534_s30, 6 }
 0xd33   : > { %s481_s28 = scalar_lea.vmem %s9531_s14, %s7040_s25 }
 0xd34   : > { %v6487_v23 = vstv %s6486_s26 }
 0xd35   : > { %v6488_v25 = vsub.f32 %v6413_v56, %v6487_v23  ;;  %v6489_v26 = vsub.f32 %v7859_v54, %v6487_v23  ;;  %v6490_v27 = vsub.f32 %v6423_v58, %v6487_v23  ;;  %v6491_v7 = vsub.f32 %v7862_v33, %v6487_v23 }
 0xd36   : > { %v6492_v31 = vsub.f32 %v6433_v39, %v6487_v23  ;;  %v6493_v14 = vsub.f32 %v7865_v61, %v6487_v23  ;;  %v6494_v40 = vsub.f32 %v6443_v2, %v6487_v23  ;;  %v6495_v45 = vsub.f32 %v7868_v63, %v6487_v23 }
 0xd37   : > { %v6496_v10 = vmul.f32 %v6488_v25, %v6488_v25  ;;  %v6497_v11 = vmul.f32 %v6489_v26, %v6489_v26  ;;  %v6498_v12 = vmul.f32 %v6490_v27, %v6490_v27  ;;  %v6499_v15 = vmul.f32 %v6491_v7, %v6491_v7 }
 0xd38   : > { %v6500_v42 = vmul.f32 %v6492_v31, %v6492_v31  ;;  %v6501_v18 = vmul.f32 %v6493_v14, %v6493_v14  ;;  %v6502_v30 = vmul.f32 %v6494_v40, %v6494_v40  ;;  %v6503_v41 = vmul.f32 %v6495_v45, %v6495_v45 }
 0xd39   : > { %v6504_v60 = vsel %vm513_vm2, %v6496_v10, 0.0  ;;  %v6505_v4 = vsel %vm513_vm2, %v6497_v11, 0.0  ;;  %v6507_v43 = vsel %vm513_vm2, %v6498_v12, 0.0  ;;  %v6509_v19 = vsel %vm513_vm2, %v6499_v15, 0.0 }
 0xd3a   : > { %v6506_v38 = vadd.f32 %v6505_v4, %v6504_v60  ;;  %v6511_v36 = vsel %vm513_vm2, %v6500_v42, 0.0  ;;  %v6513_v0 = vsel %vm513_vm2, %v6501_v18, 0.0  ;;  %v6515_v46 = vsel %vm513_vm2, %v6502_v30, 0.0 }
 0xd3b   : > { %v6517_v49 = vsel %vm513_vm2, %v6503_v41, 0.0 }
 0xd3c   : > { %v6508_v44 = vadd.f32 %v6507_v43, %v6506_v38 }
 0xd3e   : > { %v6510_v24 = vadd.f32 %v6509_v19, %v6508_v44 }
 0xd40   : > { %v6512_v37 = vadd.f32 %v6511_v36, %v6510_v24 }
 0xd42   : > { %v6514_v13 = vadd.f32 %v6513_v0, %v6512_v37 }
 0xd44   : > { %v6516_v48 = vadd.f32 %v6515_v46, %v6514_v13 }
 0xd46   : > { %v6518_v50 = vadd.f32 %v6517_v49, %v6516_v48 }
 0xd48   : > { %6519 = vadd.xlane.f32.xlu0 %v6518_v50 }
 0xdd5   : > { %v6520_v52 = vpop.xlane.xlu0 %6519 }
 0xdd6   : > { %v6521_v54 = vrot.slane %v6520_v52, 4 }
 0xdd8   : > { %v6522_v55 = vadd.f32 %v6521_v54, %v6520_v52 }
 0xdda   : > { %v6523_v56 = vrot.slane %v6522_v55, 2 }
 0xddc   : > { %v6524_v57 = vadd.f32 %v6523_v56, %v6522_v55 }
 0xdde   : > { %v6525_v32 = vrot.slane %v6524_v57, 1 }
 0xde0   : > { %v6526_v33 = vadd.f32 %v6525_v32, %v6524_v57 }
 0xde2   : > { %8145 = vpush %v6526_v33 }
 0xe13   : > { %s8146_s17 = spop %8145 }
 0xe14   : > { %s6530_s18 = smul.f32 0.001953125, %s8146_s17 }
 0xe16   : > { %s6531_s19 = sadd.f32 1e-05, %s6530_s18 }
 0xe18   : > { %v6532_v58 = vstv %s6531_s19 }
 0xe19   : > { %8214 = vrsqrt.f32 %v6532_v58 }
 0xe23   : > { %v8215_v29 = vpop.eup %8214 }
 0xe24   : > { %8147 = vpush %v8215_v29 }
 0xe55   : > { %s8148_s20 = spop %8147 }
 0xe56   : > { %v6535_v28 = vstv %s8148_s20 }
 0xe57   : > { %v6536_v61 = vmul.f32 %v6535_v28, %v6488_v25  ;;  %v6537_v39 = vmul.f32 %v6535_v28, %v6489_v26  ;;  %v6538_v47 = vmul.f32 %v6535_v28, %v6490_v27  ;;  %v6539_v53 = vmul.f32 %v6535_v28, %v6491_v7 }
 0xe58   : > { %v6540_v59 = vmul.f32 %v6535_v28, %v6492_v31  ;;  %v6541_v62 = vmul.f32 %v6535_v28, %v6493_v14  ;;  %v6542_v63 = vmul.f32 %v6535_v28, %v6494_v40  ;;  %v6543_v2 = vmul.f32 %v6535_v28, %v6495_v45  ;;  %v6590_v31 = vpop.permute.xlu1 %6589 }
 0xe59   : > { %v6551_v3 = vmul.f32 %v7034_v34, %v6536_v61  ;;  %v6552_v5 = vmul.f32 %v7034_v34, %v6537_v39  ;;  %v6553_v6 = vmul.f32 %v7034_v34, %v6538_v47  ;;  %v6554_v8 = vmul.f32 %v7034_v34, %v6539_v53 }
 0xe5a   : > { %v6555_v9 = vmul.f32 %v7034_v34, %v6540_v59  ;;  %v6556_v16 = vmul.f32 %v7034_v34, %v6541_v62  ;;  %v6557_v35 = vmul.f32 %v7034_v34, %v6542_v63  ;;  %v6558_v17 = vmul.f32 %v7034_v34, %v6543_v2 }
 0xe5b   : > { %v6566_v20 = vadd.f32 %v7035_v1, %v6551_v3  ;;  %v6567_v21 = vadd.f32 %v7035_v1, %v6552_v5  ;;  %v6568_v22 = vadd.f32 %v7035_v1, %v6553_v6  ;;  %v6569_v23 = vadd.f32 %v7035_v1, %v6554_v8 }
 0xe5c   : > { %v6570_v25 = vadd.f32 %v7035_v1, %v6555_v9  ;;  %v6571_v26 = vadd.f32 %v7035_v1, %v6556_v16  ;;  %v6572_v27 = vadd.f32 %v7035_v1, %v6557_v35  ;;  %v6573_v7 = vadd.f32 %v7035_v1, %v6558_v17 }
 0xe5d   : > { %v6581_v10 = vmul.f32 %v7036_v51, %v6566_v20  ;;  %v6582_v11 = vmul.f32 %v7036_v51, %v6567_v21  ;;  %v6583_v12 = vmul.f32 %v7036_v51, %v6568_v22  ;;  %v6584_v14 = vmul.f32 %v7036_v51, %v6569_v23 }
 0xe5e   : > { %v6585_v15 = vmul.f32 %v7036_v51, %v6570_v25  ;;  %v6586_v60 = vmul.f32 %v7036_v51, %v6571_v26  ;;  %v6587_v4 = vmul.f32 %v7036_v51, %v6572_v27  ;;  %v6588_v38 = vmul.f32 %v7036_v51, %v6573_v7 }
 0xe5f   : > { %v6592_v40 = vadd.f32 %v6590_v31, %v6581_v10  ;;  %v6593_v42 = vadd.f32 %v6590_v31, %v6582_v11  ;;  %v6594_v43 = vadd.f32 %v6590_v31, %v6583_v12  ;;  %v6595_v44 = vadd.f32 %v6590_v31, %v6584_v14 }
 0xe60   : > { %v6596_v45 = vadd.f32 %v6590_v31, %v6585_v15  ;;  %v6597_v18 = vadd.f32 %v6590_v31, %v6586_v60  ;;  %v6598_v19 = vadd.f32 %v6590_v31, %v6587_v4  ;;  %v6599_v24 = vadd.f32 %v6590_v31, %v6588_v38 }
 0xe61   : > { %6600 = vst.msk [vmem:[%s481_s28] sm:$0xff] %vm513_vm2, %v6592_v40  ;;  %6601 = vst.msk [vmem:[%s481_s28 + $0x8] sm:$0xff] %vm513_vm2, %v6593_v42 }
 0xe62   : > { %6602 = vst.msk [vmem:[%s481_s28 + $0x10] sm:$0xff] %vm513_vm2, %v6594_v43  ;;  %6603 = vst.msk [vmem:[%s481_s28 + $0x18] sm:$0xff] %vm513_vm2, %v6595_v44 }
 0xe63   : > { %6604 = vst.msk [vmem:[%s481_s28 + $0x20] sm:$0xff] %vm513_vm2, %v6596_v45  ;;  %6605 = vst.msk [vmem:[%s481_s28 + $0x28] sm:$0xff] %vm513_vm2, %v6597_v18 }
 0xe64   : > { %6606 = vst.msk [vmem:[%s481_s28 + $0x30] sm:$0xff] %vm513_vm2, %v6598_v19  ;;  %6607 = vst.msk [vmem:[%s481_s28 + $0x38] sm:$0xff] %vm513_vm2, %v6599_v24 }
 0xe65 PF: > { %s24_s29 = sadd.s32 1, %s8222_s29  }
 0xe66   : > { %p21_p4 = scmp.ge.s32.totalorder %s24_s29, 4  }
 0xe68   :  { %23 = sbr.rel (!%p21_p4) target bundleno = 1 (0x1), region = 145 }

</bundles_post_ra>
